<compile_context>
chip_gen: v7x
topology: tpu7x:2x2x1
jax: 0.10.0
libtpu: 0.0.40
codegen_flags: <defaults>
</compile_context>

<pallas_src>
import numpy as np

import jax
import jax.numpy as jnp
from jax import lax
from jax.experimental import pallas as pl
from jax.experimental.pallas import tpu as pltpu

_EPS = 1e-5            # PyTorch BatchNorm default eps
_LEAKY_SLOPE = 0.01    # PyTorch LeakyReLU default negative_slope


# ----------------------------------------------------------------------------
# Pallas kernel: whole generator forward for ONE sample (grid iterates batch).
# ----------------------------------------------------------------------------
def _generator_kernel(x_ref, w1_ref, s1_ref, t1_ref, m1_ref,
                      wd1_ref, sd1_ref, td1_ref,
                      c2_ref, wd2_ref, sd2_ref, td2_ref,
                      c3_ref, wd3_ref, sd3_ref, td3_ref,
                      g_ref, wq_ref, bf_ref, o_ref):
    def lrelu(v):
        return jnp.where(v >= 0.0, v, _LEAKY_SLOPE * v)

    def mm(a, b):
        return jnp.dot(a, b, preferred_element_type=jnp.float32)

    # ---- Linear + BatchNorm1d + LeakyReLU (kept as a (hidden, 1) column) ----
    x_row = x_ref[0]                                            # (1, noise)
    h = jnp.sum(w1_ref[...] * x_row, axis=1, keepdims=True)     # (hidden, 1)
    h = lrelu(s1_ref[...] * h + t1_ref[...])

    # ---- DeConv1: input is the 1x1 -> 2x2 nearest upsample (all pixels = h).
    # Patch matrix P1^T (4*hidden, 9): tap block t = h * interior-mask(t).
    p1 = jnp.concatenate([h * m1_ref[t] for t in range(4)], axis=0)
    z1 = jnp.concatenate(
        [lrelu(sd1_ref[...] * mm(wd1_ref[p], p1) + td1_ref[...])
         for p in range(4)], axis=1)                            # (64, 36)

    # ---- DeConv2: gather patches from phase-stacked z1 via 0/1 matmuls.
    p2 = jnp.concatenate([mm(z1, c2_ref[t]) for t in range(4)], axis=0)   # (256, 49)
    z2 = jnp.concatenate(
        [lrelu(sd2_ref[...] * mm(wd2_ref[p], p2) + td2_ref[...])
         for p in range(4)], axis=1)                            # (32, 196)

    # ---- DeConv3: keep the four phase outputs separate for the final conv.
    p3 = jnp.concatenate([mm(z2, c3_ref[t]) for t in range(4)], axis=0)   # (128, 225)
    y3 = [lrelu(sd3_ref[...] * mm(wd3_ref[p], p3) + td3_ref[...])
          for p in range(4)]                                    # 4 x (16, 225)

    # ---- Final Conv2d(16, 1, 3) + Sigmoid, decomposed by output quadrant.
    blocks = []
    for p in range(4):          # input phase (ph, pw)
        for off in range(4):    # spatial offset (dh, dw)
            blocks.append(mm(y3[p], g_ref[off]))                # (16, 196)
    bigb = jnp.concatenate(blocks, axis=0)                      # (256, 196)

    logits = mm(wq_ref[...], bigb) + bf_ref[...]                # (4, 196)
    o_ref[0] = 1.0 / (1.0 + jnp.exp(-logits))


# ----------------------------------------------------------------------------
# Host-side parameter packing (phase kernels, gather matrices, folded BN).
# ----------------------------------------------------------------------------
def _phase_weights(w):
    """ConvTranspose2d weight (Cin, Cout, 4, 4) -> phase weights (4, Cout, 4*Cin).

    Output phase (ph, pw) at position (a, b) reads padded input at (a+th, b+tw)
    with kernel tap (ph + 2*(1-th), pw + 2*(1-tw))."""
    wn = np.asarray(w, np.float32)
    cin, cout = wn.shape[0], wn.shape[1]
    out = np.zeros((4, cout, 4 * cin), np.float32)
    for ph in range(2):
        for pw in range(2):
            p = ph * 2 + pw
            for th in range(2):
                for tw in range(2):
                    t = th * 2 + tw
                    kh = ph + 2 * (1 - th)
                    kw = pw + 2 * (1 - tw)
                    out[p, :, t * cin:(t + 1) * cin] = wn[:, :, kh, kw].T
    return jnp.asarray(out)


def _gather_mats(hin):
    """0/1 selection matrices (4, 4*Mprev, Hp*Hp) mapping the previous layer's
    phase-stacked output lanes to this layer's per-tap patch columns."""
    wp_prev = hin // 2
    mprev = wp_prev * wp_prev
    hp = hin + 1
    mats = np.zeros((4, 4 * mprev, hp * hp), np.float32)
    for th in range(2):
        for tw in range(2):
            t = th * 2 + tw
            for a in range(hp):
                for b in range(hp):
                    i, j = a + th - 1, b + tw - 1
                    if 0 <= i < hin and 0 <= j < hin:
                        src = ((i % 2) * 2 + (j % 2)) * mprev \
                              + (i // 2) * wp_prev + (j // 2)
                        mats[t, src, a * hp + b] = 1.0
    return jnp.asarray(mats)


def pack_params(raw):
    def fold(gamma, beta, mean, var, bias):
        sc = gamma / jnp.sqrt(var + _EPS)
        sh = beta + sc * (bias - mean)
        return sc[:, None].astype(jnp.float32), sh[:, None].astype(jnp.float32)

    p = {}
    # Linear + BatchNorm1d (column orientation: h = W @ x_col).
    p['w1'] = raw['lin_w'].astype(jnp.float32)            # (hidden, noise)
    p['s1'], p['t1'] = fold(raw['bn1']['gamma'], raw['bn1']['beta'],
                            raw['bn1']['mean'], raw['bn1']['var'], raw['lin_b'])

    # DeConv1 interior masks (upsampled 2x2 input, padded to 4x4): (4, 1, 9).
    m1 = np.zeros((4, 1, 9), np.float32)
    for th in range(2):
        for tw in range(2):
            for a in range(3):
                for b in range(3):
                    if 1 <= a + th <= 2 and 1 <= b + tw <= 2:
                        m1[th * 2 + tw, 0, a * 3 + b] = 1.0
    p['m1'] = jnp.asarray(m1)

    # DeConv blocks: phase weights + folded (bias + BatchNorm2d) affine.
    for idx, blk in enumerate(raw['deconv'], start=1):
        p[f'wd{idx}'] = _phase_weights(blk['w'])
        p[f'sd{idx}'], p[f'td{idx}'] = fold(blk['gamma'], blk['beta'],
                                            blk['mean'], blk['var'], blk['b'])

    # Inter-layer gathers (layer input sizes 6 and 14).
    p['c2'] = _gather_mats(6)     # (4, 36, 49)
    p['c3'] = _gather_mats(14)    # (4, 196, 225)

    # Final conv: offset gathers (4, 225, 196) + per-quadrant weights (4, 256).
    g = np.zeros((4, 225, 196), np.float32)
    for dh in range(2):
        for dw in range(2):
            off = dh * 2 + dw
            for gg in range(14):
                for dd in range(14):
                    g[off, (gg + dh) * 15 + (dd + dw), gg * 14 + dd] = 1.0
    p['g'] = jnp.asarray(g)

    wf = np.asarray(raw['conv_w'], np.float32)[0]          # (16, 3, 3)
    wq = np.zeros((4, 256), np.float32)
    for qh in range(2):
        for qw in range(2):
            q = qh * 2 + qw
            for ph in range(2):
                for pw in range(2):
                    for dh in range(2):
                        for dw in range(2):
                            r = ((ph * 2 + pw) * 2 + dh) * 2 + dw
                            kh = 2 * dh + ph - qh
                            kw = 2 * dw + pw - qw
                            if 0 <= kh <= 2 and 0 <= kw <= 2:
                                wq[q, r * 16:(r + 1) * 16] = wf[:, kh, kw]
    p['wq'] = jnp.asarray(wq)
    p['bf'] = raw['conv_b'].reshape(1, 1).astype(jnp.float32)
    return p


# ----------------------------------------------------------------------------
# Pallas wrapper.
# ----------------------------------------------------------------------------
_ARG_ORDER = ('w1', 's1', 't1', 'm1', 'wd1', 'sd1', 'td1',
              'c2', 'wd2', 'sd2', 'td2', 'c3', 'wd3', 'sd3', 'td3',
              'g', 'wq', 'bf')


def generator_forward(packed, x):
    B, noise = x.shape
    x3 = x[:, None, :].astype(jnp.float32)                 # (B, 1, noise)
    consts = [packed[k] for k in _ARG_ORDER]

    def full_spec(a):
        return pl.BlockSpec(a.shape, lambda i, _n=a.ndim: (0,) * _n)

    in_specs = ([pl.BlockSpec((1, 1, noise), lambda i: (i, 0, 0))]
                + [full_spec(a) for a in consts])

    quads = pl.pallas_call(
        _generator_kernel,
        grid=(B,),
        in_specs=in_specs,
        out_specs=pl.BlockSpec((1, 4, 196), lambda i: (i, 0, 0)),
        out_shape=jax.ShapeDtypeStruct((B, 4, 196), jnp.float32),
        compiler_params=pltpu.CompilerParams(
            dimension_semantics=("parallel",)),
    )(x3, *consts)

    # Quadrant-separated (B, 4, 196) -> NCHW image (B, 1, 28, 28).
    q = quads.reshape(B, 2, 2, 14, 14)
    return jnp.transpose(q, (0, 3, 1, 4, 2)).reshape(B, 1, 28, 28)


# ----------------------------------------------------------------------------
# Parameter init (PyTorch-layout "raw" params) + pure-JAX reference forward.
# ----------------------------------------------------------------------------
def init_raw_params(key, noise_features, hidden_features=128):
    keys = iter(jax.random.split(key, 32))

    def rnd(shape, s):
        return jax.random.normal(next(keys), shape, jnp.float32) * s

    def rpos(shape):
        return jax.random.uniform(next(keys), shape, jnp.float32, 0.5, 1.5)

    raw = {
        'lin_w': rnd((hidden_features, noise_features), 0.3),
        'lin_b': rnd((hidden_features,), 0.1),
        'bn1': dict(gamma=rpos((hidden_features,)), beta=rnd((hidden_features,), 0.1),
                    mean=rnd((hidden_features,), 0.1), var=rpos((hidden_features,))),
        'deconv': [],
    }
    for cin, cout in [(hidden_features, 64), (64, 32), (32, 16)]:
        raw['deconv'].append(dict(
            w=rnd((cin, cout, 4, 4), 0.08), b=rnd((cout,), 0.1),
            gamma=rpos((cout,)), beta=rnd((cout,), 0.1),
            mean=rnd((cout,), 0.1), var=rpos((cout,))))
    raw['conv_w'] = rnd((1, 16, 3, 3), 0.1)
    raw['conv_b'] = rnd((1,), 0.1)
    return raw


def reference_forward(raw, x):
    def lrelu(v):
        return jnp.where(v >= 0.0, v, _LEAKY_SLOPE * v)

    # Linear + BatchNorm1d + LeakyReLU
    h = jnp.dot(x, raw['lin_w'].T, precision=lax.Precision.HIGHEST) + raw['lin_b']
    bn = raw['bn1']
    h = (h - bn['mean']) / jnp.sqrt(bn['var'] + _EPS) * bn['gamma'] + bn['beta']
    h = lrelu(h)
    # Unflatten + Upsample(x2, nearest)
    B = x.shape[0]
    img = jnp.broadcast_to(h[:, :, None, None], (B, h.shape[1], 2, 2))
    # DeConv blocks (ConvTranspose2d == dilated conv of the flipped kernel)
    for blk in raw['deconv']:
        w = jnp.transpose(blk['w'][:, :, ::-1, ::-1], (1, 0, 2, 3))  # OIHW
        img = lax.conv_general_dilated(
            img, w, window_strides=(1, 1), padding=[(3, 3), (3, 3)],
            lhs_dilation=(2, 2), dimension_numbers=('NCHW', 'OIHW', 'NCHW'),
            precision=lax.Precision.HIGHEST)
        img = img + blk['b'][None, :, None, None]
        img = ((img - blk['mean'][None, :, None, None])
               / jnp.sqrt(blk['var'][None, :, None, None] + _EPS)
               * blk['gamma'][None, :, None, None]
               + blk['beta'][None, :, None, None])
        img = lrelu(img)          # Dropout2d: identity in eval
    # Final Conv2d + Sigmoid
    img = lax.conv_general_dilated(
        img, raw['conv_w'], (1, 1), 'VALID',
        dimension_numbers=('NCHW', 'OIHW', 'NCHW'),
        precision=lax.Precision.HIGHEST)
    img = img + raw['conv_b'][None, :, None, None]
    return 1.0 / (1.0 + jnp.exp(-img))


if __name__ == "__main__":
    key = jax.random.PRNGKey(0)
    batch, noise_features, hidden_features = 2, 8, 32
    pkey, xkey = jax.random.split(key)

    raw = init_raw_params(pkey, noise_features, hidden_features)
    packed = pack_params(raw)
    x = jax.random.normal(xkey, (batch, noise_features), jnp.float32)

    out = jax.jit(generator_forward)(packed, x)
    out = jax.block_until_ready(out)
    ref = jax.block_until_ready(jax.jit(reference_forward)(raw, x))

    assert out.shape == (batch, 1, 28, 28), out.shape
    assert bool(jnp.all(jnp.isfinite(out)))
    assert bool(jnp.all((out >= 0.0) & (out <= 1.0)))
    err = float(jnp.max(jnp.abs(out - ref)))
    assert err < 2e-2, f"max |pallas - reference| = {err}"
    print("KERNEL_OK")
</pallas_src>

<mosaic_0001>
module attributes {stable_mosaic.version = 11 : i64} {
  func.func @_generator_kernel(%arg0: i32, %arg1: memref<1x1x8xf32, #tpu.memory_space<vmem>>, %arg2: memref<32x8xf32, #tpu.memory_space<vmem>>, %arg3: memref<32x1xf32, #tpu.memory_space<vmem>>, %arg4: memref<32x1xf32, #tpu.memory_space<vmem>>, %arg5: memref<4x1x9xf32, #tpu.memory_space<vmem>>, %arg6: memref<4x64x128xf32, #tpu.memory_space<vmem>>, %arg7: memref<64x1xf32, #tpu.memory_space<vmem>>, %arg8: memref<64x1xf32, #tpu.memory_space<vmem>>, %arg9: memref<4x36x49xf32, #tpu.memory_space<vmem>>, %arg10: memref<4x32x256xf32, #tpu.memory_space<vmem>>, %arg11: memref<32x1xf32, #tpu.memory_space<vmem>>, %arg12: memref<32x1xf32, #tpu.memory_space<vmem>>, %arg13: memref<4x196x225xf32, #tpu.memory_space<vmem>>, %arg14: memref<4x16x128xf32, #tpu.memory_space<vmem>>, %arg15: memref<16x1xf32, #tpu.memory_space<vmem>>, %arg16: memref<16x1xf32, #tpu.memory_space<vmem>>, %arg17: memref<4x225x196xf32, #tpu.memory_space<vmem>>, %arg18: memref<4x256xf32, #tpu.memory_space<vmem>>, %arg19: memref<1x1xf32, #tpu.memory_space<vmem>>, %arg20: memref<1x4x196xf32, #tpu.memory_space<vmem>>) attributes {dimension_semantics = [#tpu.dimension_semantics<parallel>], iteration_bounds = array<i64: 2>, scalar_prefetch = 0 : i64, scratch_operands = 0 : i64, tpu.core_type = #tpu.core_type<tc>, window_params = [{transform_indices = @transform_0, window_bounds = array<i64: 1, 1, 8>}, {pipeline_mode = #tpu.pipeline_mode<synchronous>, transform_indices = @transform_1, window_bounds = array<i64: 32, 8>}, {pipeline_mode = #tpu.pipeline_mode<synchronous>, transform_indices = @transform_2, window_bounds = array<i64: 32, 1>}, {pipeline_mode = #tpu.pipeline_mode<synchronous>, transform_indices = @transform_3, window_bounds = array<i64: 32, 1>}, {pipeline_mode = #tpu.pipeline_mode<synchronous>, transform_indices = @transform_4, window_bounds = array<i64: 4, 1, 9>}, {pipeline_mode = #tpu.pipeline_mode<synchronous>, transform_indices = @transform_5, window_bounds = array<i64: 4, 64, 128>}, {pipeline_mode = #tpu.pipeline_mode<synchronous>, transform_indices = @transform_6, window_bounds = array<i64: 64, 1>}, {pipeline_mode = #tpu.pipeline_mode<synchronous>, transform_indices = @transform_7, window_bounds = array<i64: 64, 1>}, {pipeline_mode = #tpu.pipeline_mode<synchronous>, transform_indices = @transform_8, window_bounds = array<i64: 4, 36, 49>}, {pipeline_mode = #tpu.pipeline_mode<synchronous>, transform_indices = @transform_9, window_bounds = array<i64: 4, 32, 256>}, {pipeline_mode = #tpu.pipeline_mode<synchronous>, transform_indices = @transform_10, window_bounds = array<i64: 32, 1>}, {pipeline_mode = #tpu.pipeline_mode<synchronous>, transform_indices = @transform_11, window_bounds = array<i64: 32, 1>}, {pipeline_mode = #tpu.pipeline_mode<synchronous>, transform_indices = @transform_12, window_bounds = array<i64: 4, 196, 225>}, {pipeline_mode = #tpu.pipeline_mode<synchronous>, transform_indices = @transform_13, window_bounds = array<i64: 4, 16, 128>}, {pipeline_mode = #tpu.pipeline_mode<synchronous>, transform_indices = @transform_14, window_bounds = array<i64: 16, 1>}, {pipeline_mode = #tpu.pipeline_mode<synchronous>, transform_indices = @transform_15, window_bounds = array<i64: 16, 1>}, {pipeline_mode = #tpu.pipeline_mode<synchronous>, transform_indices = @transform_16, window_bounds = array<i64: 4, 225, 196>}, {pipeline_mode = #tpu.pipeline_mode<synchronous>, transform_indices = @transform_17, window_bounds = array<i64: 4, 256>}, {pipeline_mode = #tpu.pipeline_mode<synchronous>, transform_indices = @transform_18, window_bounds = array<i64: 1, 1>}, {transform_indices = @transform_19, window_bounds = array<i64: 1, 4, 196>}]} {
    %c0 = arith.constant 0 : index
    %c0_0 = arith.constant 0 : index
    %c0_1 = arith.constant 0 : index
    %0 = vector.load %arg1[%c0, %c0_0, %c0_1] : memref<1x1x8xf32, #tpu.memory_space<vmem>>, vector<1x1x8xf32>
    %1 = vector.shape_cast %0 : vector<1x1x8xf32> to vector<1x8xf32>
    %c0_2 = arith.constant 0 : index
    %c0_3 = arith.constant 0 : index
    %2 = vector.load %arg2[%c0_2, %c0_3] : memref<32x8xf32, #tpu.memory_space<vmem>>, vector<32x8xf32>
    %3 = vector.broadcast %1 : vector<1x8xf32> to vector<32x8xf32>
    %4 = arith.mulf %2, %3 : vector<32x8xf32>
    %cst = arith.constant dense<0.000000e+00> : vector<32xf32>
    %5 = vector.multi_reduction <add>, %4, %cst [1] : vector<32x8xf32> to vector<32xf32>
    %6 = vector.shape_cast %5 : vector<32xf32> to vector<32x1xf32>
    %c0_4 = arith.constant 0 : index
    %c0_5 = arith.constant 0 : index
    %7 = vector.load %arg3[%c0_4, %c0_5] : memref<32x1xf32, #tpu.memory_space<vmem>>, vector<32x1xf32>
    %8 = arith.mulf %7, %6 : vector<32x1xf32>
    %c0_6 = arith.constant 0 : index
    %c0_7 = arith.constant 0 : index
    %9 = vector.load %arg4[%c0_6, %c0_7] : memref<32x1xf32, #tpu.memory_space<vmem>>, vector<32x1xf32>
    %10 = arith.addf %8, %9 : vector<32x1xf32>
    %cst_8 = arith.constant 0.000000e+00 : f32
    %11 = vector.broadcast %cst_8 : f32 to vector<32x1xf32>
    %12 = arith.cmpf oge, %10, %11 : vector<32x1xf32>
    %cst_9 = arith.constant 0.00999999977 : f32
    %13 = vector.broadcast %cst_9 : f32 to vector<32x1xf32>
    %14 = arith.mulf %13, %10 : vector<32x1xf32>
    %15 = arith.select %12, %10, %14 : vector<32x1xi1>, vector<32x1xf32>
    %c0_10 = arith.constant 0 : index
    %c0_11 = arith.constant 0 : index
    %c0_12 = arith.constant 0 : index
    %16 = vector.load %arg5[%c0_10, %c0_11, %c0_12] : memref<4x1x9xf32, #tpu.memory_space<vmem>>, vector<1x1x9xf32>
    %17 = vector.shape_cast %16 : vector<1x1x9xf32> to vector<1x9xf32>
    %18 = vector.broadcast %15 : vector<32x1xf32> to vector<32x9xf32>
    %19 = vector.broadcast %17 : vector<1x9xf32> to vector<32x9xf32>
    %20 = arith.mulf %18, %19 : vector<32x9xf32>
    %c1 = arith.constant 1 : index
    %c0_13 = arith.constant 0 : index
    %c0_14 = arith.constant 0 : index
    %21 = vector.load %arg5[%c1, %c0_13, %c0_14] : memref<4x1x9xf32, #tpu.memory_space<vmem>>, vector<1x1x9xf32>
    %22 = vector.shape_cast %21 : vector<1x1x9xf32> to vector<1x9xf32>
    %23 = vector.broadcast %15 : vector<32x1xf32> to vector<32x9xf32>
    %24 = vector.broadcast %22 : vector<1x9xf32> to vector<32x9xf32>
    %25 = arith.mulf %23, %24 : vector<32x9xf32>
    %c2 = arith.constant 2 : index
    %c0_15 = arith.constant 0 : index
    %c0_16 = arith.constant 0 : index
    %26 = vector.load %arg5[%c2, %c0_15, %c0_16] : memref<4x1x9xf32, #tpu.memory_space<vmem>>, vector<1x1x9xf32>
    %27 = vector.shape_cast %26 : vector<1x1x9xf32> to vector<1x9xf32>
    %28 = vector.broadcast %15 : vector<32x1xf32> to vector<32x9xf32>
    %29 = vector.broadcast %27 : vector<1x9xf32> to vector<32x9xf32>
    %30 = arith.mulf %28, %29 : vector<32x9xf32>
    %c3 = arith.constant 3 : index
    %c0_17 = arith.constant 0 : index
    %c0_18 = arith.constant 0 : index
    %31 = vector.load %arg5[%c3, %c0_17, %c0_18] : memref<4x1x9xf32, #tpu.memory_space<vmem>>, vector<1x1x9xf32>
    %32 = vector.shape_cast %31 : vector<1x1x9xf32> to vector<1x9xf32>
    %33 = vector.broadcast %15 : vector<32x1xf32> to vector<32x9xf32>
    %34 = vector.broadcast %32 : vector<1x9xf32> to vector<32x9xf32>
    %35 = arith.mulf %33, %34 : vector<32x9xf32>
    %36 = tpu.concatenate %20, %25, %30, %35 in 0 : vector<32x9xf32>, vector<32x9xf32>, vector<32x9xf32>, vector<32x9xf32> -> vector<128x9xf32>
    %c0_19 = arith.constant 0 : index
    %c0_20 = arith.constant 0 : index
    %37 = vector.load %arg7[%c0_19, %c0_20] : memref<64x1xf32, #tpu.memory_space<vmem>>, vector<64x1xf32>
    %c0_21 = arith.constant 0 : index
    %c0_22 = arith.constant 0 : index
    %c0_23 = arith.constant 0 : index
    %38 = vector.load %arg6[%c0_21, %c0_22, %c0_23] : memref<4x64x128xf32, #tpu.memory_space<vmem>>, vector<1x64x128xf32>
    %39 = vector.shape_cast %38 : vector<1x64x128xf32> to vector<64x128xf32>
    %cst_24 = arith.constant dense<0.000000e+00> : vector<64x9xf32>
    %40 = tpu.matmul %39, %36, %cst_24 {dimension_numbers = #tpu.dot_dimension_numbers<[1], [0], [0], [1], [0, 0, 1, 1], [], []>} : vector<64x128xf32>, vector<128x9xf32>, vector<64x9xf32> -> vector<64x9xf32>
    %41 = vector.broadcast %37 : vector<64x1xf32> to vector<64x9xf32>
    %42 = arith.mulf %41, %40 : vector<64x9xf32>
    %c0_25 = arith.constant 0 : index
    %c0_26 = arith.constant 0 : index
    %43 = vector.load %arg8[%c0_25, %c0_26] : memref<64x1xf32, #tpu.memory_space<vmem>>, vector<64x1xf32>
    %44 = vector.broadcast %43 : vector<64x1xf32> to vector<64x9xf32>
    %45 = arith.addf %42, %44 : vector<64x9xf32>
    %cst_27 = arith.constant 0.000000e+00 : f32
    %46 = vector.broadcast %cst_27 : f32 to vector<64x9xf32>
    %47 = arith.cmpf oge, %45, %46 : vector<64x9xf32>
    %cst_28 = arith.constant 0.00999999977 : f32
    %48 = vector.broadcast %cst_28 : f32 to vector<64x9xf32>
    %49 = arith.mulf %48, %45 : vector<64x9xf32>
    %50 = arith.select %47, %45, %49 : vector<64x9xi1>, vector<64x9xf32>
    %c0_29 = arith.constant 0 : index
    %c0_30 = arith.constant 0 : index
    %51 = vector.load %arg7[%c0_29, %c0_30] : memref<64x1xf32, #tpu.memory_space<vmem>>, vector<64x1xf32>
    %c1_31 = arith.constant 1 : index
    %c0_32 = arith.constant 0 : index
    %c0_33 = arith.constant 0 : index
    %52 = vector.load %arg6[%c1_31, %c0_32, %c0_33] : memref<4x64x128xf32, #tpu.memory_space<vmem>>, vector<1x64x128xf32>
    %53 = vector.shape_cast %52 : vector<1x64x128xf32> to vector<64x128xf32>
    %cst_34 = arith.constant dense<0.000000e+00> : vector<64x9xf32>
    %54 = tpu.matmul %53, %36, %cst_34 {dimension_numbers = #tpu.dot_dimension_numbers<[1], [0], [0], [1], [0, 0, 1, 1], [], []>} : vector<64x128xf32>, vector<128x9xf32>, vector<64x9xf32> -> vector<64x9xf32>
    %55 = vector.broadcast %51 : vector<64x1xf32> to vector<64x9xf32>
    %56 = arith.mulf %55, %54 : vector<64x9xf32>
    %c0_35 = arith.constant 0 : index
    %c0_36 = arith.constant 0 : index
    %57 = vector.load %arg8[%c0_35, %c0_36] : memref<64x1xf32, #tpu.memory_space<vmem>>, vector<64x1xf32>
    %58 = vector.broadcast %57 : vector<64x1xf32> to vector<64x9xf32>
    %59 = arith.addf %56, %58 : vector<64x9xf32>
    %cst_37 = arith.constant 0.000000e+00 : f32
    %60 = vector.broadcast %cst_37 : f32 to vector<64x9xf32>
    %61 = arith.cmpf oge, %59, %60 : vector<64x9xf32>
    %cst_38 = arith.constant 0.00999999977 : f32
    %62 = vector.broadcast %cst_38 : f32 to vector<64x9xf32>
    %63 = arith.mulf %62, %59 : vector<64x9xf32>
    %64 = arith.select %61, %59, %63 : vector<64x9xi1>, vector<64x9xf32>
    %c0_39 = arith.constant 0 : index
    %c0_40 = arith.constant 0 : index
    %65 = vector.load %arg7[%c0_39, %c0_40] : memref<64x1xf32, #tpu.memory_space<vmem>>, vector<64x1xf32>
    %c2_41 = arith.constant 2 : index
    %c0_42 = arith.constant 0 : index
    %c0_43 = arith.constant 0 : index
    %66 = vector.load %arg6[%c2_41, %c0_42, %c0_43] : memref<4x64x128xf32, #tpu.memory_space<vmem>>, vector<1x64x128xf32>
    %67 = vector.shape_cast %66 : vector<1x64x128xf32> to vector<64x128xf32>
    %cst_44 = arith.constant dense<0.000000e+00> : vector<64x9xf32>
    %68 = tpu.matmul %67, %36, %cst_44 {dimension_numbers = #tpu.dot_dimension_numbers<[1], [0], [0], [1], [0, 0, 1, 1], [], []>} : vector<64x128xf32>, vector<128x9xf32>, vector<64x9xf32> -> vector<64x9xf32>
    %69 = vector.broadcast %65 : vector<64x1xf32> to vector<64x9xf32>
    %70 = arith.mulf %69, %68 : vector<64x9xf32>
    %c0_45 = arith.constant 0 : index
    %c0_46 = arith.constant 0 : index
    %71 = vector.load %arg8[%c0_45, %c0_46] : memref<64x1xf32, #tpu.memory_space<vmem>>, vector<64x1xf32>
    %72 = vector.broadcast %71 : vector<64x1xf32> to vector<64x9xf32>
    %73 = arith.addf %70, %72 : vector<64x9xf32>
    %cst_47 = arith.constant 0.000000e+00 : f32
    %74 = vector.broadcast %cst_47 : f32 to vector<64x9xf32>
    %75 = arith.cmpf oge, %73, %74 : vector<64x9xf32>
    %cst_48 = arith.constant 0.00999999977 : f32
    %76 = vector.broadcast %cst_48 : f32 to vector<64x9xf32>
    %77 = arith.mulf %76, %73 : vector<64x9xf32>
    %78 = arith.select %75, %73, %77 : vector<64x9xi1>, vector<64x9xf32>
    %c0_49 = arith.constant 0 : index
    %c0_50 = arith.constant 0 : index
    %79 = vector.load %arg7[%c0_49, %c0_50] : memref<64x1xf32, #tpu.memory_space<vmem>>, vector<64x1xf32>
    %c3_51 = arith.constant 3 : index
    %c0_52 = arith.constant 0 : index
    %c0_53 = arith.constant 0 : index
    %80 = vector.load %arg6[%c3_51, %c0_52, %c0_53] : memref<4x64x128xf32, #tpu.memory_space<vmem>>, vector<1x64x128xf32>
    %81 = vector.shape_cast %80 : vector<1x64x128xf32> to vector<64x128xf32>
    %cst_54 = arith.constant dense<0.000000e+00> : vector<64x9xf32>
    %82 = tpu.matmul %81, %36, %cst_54 {dimension_numbers = #tpu.dot_dimension_numbers<[1], [0], [0], [1], [0, 0, 1, 1], [], []>} : vector<64x128xf32>, vector<128x9xf32>, vector<64x9xf32> -> vector<64x9xf32>
    %83 = vector.broadcast %79 : vector<64x1xf32> to vector<64x9xf32>
    %84 = arith.mulf %83, %82 : vector<64x9xf32>
    %c0_55 = arith.constant 0 : index
    %c0_56 = arith.constant 0 : index
    %85 = vector.load %arg8[%c0_55, %c0_56] : memref<64x1xf32, #tpu.memory_space<vmem>>, vector<64x1xf32>
    %86 = vector.broadcast %85 : vector<64x1xf32> to vector<64x9xf32>
    %87 = arith.addf %84, %86 : vector<64x9xf32>
    %cst_57 = arith.constant 0.000000e+00 : f32
    %88 = vector.broadcast %cst_57 : f32 to vector<64x9xf32>
    %89 = arith.cmpf oge, %87, %88 : vector<64x9xf32>
    %cst_58 = arith.constant 0.00999999977 : f32
    %90 = vector.broadcast %cst_58 : f32 to vector<64x9xf32>
    %91 = arith.mulf %90, %87 : vector<64x9xf32>
    %92 = arith.select %89, %87, %91 : vector<64x9xi1>, vector<64x9xf32>
    %93 = tpu.concatenate %50, %64, %78, %92 in 1 : vector<64x9xf32>, vector<64x9xf32>, vector<64x9xf32>, vector<64x9xf32> -> vector<64x36xf32>
    %c0_59 = arith.constant 0 : index
    %c0_60 = arith.constant 0 : index
    %c0_61 = arith.constant 0 : index
    %94 = vector.load %arg9[%c0_59, %c0_60, %c0_61] : memref<4x36x49xf32, #tpu.memory_space<vmem>>, vector<1x36x49xf32>
    %95 = vector.shape_cast %94 : vector<1x36x49xf32> to vector<36x49xf32>
    %cst_62 = arith.constant dense<0.000000e+00> : vector<64x49xf32>
    %96 = tpu.matmul %93, %95, %cst_62 {dimension_numbers = #tpu.dot_dimension_numbers<[1], [0], [0], [1], [0, 0, 1, 1], [], []>} : vector<64x36xf32>, vector<36x49xf32>, vector<64x49xf32> -> vector<64x49xf32>
    %c1_63 = arith.constant 1 : index
    %c0_64 = arith.constant 0 : index
    %c0_65 = arith.constant 0 : index
    %97 = vector.load %arg9[%c1_63, %c0_64, %c0_65] : memref<4x36x49xf32, #tpu.memory_space<vmem>>, vector<1x36x49xf32>
    %98 = vector.shape_cast %97 : vector<1x36x49xf32> to vector<36x49xf32>
    %cst_66 = arith.constant dense<0.000000e+00> : vector<64x49xf32>
    %99 = tpu.matmul %93, %98, %cst_66 {dimension_numbers = #tpu.dot_dimension_numbers<[1], [0], [0], [1], [0, 0, 1, 1], [], []>} : vector<64x36xf32>, vector<36x49xf32>, vector<64x49xf32> -> vector<64x49xf32>
    %c2_67 = arith.constant 2 : index
    %c0_68 = arith.constant 0 : index
    %c0_69 = arith.constant 0 : index
    %100 = vector.load %arg9[%c2_67, %c0_68, %c0_69] : memref<4x36x49xf32, #tpu.memory_space<vmem>>, vector<1x36x49xf32>
    %101 = vector.shape_cast %100 : vector<1x36x49xf32> to vector<36x49xf32>
    %cst_70 = arith.constant dense<0.000000e+00> : vector<64x49xf32>
    %102 = tpu.matmul %93, %101, %cst_70 {dimension_numbers = #tpu.dot_dimension_numbers<[1], [0], [0], [1], [0, 0, 1, 1], [], []>} : vector<64x36xf32>, vector<36x49xf32>, vector<64x49xf32> -> vector<64x49xf32>
    %c3_71 = arith.constant 3 : index
    %c0_72 = arith.constant 0 : index
    %c0_73 = arith.constant 0 : index
    %103 = vector.load %arg9[%c3_71, %c0_72, %c0_73] : memref<4x36x49xf32, #tpu.memory_space<vmem>>, vector<1x36x49xf32>
    %104 = vector.shape_cast %103 : vector<1x36x49xf32> to vector<36x49xf32>
    %cst_74 = arith.constant dense<0.000000e+00> : vector<64x49xf32>
    %105 = tpu.matmul %93, %104, %cst_74 {dimension_numbers = #tpu.dot_dimension_numbers<[1], [0], [0], [1], [0, 0, 1, 1], [], []>} : vector<64x36xf32>, vector<36x49xf32>, vector<64x49xf32> -> vector<64x49xf32>
    %106 = tpu.concatenate %96, %99, %102, %105 in 0 : vector<64x49xf32>, vector<64x49xf32>, vector<64x49xf32>, vector<64x49xf32> -> vector<256x49xf32>
    %c0_75 = arith.constant 0 : index
    %c0_76 = arith.constant 0 : index
    %107 = vector.load %arg11[%c0_75, %c0_76] : memref<32x1xf32, #tpu.memory_space<vmem>>, vector<32x1xf32>
    %c0_77 = arith.constant 0 : index
    %c0_78 = arith.constant 0 : index
    %c0_79 = arith.constant 0 : index
    %108 = vector.load %arg10[%c0_77, %c0_78, %c0_79] : memref<4x32x256xf32, #tpu.memory_space<vmem>>, vector<1x32x256xf32>
    %109 = vector.shape_cast %108 : vector<1x32x256xf32> to vector<32x256xf32>
    %cst_80 = arith.constant dense<0.000000e+00> : vector<32x49xf32>
    %110 = tpu.matmul %109, %106, %cst_80 {dimension_numbers = #tpu.dot_dimension_numbers<[1], [0], [0], [1], [0, 0, 1, 1], [], []>} : vector<32x256xf32>, vector<256x49xf32>, vector<32x49xf32> -> vector<32x49xf32>
    %111 = vector.broadcast %107 : vector<32x1xf32> to vector<32x49xf32>
    %112 = arith.mulf %111, %110 : vector<32x49xf32>
    %c0_81 = arith.constant 0 : index
    %c0_82 = arith.constant 0 : index
    %113 = vector.load %arg12[%c0_81, %c0_82] : memref<32x1xf32, #tpu.memory_space<vmem>>, vector<32x1xf32>
    %114 = vector.broadcast %113 : vector<32x1xf32> to vector<32x49xf32>
    %115 = arith.addf %112, %114 : vector<32x49xf32>
    %cst_83 = arith.constant 0.000000e+00 : f32
    %116 = vector.broadcast %cst_83 : f32 to vector<32x49xf32>
    %117 = arith.cmpf oge, %115, %116 : vector<32x49xf32>
    %cst_84 = arith.constant 0.00999999977 : f32
    %118 = vector.broadcast %cst_84 : f32 to vector<32x49xf32>
    %119 = arith.mulf %118, %115 : vector<32x49xf32>
    %120 = arith.select %117, %115, %119 : vector<32x49xi1>, vector<32x49xf32>
    %c0_85 = arith.constant 0 : index
    %c0_86 = arith.constant 0 : index
    %121 = vector.load %arg11[%c0_85, %c0_86] : memref<32x1xf32, #tpu.memory_space<vmem>>, vector<32x1xf32>
    %c1_87 = arith.constant 1 : index
    %c0_88 = arith.constant 0 : index
    %c0_89 = arith.constant 0 : index
    %122 = vector.load %arg10[%c1_87, %c0_88, %c0_89] : memref<4x32x256xf32, #tpu.memory_space<vmem>>, vector<1x32x256xf32>
    %123 = vector.shape_cast %122 : vector<1x32x256xf32> to vector<32x256xf32>
    %cst_90 = arith.constant dense<0.000000e+00> : vector<32x49xf32>
    %124 = tpu.matmul %123, %106, %cst_90 {dimension_numbers = #tpu.dot_dimension_numbers<[1], [0], [0], [1], [0, 0, 1, 1], [], []>} : vector<32x256xf32>, vector<256x49xf32>, vector<32x49xf32> -> vector<32x49xf32>
    %125 = vector.broadcast %121 : vector<32x1xf32> to vector<32x49xf32>
    %126 = arith.mulf %125, %124 : vector<32x49xf32>
    %c0_91 = arith.constant 0 : index
    %c0_92 = arith.constant 0 : index
    %127 = vector.load %arg12[%c0_91, %c0_92] : memref<32x1xf32, #tpu.memory_space<vmem>>, vector<32x1xf32>
    %128 = vector.broadcast %127 : vector<32x1xf32> to vector<32x49xf32>
    %129 = arith.addf %126, %128 : vector<32x49xf32>
    %cst_93 = arith.constant 0.000000e+00 : f32
    %130 = vector.broadcast %cst_93 : f32 to vector<32x49xf32>
    %131 = arith.cmpf oge, %129, %130 : vector<32x49xf32>
    %cst_94 = arith.constant 0.00999999977 : f32
    %132 = vector.broadcast %cst_94 : f32 to vector<32x49xf32>
    %133 = arith.mulf %132, %129 : vector<32x49xf32>
    %134 = arith.select %131, %129, %133 : vector<32x49xi1>, vector<32x49xf32>
    %c0_95 = arith.constant 0 : index
    %c0_96 = arith.constant 0 : index
    %135 = vector.load %arg11[%c0_95, %c0_96] : memref<32x1xf32, #tpu.memory_space<vmem>>, vector<32x1xf32>
    %c2_97 = arith.constant 2 : index
    %c0_98 = arith.constant 0 : index
    %c0_99 = arith.constant 0 : index
    %136 = vector.load %arg10[%c2_97, %c0_98, %c0_99] : memref<4x32x256xf32, #tpu.memory_space<vmem>>, vector<1x32x256xf32>
    %137 = vector.shape_cast %136 : vector<1x32x256xf32> to vector<32x256xf32>
    %cst_100 = arith.constant dense<0.000000e+00> : vector<32x49xf32>
    %138 = tpu.matmul %137, %106, %cst_100 {dimension_numbers = #tpu.dot_dimension_numbers<[1], [0], [0], [1], [0, 0, 1, 1], [], []>} : vector<32x256xf32>, vector<256x49xf32>, vector<32x49xf32> -> vector<32x49xf32>
    %139 = vector.broadcast %135 : vector<32x1xf32> to vector<32x49xf32>
    %140 = arith.mulf %139, %138 : vector<32x49xf32>
    %c0_101 = arith.constant 0 : index
    %c0_102 = arith.constant 0 : index
    %141 = vector.load %arg12[%c0_101, %c0_102] : memref<32x1xf32, #tpu.memory_space<vmem>>, vector<32x1xf32>
    %142 = vector.broadcast %141 : vector<32x1xf32> to vector<32x49xf32>
    %143 = arith.addf %140, %142 : vector<32x49xf32>
    %cst_103 = arith.constant 0.000000e+00 : f32
    %144 = vector.broadcast %cst_103 : f32 to vector<32x49xf32>
    %145 = arith.cmpf oge, %143, %144 : vector<32x49xf32>
    %cst_104 = arith.constant 0.00999999977 : f32
    %146 = vector.broadcast %cst_104 : f32 to vector<32x49xf32>
    %147 = arith.mulf %146, %143 : vector<32x49xf32>
    %148 = arith.select %145, %143, %147 : vector<32x49xi1>, vector<32x49xf32>
    %c0_105 = arith.constant 0 : index
    %c0_106 = arith.constant 0 : index
    %149 = vector.load %arg11[%c0_105, %c0_106] : memref<32x1xf32, #tpu.memory_space<vmem>>, vector<32x1xf32>
    %c3_107 = arith.constant 3 : index
    %c0_108 = arith.constant 0 : index
    %c0_109 = arith.constant 0 : index
    %150 = vector.load %arg10[%c3_107, %c0_108, %c0_109] : memref<4x32x256xf32, #tpu.memory_space<vmem>>, vector<1x32x256xf32>
    %151 = vector.shape_cast %150 : vector<1x32x256xf32> to vector<32x256xf32>
    %cst_110 = arith.constant dense<0.000000e+00> : vector<32x49xf32>
    %152 = tpu.matmul %151, %106, %cst_110 {dimension_numbers = #tpu.dot_dimension_numbers<[1], [0], [0], [1], [0, 0, 1, 1], [], []>} : vector<32x256xf32>, vector<256x49xf32>, vector<32x49xf32> -> vector<32x49xf32>
    %153 = vector.broadcast %149 : vector<32x1xf32> to vector<32x49xf32>
    %154 = arith.mulf %153, %152 : vector<32x49xf32>
    %c0_111 = arith.constant 0 : index
    %c0_112 = arith.constant 0 : index
    %155 = vector.load %arg12[%c0_111, %c0_112] : memref<32x1xf32, #tpu.memory_space<vmem>>, vector<32x1xf32>
    %156 = vector.broadcast %155 : vector<32x1xf32> to vector<32x49xf32>
    %157 = arith.addf %154, %156 : vector<32x49xf32>
    %cst_113 = arith.constant 0.000000e+00 : f32
    %158 = vector.broadcast %cst_113 : f32 to vector<32x49xf32>
    %159 = arith.cmpf oge, %157, %158 : vector<32x49xf32>
    %cst_114 = arith.constant 0.00999999977 : f32
    %160 = vector.broadcast %cst_114 : f32 to vector<32x49xf32>
    %161 = arith.mulf %160, %157 : vector<32x49xf32>
    %162 = arith.select %159, %157, %161 : vector<32x49xi1>, vector<32x49xf32>
    %163 = tpu.concatenate %120, %134, %148, %162 in 1 : vector<32x49xf32>, vector<32x49xf32>, vector<32x49xf32>, vector<32x49xf32> -> vector<32x196xf32>
    %c0_115 = arith.constant 0 : index
    %c0_116 = arith.constant 0 : index
    %c0_117 = arith.constant 0 : index
    %164 = vector.load %arg13[%c0_115, %c0_116, %c0_117] : memref<4x196x225xf32, #tpu.memory_space<vmem>>, vector<1x196x225xf32>
    %165 = vector.shape_cast %164 : vector<1x196x225xf32> to vector<196x225xf32>
    %cst_118 = arith.constant dense<0.000000e+00> : vector<32x225xf32>
    %166 = tpu.matmul %163, %165, %cst_118 {dimension_numbers = #tpu.dot_dimension_numbers<[1], [0], [0], [1], [0, 0, 1, 1], [], []>} : vector<32x196xf32>, vector<196x225xf32>, vector<32x225xf32> -> vector<32x225xf32>
    %c1_119 = arith.constant 1 : index
    %c0_120 = arith.constant 0 : index
    %c0_121 = arith.constant 0 : index
    %167 = vector.load %arg13[%c1_119, %c0_120, %c0_121] : memref<4x196x225xf32, #tpu.memory_space<vmem>>, vector<1x196x225xf32>
    %168 = vector.shape_cast %167 : vector<1x196x225xf32> to vector<196x225xf32>
    %cst_122 = arith.constant dense<0.000000e+00> : vector<32x225xf32>
    %169 = tpu.matmul %163, %168, %cst_122 {dimension_numbers = #tpu.dot_dimension_numbers<[1], [0], [0], [1], [0, 0, 1, 1], [], []>} : vector<32x196xf32>, vector<196x225xf32>, vector<32x225xf32> -> vector<32x225xf32>
    %c2_123 = arith.constant 2 : index
    %c0_124 = arith.constant 0 : index
    %c0_125 = arith.constant 0 : index
    %170 = vector.load %arg13[%c2_123, %c0_124, %c0_125] : memref<4x196x225xf32, #tpu.memory_space<vmem>>, vector<1x196x225xf32>
    %171 = vector.shape_cast %170 : vector<1x196x225xf32> to vector<196x225xf32>
    %cst_126 = arith.constant dense<0.000000e+00> : vector<32x225xf32>
    %172 = tpu.matmul %163, %171, %cst_126 {dimension_numbers = #tpu.dot_dimension_numbers<[1], [0], [0], [1], [0, 0, 1, 1], [], []>} : vector<32x196xf32>, vector<196x225xf32>, vector<32x225xf32> -> vector<32x225xf32>
    %c3_127 = arith.constant 3 : index
    %c0_128 = arith.constant 0 : index
    %c0_129 = arith.constant 0 : index
    %173 = vector.load %arg13[%c3_127, %c0_128, %c0_129] : memref<4x196x225xf32, #tpu.memory_space<vmem>>, vector<1x196x225xf32>
    %174 = vector.shape_cast %173 : vector<1x196x225xf32> to vector<196x225xf32>
    %cst_130 = arith.constant dense<0.000000e+00> : vector<32x225xf32>
    %175 = tpu.matmul %163, %174, %cst_130 {dimension_numbers = #tpu.dot_dimension_numbers<[1], [0], [0], [1], [0, 0, 1, 1], [], []>} : vector<32x196xf32>, vector<196x225xf32>, vector<32x225xf32> -> vector<32x225xf32>
    %176 = tpu.concatenate %166, %169, %172, %175 in 0 : vector<32x225xf32>, vector<32x225xf32>, vector<32x225xf32>, vector<32x225xf32> -> vector<128x225xf32>
    %c0_131 = arith.constant 0 : index
    %c0_132 = arith.constant 0 : index
    %177 = vector.load %arg15[%c0_131, %c0_132] : memref<16x1xf32, #tpu.memory_space<vmem>>, vector<16x1xf32>
    %c0_133 = arith.constant 0 : index
    %c0_134 = arith.constant 0 : index
    %c0_135 = arith.constant 0 : index
    %178 = vector.load %arg14[%c0_133, %c0_134, %c0_135] : memref<4x16x128xf32, #tpu.memory_space<vmem>>, vector<1x16x128xf32>
    %179 = vector.shape_cast %178 : vector<1x16x128xf32> to vector<16x128xf32>
    %cst_136 = arith.constant dense<0.000000e+00> : vector<16x225xf32>
    %180 = tpu.matmul %179, %176, %cst_136 {dimension_numbers = #tpu.dot_dimension_numbers<[1], [0], [0], [1], [0, 0, 1, 1], [], []>} : vector<16x128xf32>, vector<128x225xf32>, vector<16x225xf32> -> vector<16x225xf32>
    %181 = vector.broadcast %177 : vector<16x1xf32> to vector<16x225xf32>
    %182 = arith.mulf %181, %180 : vector<16x225xf32>
    %c0_137 = arith.constant 0 : index
    %c0_138 = arith.constant 0 : index
    %183 = vector.load %arg16[%c0_137, %c0_138] : memref<16x1xf32, #tpu.memory_space<vmem>>, vector<16x1xf32>
    %184 = vector.broadcast %183 : vector<16x1xf32> to vector<16x225xf32>
    %185 = arith.addf %182, %184 : vector<16x225xf32>
    %cst_139 = arith.constant 0.000000e+00 : f32
    %186 = vector.broadcast %cst_139 : f32 to vector<16x225xf32>
    %187 = arith.cmpf oge, %185, %186 : vector<16x225xf32>
    %cst_140 = arith.constant 0.00999999977 : f32
    %188 = vector.broadcast %cst_140 : f32 to vector<16x225xf32>
    %189 = arith.mulf %188, %185 : vector<16x225xf32>
    %190 = arith.select %187, %185, %189 : vector<16x225xi1>, vector<16x225xf32>
    %c0_141 = arith.constant 0 : index
    %c0_142 = arith.constant 0 : index
    %191 = vector.load %arg15[%c0_141, %c0_142] : memref<16x1xf32, #tpu.memory_space<vmem>>, vector<16x1xf32>
    %c1_143 = arith.constant 1 : index
    %c0_144 = arith.constant 0 : index
    %c0_145 = arith.constant 0 : index
    %192 = vector.load %arg14[%c1_143, %c0_144, %c0_145] : memref<4x16x128xf32, #tpu.memory_space<vmem>>, vector<1x16x128xf32>
    %193 = vector.shape_cast %192 : vector<1x16x128xf32> to vector<16x128xf32>
    %cst_146 = arith.constant dense<0.000000e+00> : vector<16x225xf32>
    %194 = tpu.matmul %193, %176, %cst_146 {dimension_numbers = #tpu.dot_dimension_numbers<[1], [0], [0], [1], [0, 0, 1, 1], [], []>} : vector<16x128xf32>, vector<128x225xf32>, vector<16x225xf32> -> vector<16x225xf32>
    %195 = vector.broadcast %191 : vector<16x1xf32> to vector<16x225xf32>
    %196 = arith.mulf %195, %194 : vector<16x225xf32>
    %c0_147 = arith.constant 0 : index
    %c0_148 = arith.constant 0 : index
    %197 = vector.load %arg16[%c0_147, %c0_148] : memref<16x1xf32, #tpu.memory_space<vmem>>, vector<16x1xf32>
    %198 = vector.broadcast %197 : vector<16x1xf32> to vector<16x225xf32>
    %199 = arith.addf %196, %198 : vector<16x225xf32>
    %cst_149 = arith.constant 0.000000e+00 : f32
    %200 = vector.broadcast %cst_149 : f32 to vector<16x225xf32>
    %201 = arith.cmpf oge, %199, %200 : vector<16x225xf32>
    %cst_150 = arith.constant 0.00999999977 : f32
    %202 = vector.broadcast %cst_150 : f32 to vector<16x225xf32>
    %203 = arith.mulf %202, %199 : vector<16x225xf32>
    %204 = arith.select %201, %199, %203 : vector<16x225xi1>, vector<16x225xf32>
    %c0_151 = arith.constant 0 : index
    %c0_152 = arith.constant 0 : index
    %205 = vector.load %arg15[%c0_151, %c0_152] : memref<16x1xf32, #tpu.memory_space<vmem>>, vector<16x1xf32>
    %c2_153 = arith.constant 2 : index
    %c0_154 = arith.constant 0 : index
    %c0_155 = arith.constant 0 : index
    %206 = vector.load %arg14[%c2_153, %c0_154, %c0_155] : memref<4x16x128xf32, #tpu.memory_space<vmem>>, vector<1x16x128xf32>
    %207 = vector.shape_cast %206 : vector<1x16x128xf32> to vector<16x128xf32>
    %cst_156 = arith.constant dense<0.000000e+00> : vector<16x225xf32>
    %208 = tpu.matmul %207, %176, %cst_156 {dimension_numbers = #tpu.dot_dimension_numbers<[1], [0], [0], [1], [0, 0, 1, 1], [], []>} : vector<16x128xf32>, vector<128x225xf32>, vector<16x225xf32> -> vector<16x225xf32>
    %209 = vector.broadcast %205 : vector<16x1xf32> to vector<16x225xf32>
    %210 = arith.mulf %209, %208 : vector<16x225xf32>
    %c0_157 = arith.constant 0 : index
    %c0_158 = arith.constant 0 : index
    %211 = vector.load %arg16[%c0_157, %c0_158] : memref<16x1xf32, #tpu.memory_space<vmem>>, vector<16x1xf32>
    %212 = vector.broadcast %211 : vector<16x1xf32> to vector<16x225xf32>
    %213 = arith.addf %210, %212 : vector<16x225xf32>
    %cst_159 = arith.constant 0.000000e+00 : f32
    %214 = vector.broadcast %cst_159 : f32 to vector<16x225xf32>
    %215 = arith.cmpf oge, %213, %214 : vector<16x225xf32>
    %cst_160 = arith.constant 0.00999999977 : f32
    %216 = vector.broadcast %cst_160 : f32 to vector<16x225xf32>
    %217 = arith.mulf %216, %213 : vector<16x225xf32>
    %218 = arith.select %215, %213, %217 : vector<16x225xi1>, vector<16x225xf32>
    %c0_161 = arith.constant 0 : index
    %c0_162 = arith.constant 0 : index
    %219 = vector.load %arg15[%c0_161, %c0_162] : memref<16x1xf32, #tpu.memory_space<vmem>>, vector<16x1xf32>
    %c3_163 = arith.constant 3 : index
    %c0_164 = arith.constant 0 : index
    %c0_165 = arith.constant 0 : index
    %220 = vector.load %arg14[%c3_163, %c0_164, %c0_165] : memref<4x16x128xf32, #tpu.memory_space<vmem>>, vector<1x16x128xf32>
    %221 = vector.shape_cast %220 : vector<1x16x128xf32> to vector<16x128xf32>
    %cst_166 = arith.constant dense<0.000000e+00> : vector<16x225xf32>
    %222 = tpu.matmul %221, %176, %cst_166 {dimension_numbers = #tpu.dot_dimension_numbers<[1], [0], [0], [1], [0, 0, 1, 1], [], []>} : vector<16x128xf32>, vector<128x225xf32>, vector<16x225xf32> -> vector<16x225xf32>
    %223 = vector.broadcast %219 : vector<16x1xf32> to vector<16x225xf32>
    %224 = arith.mulf %223, %222 : vector<16x225xf32>
    %c0_167 = arith.constant 0 : index
    %c0_168 = arith.constant 0 : index
    %225 = vector.load %arg16[%c0_167, %c0_168] : memref<16x1xf32, #tpu.memory_space<vmem>>, vector<16x1xf32>
    %226 = vector.broadcast %225 : vector<16x1xf32> to vector<16x225xf32>
    %227 = arith.addf %224, %226 : vector<16x225xf32>
    %cst_169 = arith.constant 0.000000e+00 : f32
    %228 = vector.broadcast %cst_169 : f32 to vector<16x225xf32>
    %229 = arith.cmpf oge, %227, %228 : vector<16x225xf32>
    %cst_170 = arith.constant 0.00999999977 : f32
    %230 = vector.broadcast %cst_170 : f32 to vector<16x225xf32>
    %231 = arith.mulf %230, %227 : vector<16x225xf32>
    %232 = arith.select %229, %227, %231 : vector<16x225xi1>, vector<16x225xf32>
    %c0_171 = arith.constant 0 : index
    %c0_172 = arith.constant 0 : index
    %c0_173 = arith.constant 0 : index
    %233 = vector.load %arg17[%c0_171, %c0_172, %c0_173] : memref<4x225x196xf32, #tpu.memory_space<vmem>>, vector<1x225x196xf32>
    %234 = vector.shape_cast %233 : vector<1x225x196xf32> to vector<225x196xf32>
    %cst_174 = arith.constant dense<0.000000e+00> : vector<16x196xf32>
    %235 = tpu.matmul %190, %234, %cst_174 {dimension_numbers = #tpu.dot_dimension_numbers<[1], [0], [0], [1], [0, 0, 1, 1], [], []>} : vector<16x225xf32>, vector<225x196xf32>, vector<16x196xf32> -> vector<16x196xf32>
    %c1_175 = arith.constant 1 : index
    %c0_176 = arith.constant 0 : index
    %c0_177 = arith.constant 0 : index
    %236 = vector.load %arg17[%c1_175, %c0_176, %c0_177] : memref<4x225x196xf32, #tpu.memory_space<vmem>>, vector<1x225x196xf32>
    %237 = vector.shape_cast %236 : vector<1x225x196xf32> to vector<225x196xf32>
    %cst_178 = arith.constant dense<0.000000e+00> : vector<16x196xf32>
    %238 = tpu.matmul %190, %237, %cst_178 {dimension_numbers = #tpu.dot_dimension_numbers<[1], [0], [0], [1], [0, 0, 1, 1], [], []>} : vector<16x225xf32>, vector<225x196xf32>, vector<16x196xf32> -> vector<16x196xf32>
    %c2_179 = arith.constant 2 : index
    %c0_180 = arith.constant 0 : index
    %c0_181 = arith.constant 0 : index
    %239 = vector.load %arg17[%c2_179, %c0_180, %c0_181] : memref<4x225x196xf32, #tpu.memory_space<vmem>>, vector<1x225x196xf32>
    %240 = vector.shape_cast %239 : vector<1x225x196xf32> to vector<225x196xf32>
    %cst_182 = arith.constant dense<0.000000e+00> : vector<16x196xf32>
    %241 = tpu.matmul %190, %240, %cst_182 {dimension_numbers = #tpu.dot_dimension_numbers<[1], [0], [0], [1], [0, 0, 1, 1], [], []>} : vector<16x225xf32>, vector<225x196xf32>, vector<16x196xf32> -> vector<16x196xf32>
    %c3_183 = arith.constant 3 : index
    %c0_184 = arith.constant 0 : index
    %c0_185 = arith.constant 0 : index
    %242 = vector.load %arg17[%c3_183, %c0_184, %c0_185] : memref<4x225x196xf32, #tpu.memory_space<vmem>>, vector<1x225x196xf32>
    %243 = vector.shape_cast %242 : vector<1x225x196xf32> to vector<225x196xf32>
    %cst_186 = arith.constant dense<0.000000e+00> : vector<16x196xf32>
    %244 = tpu.matmul %190, %243, %cst_186 {dimension_numbers = #tpu.dot_dimension_numbers<[1], [0], [0], [1], [0, 0, 1, 1], [], []>} : vector<16x225xf32>, vector<225x196xf32>, vector<16x196xf32> -> vector<16x196xf32>
    %c0_187 = arith.constant 0 : index
    %c0_188 = arith.constant 0 : index
    %c0_189 = arith.constant 0 : index
    %245 = vector.load %arg17[%c0_187, %c0_188, %c0_189] : memref<4x225x196xf32, #tpu.memory_space<vmem>>, vector<1x225x196xf32>
    %246 = vector.shape_cast %245 : vector<1x225x196xf32> to vector<225x196xf32>
    %cst_190 = arith.constant dense<0.000000e+00> : vector<16x196xf32>
    %247 = tpu.matmul %204, %246, %cst_190 {dimension_numbers = #tpu.dot_dimension_numbers<[1], [0], [0], [1], [0, 0, 1, 1], [], []>} : vector<16x225xf32>, vector<225x196xf32>, vector<16x196xf32> -> vector<16x196xf32>
    %c1_191 = arith.constant 1 : index
    %c0_192 = arith.constant 0 : index
    %c0_193 = arith.constant 0 : index
    %248 = vector.load %arg17[%c1_191, %c0_192, %c0_193] : memref<4x225x196xf32, #tpu.memory_space<vmem>>, vector<1x225x196xf32>
    %249 = vector.shape_cast %248 : vector<1x225x196xf32> to vector<225x196xf32>
    %cst_194 = arith.constant dense<0.000000e+00> : vector<16x196xf32>
    %250 = tpu.matmul %204, %249, %cst_194 {dimension_numbers = #tpu.dot_dimension_numbers<[1], [0], [0], [1], [0, 0, 1, 1], [], []>} : vector<16x225xf32>, vector<225x196xf32>, vector<16x196xf32> -> vector<16x196xf32>
    %c2_195 = arith.constant 2 : index
    %c0_196 = arith.constant 0 : index
    %c0_197 = arith.constant 0 : index
    %251 = vector.load %arg17[%c2_195, %c0_196, %c0_197] : memref<4x225x196xf32, #tpu.memory_space<vmem>>, vector<1x225x196xf32>
    %252 = vector.shape_cast %251 : vector<1x225x196xf32> to vector<225x196xf32>
    %cst_198 = arith.constant dense<0.000000e+00> : vector<16x196xf32>
    %253 = tpu.matmul %204, %252, %cst_198 {dimension_numbers = #tpu.dot_dimension_numbers<[1], [0], [0], [1], [0, 0, 1, 1], [], []>} : vector<16x225xf32>, vector<225x196xf32>, vector<16x196xf32> -> vector<16x196xf32>
    %c3_199 = arith.constant 3 : index
    %c0_200 = arith.constant 0 : index
    %c0_201 = arith.constant 0 : index
    %254 = vector.load %arg17[%c3_199, %c0_200, %c0_201] : memref<4x225x196xf32, #tpu.memory_space<vmem>>, vector<1x225x196xf32>
    %255 = vector.shape_cast %254 : vector<1x225x196xf32> to vector<225x196xf32>
    %cst_202 = arith.constant dense<0.000000e+00> : vector<16x196xf32>
    %256 = tpu.matmul %204, %255, %cst_202 {dimension_numbers = #tpu.dot_dimension_numbers<[1], [0], [0], [1], [0, 0, 1, 1], [], []>} : vector<16x225xf32>, vector<225x196xf32>, vector<16x196xf32> -> vector<16x196xf32>
    %c0_203 = arith.constant 0 : index
    %c0_204 = arith.constant 0 : index
    %c0_205 = arith.constant 0 : index
    %257 = vector.load %arg17[%c0_203, %c0_204, %c0_205] : memref<4x225x196xf32, #tpu.memory_space<vmem>>, vector<1x225x196xf32>
    %258 = vector.shape_cast %257 : vector<1x225x196xf32> to vector<225x196xf32>
    %cst_206 = arith.constant dense<0.000000e+00> : vector<16x196xf32>
    %259 = tpu.matmul %218, %258, %cst_206 {dimension_numbers = #tpu.dot_dimension_numbers<[1], [0], [0], [1], [0, 0, 1, 1], [], []>} : vector<16x225xf32>, vector<225x196xf32>, vector<16x196xf32> -> vector<16x196xf32>
    %c1_207 = arith.constant 1 : index
    %c0_208 = arith.constant 0 : index
    %c0_209 = arith.constant 0 : index
    %260 = vector.load %arg17[%c1_207, %c0_208, %c0_209] : memref<4x225x196xf32, #tpu.memory_space<vmem>>, vector<1x225x196xf32>
    %261 = vector.shape_cast %260 : vector<1x225x196xf32> to vector<225x196xf32>
    %cst_210 = arith.constant dense<0.000000e+00> : vector<16x196xf32>
    %262 = tpu.matmul %218, %261, %cst_210 {dimension_numbers = #tpu.dot_dimension_numbers<[1], [0], [0], [1], [0, 0, 1, 1], [], []>} : vector<16x225xf32>, vector<225x196xf32>, vector<16x196xf32> -> vector<16x196xf32>
    %c2_211 = arith.constant 2 : index
    %c0_212 = arith.constant 0 : index
    %c0_213 = arith.constant 0 : index
    %263 = vector.load %arg17[%c2_211, %c0_212, %c0_213] : memref<4x225x196xf32, #tpu.memory_space<vmem>>, vector<1x225x196xf32>
    %264 = vector.shape_cast %263 : vector<1x225x196xf32> to vector<225x196xf32>
    %cst_214 = arith.constant dense<0.000000e+00> : vector<16x196xf32>
    %265 = tpu.matmul %218, %264, %cst_214 {dimension_numbers = #tpu.dot_dimension_numbers<[1], [0], [0], [1], [0, 0, 1, 1], [], []>} : vector<16x225xf32>, vector<225x196xf32>, vector<16x196xf32> -> vector<16x196xf32>
    %c3_215 = arith.constant 3 : index
    %c0_216 = arith.constant 0 : index
    %c0_217 = arith.constant 0 : index
    %266 = vector.load %arg17[%c3_215, %c0_216, %c0_217] : memref<4x225x196xf32, #tpu.memory_space<vmem>>, vector<1x225x196xf32>
    %267 = vector.shape_cast %266 : vector<1x225x196xf32> to vector<225x196xf32>
    %cst_218 = arith.constant dense<0.000000e+00> : vector<16x196xf32>
    %268 = tpu.matmul %218, %267, %cst_218 {dimension_numbers = #tpu.dot_dimension_numbers<[1], [0], [0], [1], [0, 0, 1, 1], [], []>} : vector<16x225xf32>, vector<225x196xf32>, vector<16x196xf32> -> vector<16x196xf32>
    %c0_219 = arith.constant 0 : index
    %c0_220 = arith.constant 0 : index
    %c0_221 = arith.constant 0 : index
    %269 = vector.load %arg17[%c0_219, %c0_220, %c0_221] : memref<4x225x196xf32, #tpu.memory_space<vmem>>, vector<1x225x196xf32>
    %270 = vector.shape_cast %269 : vector<1x225x196xf32> to vector<225x196xf32>
    %cst_222 = arith.constant dense<0.000000e+00> : vector<16x196xf32>
    %271 = tpu.matmul %232, %270, %cst_222 {dimension_numbers = #tpu.dot_dimension_numbers<[1], [0], [0], [1], [0, 0, 1, 1], [], []>} : vector<16x225xf32>, vector<225x196xf32>, vector<16x196xf32> -> vector<16x196xf32>
    %c1_223 = arith.constant 1 : index
    %c0_224 = arith.constant 0 : index
    %c0_225 = arith.constant 0 : index
    %272 = vector.load %arg17[%c1_223, %c0_224, %c0_225] : memref<4x225x196xf32, #tpu.memory_space<vmem>>, vector<1x225x196xf32>
    %273 = vector.shape_cast %272 : vector<1x225x196xf32> to vector<225x196xf32>
    %cst_226 = arith.constant dense<0.000000e+00> : vector<16x196xf32>
    %274 = tpu.matmul %232, %273, %cst_226 {dimension_numbers = #tpu.dot_dimension_numbers<[1], [0], [0], [1], [0, 0, 1, 1], [], []>} : vector<16x225xf32>, vector<225x196xf32>, vector<16x196xf32> -> vector<16x196xf32>
    %c2_227 = arith.constant 2 : index
    %c0_228 = arith.constant 0 : index
    %c0_229 = arith.constant 0 : index
    %275 = vector.load %arg17[%c2_227, %c0_228, %c0_229] : memref<4x225x196xf32, #tpu.memory_space<vmem>>, vector<1x225x196xf32>
    %276 = vector.shape_cast %275 : vector<1x225x196xf32> to vector<225x196xf32>
    %cst_230 = arith.constant dense<0.000000e+00> : vector<16x196xf32>
    %277 = tpu.matmul %232, %276, %cst_230 {dimension_numbers = #tpu.dot_dimension_numbers<[1], [0], [0], [1], [0, 0, 1, 1], [], []>} : vector<16x225xf32>, vector<225x196xf32>, vector<16x196xf32> -> vector<16x196xf32>
    %c3_231 = arith.constant 3 : index
    %c0_232 = arith.constant 0 : index
    %c0_233 = arith.constant 0 : index
    %278 = vector.load %arg17[%c3_231, %c0_232, %c0_233] : memref<4x225x196xf32, #tpu.memory_space<vmem>>, vector<1x225x196xf32>
    %279 = vector.shape_cast %278 : vector<1x225x196xf32> to vector<225x196xf32>
    %cst_234 = arith.constant dense<0.000000e+00> : vector<16x196xf32>
    %280 = tpu.matmul %232, %279, %cst_234 {dimension_numbers = #tpu.dot_dimension_numbers<[1], [0], [0], [1], [0, 0, 1, 1], [], []>} : vector<16x225xf32>, vector<225x196xf32>, vector<16x196xf32> -> vector<16x196xf32>
    %281 = tpu.concatenate %235, %238, %241, %244, %247, %250, %253, %256, %259, %262, %265, %268, %271, %274, %277, %280 in 0 : vector<16x196xf32>, vector<16x196xf32>, vector<16x196xf32>, vector<16x196xf32>, vector<16x196xf32>, vector<16x196xf32>, vector<16x196xf32>, vector<16x196xf32>, vector<16x196xf32>, vector<16x196xf32>, vector<16x196xf32>, vector<16x196xf32>, vector<16x196xf32>, vector<16x196xf32>, vector<16x196xf32>, vector<16x196xf32> -> vector<256x196xf32>
    %c0_235 = arith.constant 0 : index
    %c0_236 = arith.constant 0 : index
    %282 = vector.load %arg18[%c0_235, %c0_236] : memref<4x256xf32, #tpu.memory_space<vmem>>, vector<4x256xf32>
    %cst_237 = arith.constant dense<0.000000e+00> : vector<4x196xf32>
    %283 = tpu.matmul %282, %281, %cst_237 {dimension_numbers = #tpu.dot_dimension_numbers<[1], [0], [0], [1], [0, 0, 1, 1], [], []>} : vector<4x256xf32>, vector<256x196xf32>, vector<4x196xf32> -> vector<4x196xf32>
    %c0_238 = arith.constant 0 : index
    %c0_239 = arith.constant 0 : index
    %284 = vector.load %arg19[%c0_238, %c0_239] : memref<1x1xf32, #tpu.memory_space<vmem>>, vector<1x1xf32>
    %285 = vector.broadcast %284 : vector<1x1xf32> to vector<4x196xf32>
    %286 = arith.addf %283, %285 : vector<4x196xf32>
    %cst_240 = arith.constant 0.000000e+00 : f32
    %287 = vector.broadcast %cst_240 : f32 to vector<4x196xf32>
    %288 = arith.subf %287, %286 : vector<4x196xf32>
    %289 = math.exp %288 : vector<4x196xf32>
    %cst_241 = arith.constant 1.000000e+00 : f32
    %290 = vector.broadcast %cst_241 : f32 to vector<4x196xf32>
    %291 = arith.addf %290, %289 : vector<4x196xf32>
    %cst_242 = arith.constant 1.000000e+00 : f32
    %292 = vector.broadcast %cst_242 : f32 to vector<4x196xf32>
    %293 = arith.divf %292, %291 : vector<4x196xf32>
    %c0_243 = arith.constant 0 : index
    %c0_244 = arith.constant 0 : index
    %c0_245 = arith.constant 0 : index
    %294 = vector.load %arg20[%c0_243, %c0_244, %c0_245] : memref<1x4x196xf32, #tpu.memory_space<vmem>>, vector<1x4x196xf32>
    %295 = vector.shape_cast %294 : vector<1x4x196xf32> to vector<4x196xf32>
    %296 = vector.shape_cast %293 : vector<4x196xf32> to vector<1x4x196xf32>
    tpu.vector_store %arg20[%c0_243, %c0_244, %c0_245], %296 {strides = array<i32>} : memref<1x4x196xf32, #tpu.memory_space<vmem>>, vector<1x4x196xf32>,
    return
  }
  func.func @transform_0(%arg0: i32) -> (i32, i32, i32) {
    %c0_i32 = arith.constant 0 : i32
    %c0_i32_0 = arith.constant 0 : i32
    %c0_i32_1 = arith.constant 0 : i32
    return %arg0, %c0_i32, %c0_i32_0 : i32, i32, i32
  }
  func.func @transform_1(%arg0: i32) -> (i32, i32) {
    %c0_i32 = arith.constant 0 : i32
    %c0_i32_0 = arith.constant 0 : i32
    %c0_i32_1 = arith.constant 0 : i32
    return %c0_i32, %c0_i32_0 : i32, i32
  }
  func.func @transform_2(%arg0: i32) -> (i32, i32) {
    %c0_i32 = arith.constant 0 : i32
    %c0_i32_0 = arith.constant 0 : i32
    %c0_i32_1 = arith.constant 0 : i32
    return %c0_i32, %c0_i32_0 : i32, i32
  }
  func.func @transform_3(%arg0: i32) -> (i32, i32) {
    %c0_i32 = arith.constant 0 : i32
    %c0_i32_0 = arith.constant 0 : i32
    %c0_i32_1 = arith.constant 0 : i32
    return %c0_i32, %c0_i32_0 : i32, i32
  }
  func.func @transform_4(%arg0: i32) -> (i32, i32, i32) {
    %c0_i32 = arith.constant 0 : i32
    %c0_i32_0 = arith.constant 0 : i32
    %c0_i32_1 = arith.constant 0 : i32
    %c0_i32_2 = arith.constant 0 : i32
    return %c0_i32, %c0_i32_0, %c0_i32_1 : i32, i32, i32
  }
  func.func @transform_5(%arg0: i32) -> (i32, i32, i32) {
    %c0_i32 = arith.constant 0 : i32
    %c0_i32_0 = arith.constant 0 : i32
    %c0_i32_1 = arith.constant 0 : i32
    %c0_i32_2 = arith.constant 0 : i32
    return %c0_i32, %c0_i32_0, %c0_i32_1 : i32, i32, i32
  }
  func.func @transform_6(%arg0: i32) -> (i32, i32) {
    %c0_i32 = arith.constant 0 : i32
    %c0_i32_0 = arith.constant 0 : i32
    %c0_i32_1 = arith.constant 0 : i32
    return %c0_i32, %c0_i32_0 : i32, i32
  }
  func.func @transform_7(%arg0: i32) -> (i32, i32) {
    %c0_i32 = arith.constant 0 : i32
    %c0_i32_0 = arith.constant 0 : i32
    %c0_i32_1 = arith.constant 0 : i32
    return %c0_i32, %c0_i32_0 : i32, i32
  }
  func.func @transform_8(%arg0: i32) -> (i32, i32, i32) {
    %c0_i32 = arith.constant 0 : i32
    %c0_i32_0 = arith.constant 0 : i32
    %c0_i32_1 = arith.constant 0 : i32
    %c0_i32_2 = arith.constant 0 : i32
    return %c0_i32, %c0_i32_0, %c0_i32_1 : i32, i32, i32
  }
  func.func @transform_9(%arg0: i32) -> (i32, i32, i32) {
    %c0_i32 = arith.constant 0 : i32
    %c0_i32_0 = arith.constant 0 : i32
    %c0_i32_1 = arith.constant 0 : i32
    %c0_i32_2 = arith.constant 0 : i32
    return %c0_i32, %c0_i32_0, %c0_i32_1 : i32, i32, i32
  }
  func.func @transform_10(%arg0: i32) -> (i32, i32) {
    %c0_i32 = arith.constant 0 : i32
    %c0_i32_0 = arith.constant 0 : i32
    %c0_i32_1 = arith.constant 0 : i32
    return %c0_i32, %c0_i32_0 : i32, i32
  }
  func.func @transform_11(%arg0: i32) -> (i32, i32) {
    %c0_i32 = arith.constant 0 : i32
    %c0_i32_0 = arith.constant 0 : i32
    %c0_i32_1 = arith.constant 0 : i32
    return %c0_i32, %c0_i32_0 : i32, i32
  }
  func.func @transform_12(%arg0: i32) -> (i32, i32, i32) {
    %c0_i32 = arith.constant 0 : i32
    %c0_i32_0 = arith.constant 0 : i32
    %c0_i32_1 = arith.constant 0 : i32
    %c0_i32_2 = arith.constant 0 : i32
    return %c0_i32, %c0_i32_0, %c0_i32_1 : i32, i32, i32
  }
  func.func @transform_13(%arg0: i32) -> (i32, i32, i32) {
    %c0_i32 = arith.constant 0 : i32
    %c0_i32_0 = arith.constant 0 : i32
    %c0_i32_1 = arith.constant 0 : i32
    %c0_i32_2 = arith.constant 0 : i32
    return %c0_i32, %c0_i32_0, %c0_i32_1 : i32, i32, i32
  }
  func.func @transform_14(%arg0: i32) -> (i32, i32) {
    %c0_i32 = arith.constant 0 : i32
    %c0_i32_0 = arith.constant 0 : i32
    %c0_i32_1 = arith.constant 0 : i32
    return %c0_i32, %c0_i32_0 : i32, i32
  }
  func.func @transform_15(%arg0: i32) -> (i32, i32) {
    %c0_i32 = arith.constant 0 : i32
    %c0_i32_0 = arith.constant 0 : i32
    %c0_i32_1 = arith.constant 0 : i32
    return %c0_i32, %c0_i32_0 : i32, i32
  }
  func.func @transform_16(%arg0: i32) -> (i32, i32, i32) {
    %c0_i32 = arith.constant 0 : i32
    %c0_i32_0 = arith.constant 0 : i32
    %c0_i32_1 = arith.constant 0 : i32
    %c0_i32_2 = arith.constant 0 : i32
    return %c0_i32, %c0_i32_0, %c0_i32_1 : i32, i32, i32
  }
  func.func @transform_17(%arg0: i32) -> (i32, i32) {
    %c0_i32 = arith.constant 0 : i32
    %c0_i32_0 = arith.constant 0 : i32
    %c0_i32_1 = arith.constant 0 : i32
    return %c0_i32, %c0_i32_0 : i32, i32
  }
  func.func @transform_18(%arg0: i32) -> (i32, i32) {
    %c0_i32 = arith.constant 0 : i32
    %c0_i32_0 = arith.constant 0 : i32
    %c0_i32_1 = arith.constant 0 : i32
    return %c0_i32, %c0_i32_0 : i32, i32
  }
  func.func @transform_19(%arg0: i32) -> (i32, i32, i32) {
    %c0_i32 = arith.constant 0 : i32
    %c0_i32_0 = arith.constant 0 : i32
    %c0_i32_1 = arith.constant 0 : i32
    return %arg0, %c0_i32, %c0_i32_0 : i32, i32, i32
  }
}

</mosaic_0001>

<bundles_post_ra>
// kernel: generator_forward.1
= control target key start
LH: loop header
LB: loop body
LE: loop exit
PB: predicated region body
PF: predicated region fallthrough
CT: control target
= control target key end

     0   :  { %s8142_s20 = smov 0   ;;  %s11627_s0 = inlined_call_operand.vmem [shape: f32[2,1,8], index: 0, kind: input, shape index: {}]   ;;  %s11628_s1 = inlined_call_operand.vmem [shape: f32[32,8], index: 1, kind: input, shape index: {}]   ;;  %s11629_s2 = inlined_call_operand.vmem [shape: f32[32,1], index: 2, kind: input, shape index: {}]   ;;  %s11630_s3 = inlined_call_operand.vmem [shape: f32[32,1], index: 3, kind: input, shape index: {}]   ;;  %s11631_s4 = inlined_call_operand.vmem [shape: f32[4,1,9], index: 4, kind: input, shape index: {}]   ;;  %s11632_s5 = inlined_call_operand.vmem [shape: f32[4,64,128], index: 5, kind: input, shape index: {}]   ;;  %s11633_s6 = inlined_call_operand.vmem [shape: f32[64,1], index: 6, kind: input, shape index: {}]   ;;  %s11634_s7 = inlined_call_operand.vmem [shape: f32[64,1], index: 7, kind: input, shape index: {}]   ;;  %s11635_s8 = inlined_call_operand.vmem [shape: f32[4,36,49], index: 8, kind: input, shape index: {}]   ;;  %s11636_s9 = inlined_call_operand.vmem [shape: f32[4,32,256], index: 9, kind: input, shape index: {}]   ;;  %s11637_s10 = inlined_call_operand.vmem [shape: f32[32,1], index: 10, kind: input, shape index: {}]   ;;  %s11638_s11 = inlined_call_operand.vmem [shape: f32[32,1], index: 11, kind: input, shape index: {}]   ;;  %s11639_s12 = inlined_call_operand.vmem [shape: f32[4,196,225], index: 12, kind: input, shape index: {}]   ;;  %s11640_s13 = inlined_call_operand.vmem [shape: f32[4,16,128], index: 13, kind: input, shape index: {}]   ;;  %s11641_s14 = inlined_call_operand.vmem [shape: f32[16,1], index: 14, kind: input, shape index: {}]   ;;  %s11642_s15 = inlined_call_operand.vmem [shape: f32[16,1], index: 15, kind: input, shape index: {}]   ;;  %s11643_s16 = inlined_call_operand.vmem [shape: f32[4,225,196], index: 16, kind: input, shape index: {}]   ;;  %s11644_s17 = inlined_call_operand.vmem [shape: f32[4,256], index: 17, kind: input, shape index: {}]   ;;  %s11645_s18 = inlined_call_operand.<no memory space> [shape: f32[1,1], index: 18, kind: input, shape index: {}]   ;;  %s11646_s19 = inlined_call_operand.vmem [shape: f32[2,4,196], index: 19, kind: output, shape index: {}]  }
   0x1   :  { %11844 = sst [smem:[#allocation104_spill]] %s11627_s0  ;;  %v24_v0 = vstv %s11645_s18 }
   0x2   :  { %11845 = sst [smem:[#allocation105_spill]] %s11628_s1  ;;  %25 = vst [vmem:[#allocation2] sm:$0x1] %v24_v0 }
   0x3   :  { %11846 = sst [smem:[#allocation106_spill]] %s11629_s2 }
   0x4   :  { %11847 = sst [smem:[#allocation107_spill]] %s11630_s3 }
   0x5 LB: > { %s5295_s21 = sadd.s32 4294967295, %s8029_s20   ;;  %p5299_p0 = scmp.ge.s32.totalorder %s8029_s20, 1  ;;  %s8029_s20 = sphi %s8142_s20, %s31_s20  }
   0x6   : > { %p537_p1 = scmp.lt.s32.totalorder %s8029_s20, 3 }
   0x8   : > { %p538_p2 = pnand %p5299_p0, %p537_p1 }
   0xa   : > { %541 = sbr.rel (%p538_p2) target bundleno = 2787 (0xae3), region = 96 }
  0x11   : > { %p591_p3 = scmp.lt.s32.totalorder %s5295_s21, 1  ;;  %s11848_s22 = sld [smem:[#allocation105_spill]]  ;;  %vm614_vm0 = vcmask 64512   ;;  %v8031_v14 = vmov 0   ;;  %v725_v36 = vld [vmem:[%s11633_s6 + $0x18] sm:$0xff]  ;;  %v727_v44 = vld [vmem:[%s11633_s6 + $0x28] sm:$0xff] }
  0x12   : > { %s11849_s29 = sld [smem:[#allocation104_spill]]  ;;  %8003 = vset.pattern.permute.xlu0 %v8031_v14  ;;  %8004 = vset.pattern.permute.xlu1 %v8031_v14  ;;  %s11850_s1 = sld [smem:[#allocation106_spill]]  ;;  %v894_v41 = vld [vmem:[%s11634_s7 + $0x18] sm:$0xff]  ;;  %v896_v46 = vld [vmem:[%s11634_s7 + $0x28] sm:$0xff]  ;;  %v722_v47 = vld [vmem:[%s11633_s6] sm:$0xff] }
  0x13   : > { %s12193_s21 = smov (!%p591_p3, %s5295_s21), 1  ;;  %s11851_s24 = sld [smem:[#allocation107_spill]]  ;;  %v729_v48 = vld [vmem:[%s11633_s6 + $0x38] sm:$0xff]  ;;  %v723_v49 = vld [vmem:[%s11633_s6 + $0x8] sm:$0xff]  ;;  %v891_v51 = vld [vmem:[%s11634_s7] sm:$0xff] }
  0x14   : > { %v898_v50 = vld [vmem:[%s11634_s7 + $0x38] sm:$0xff]  ;;  %v892_v52 = vld [vmem:[%s11634_s7 + $0x8] sm:$0xff]  ;;  %v724_v53 = vld [vmem:[%s11633_s6 + $0x10] sm:$0xff]  ;;  %s8033_s30 = smov 9   ;;  %s8034_s28 = smov 27  }
  0x15   : > { %v893_v54 = vld [vmem:[%s11634_s7 + $0x10] sm:$0xff]  ;;  %v726_v55 = vld [vmem:[%s11633_s6 + $0x20] sm:$0xff]  ;;  %s8035_s25 = smov 49   ;;  %s8036_s26 = smov 98  }
  0x16   : > { %v895_v56 = vld [vmem:[%s11634_s7 + $0x20] sm:$0xff]  ;;  %v728_v59 = vld [vmem:[%s11633_s6 + $0x30] sm:$0xff]  ;;  %s8037_s27 = smov 19   ;;  %s5830_s2 = sshll.u32 %s12193_s21, 3 }
  0x17   : > { %v600_v1 = vld [vmem:[%s11848_s22] sm:$0xff]  ;;  %v601_v2 = vld [vmem:[%s11848_s22 + $0x8] sm:$0xff]  ;;  %v602_v3 = vld [vmem:[%s11848_s22 + $0x10] sm:$0xff]  ;;  %s598_s3 = scalar_lea.vmem %s11646_s19, %s5830_s2 }
  0x18   : > { %v603_v4 = vld [vmem:[%s11848_s22 + $0x18] sm:$0xff]  ;;  %s593_s0 = scalar_lea.vmem %s11849_s29, %s12193_s21  ;;  %v627_v15 = vld [vmem:[%s11850_s1] sm:$0xff]  ;;  %v629_v18 = vld [vmem:[%s11850_s1 + $0x10] sm:$0xff] }
  0x19   : > { %v5302_v5 = vld [vmem:[%s593_s0] ss:$0 sm:$0xff]  ;;  %v628_v21 = vld [vmem:[%s11850_s1 + $0x8] sm:$0xff]  ;;  %v637_v26 = vld [vmem:[%s11851_s24 + $0x10] sm:$0xff]  ;;  %s8032_s0 = smov 18  }
  0x1a   : > { %v610_v6 = vmul.f32 %v5302_v5, %v600_v1  ;;  %v611_v7 = vmul.f32 %v5302_v5, %v601_v2  ;;  %v612_v8 = vmul.f32 %v5302_v5, %v602_v3  ;;  %v613_v9 = vmul.f32 %v5302_v5, %v603_v4  ;;  %v635_v16 = vld [vmem:[%s11851_s24] sm:$0xff]  ;;  %v636_v24 = vld [vmem:[%s11851_s24 + $0x8] sm:$0xff]  ;;  %v630_v27 = vld [vmem:[%s11850_s1 + $0x18] sm:$0xff] }
  0x1b   : > { %v638_v35 = vld [vmem:[%s11851_s24 + $0x18] sm:$0xff]  ;;  %v730_v57 = vld [vmem:[%s11632_s5] sm:$0xff]  ;;  %v897_v60 = vld [vmem:[%s11634_s7 + $0x30] sm:$0xff] }
  0x1c   : > { %v615_v10 = vsel %vm614_vm0, %v610_v6, 0.0  ;;  %v621_v11 = vsel %vm614_vm0, %v612_v8, 0.0  ;;  %v618_v12 = vsel %vm614_vm0, %v611_v7, 0.0  ;;  %v624_v13 = vsel %vm614_vm0, %v613_v9, 0.0  ;;  %v5318_v58 = vld [vmem:[%s11632_s5 + $0x80] sm:$0xff]  ;;  %6187 = vmatprep.mubr.f32.mxu1 %v730_v57  ;;  %v5332_v57 = vld [vmem:[%s11632_s5 + $0xf0] sm:$0xff] }
  0x1d   : > { %616 = vadd.xlane.f32.xlu0 %v615_v10  ;;  %622 = vadd.xlane.f32.xlu1 %v621_v11  ;;  %v5303_v61 = vld [vmem:[%s11631_s4] ss:$0 sm:$0xff]  ;;  %v5305_v4 = vld [vmem:[%s11631_s4 + $0x1] ss:$0 sm:$0xff]  ;;  %v5307_v14 = vld [vmem:[%s11631_s4 + $0x2] ss:$0 sm:$0xff] }
  0x1e   : > { %6275 = vmatprep.mubr.f32.mxu0 %v5318_v58  ;;  %v5333_v58 = vld [vmem:[%s11632_s5 + $0xf8] sm:$0xff] }
  0x21   : > { %619 = vadd.xlane.f32.xlu0 %v618_v12  ;;  %625 = vadd.xlane.f32.xlu1 %v624_v13 }
  0xaa   : > { %v617_v17 = vpop.xlane.xlu0 %616  ;;  %v623_v19 = vpop.xlane.xlu1 %622 }
  0xab   : > { %v631_v20 = vmul.f32 %v627_v15, %v617_v17  ;;  %v633_v23 = vmul.f32 %v629_v18, %v623_v19 }
  0xad   : > { %v639_v22 = vadd.f32 %v635_v16, %v631_v20  ;;  %v641_v32 = vadd.f32 %v637_v26, %v633_v23 }
  0xae   : > { %v620_v25 = vpop.xlane.xlu0 %619  ;;  %v626_v28 = vpop.xlane.xlu1 %625 }
  0xaf   : > { %v632_v29 = vmul.f32 %v628_v21, %v620_v25  ;;  %vm643_vm1 = vcmp.ge.f32.partialorder %v639_v22, 0.0  ;;  %v647_v30 = vmul.f32 0.01, %v639_v22  ;;  %v634_v34 = vmul.f32 %v630_v27, %v626_v28  ;;  %v5309_v21 = vld [vmem:[%s11631_s4 + $0x3] ss:$0 sm:$0xff] }
  0xb0   : > { %v649_v40 = vmul.f32 0.01, %v641_v32  ;;  %vm645_vm3 = vcmp.ge.f32.partialorder %v641_v32, 0.0 }
  0xb1   : > { %v640_v31 = vadd.f32 %v636_v24, %v632_v29  ;;  %v651_v33 = vsel %vm643_vm1, %v639_v22, %v647_v30  ;;  %v642_v38 = vadd.f32 %v638_v35, %v634_v34  ;;  %v731_v29 = vld [vmem:[%s11632_s5 + $0x8] sm:$0xff]  ;;  %v5321_v34 = vld [vmem:[%s11632_s5 + $0x98] sm:$0xff]  ;;  %v734_v35 = vld [vmem:[%s11632_s5 + $0x20] sm:$0xff] }
  0xb2   : > { %658 = vperm.xlu0 %8003, %v651_v33   ;;  %v653_v42 = vsel %vm645_vm3, %v641_v32, %v649_v40  ;;  %v5319_v30 = vld [vmem:[%s11632_s5 + $0x88] sm:$0xff]  ;;  %v5320_v32 = vld [vmem:[%s11632_s5 + $0x90] sm:$0xff]  ;;  %v733_v33 = vld [vmem:[%s11632_s5 + $0x18] sm:$0xff] }
  0xb3   : > { %vm644_vm2 = vcmp.ge.f32.partialorder %v640_v31, 0.0  ;;  %v648_v37 = vmul.f32 0.01, %v640_v31  ;;  %v650_v43 = vmul.f32 0.01, %v642_v38  ;;  %vm646_vm4 = vcmp.ge.f32.partialorder %v642_v38, 0.0 }
  0xb4   : > { %v5324_v40 = vld [vmem:[%s11632_s5 + $0xb0] sm:$0xff] }
  0xb5   : > { %v652_v39 = vsel %vm644_vm2, %v640_v31, %v648_v37  ;;  %v654_v45 = vsel %vm646_vm4, %v642_v38, %v650_v43  ;;  %v732_v31 = vld [vmem:[%s11632_s5 + $0x10] sm:$0xff]  ;;  %v735_v37 = vld [vmem:[%s11632_s5 + $0x28] sm:$0xff]  ;;  %v5310_v43 = vld [vmem:[%s11632_s5 + $0x40] sm:$0xff]  ;;  %vm1586_vm2 = vcmask 1043456  }
  0xb6   : > { %860 = vperm.xlu0 %8003, %v725_v36   ;;  %663 = vperm.xlu1 %8004, %v652_v39   ;;  %v5322_v36 = vld [vmem:[%s11632_s5 + $0xa0] sm:$0xff]  ;;  %v5323_v38 = vld [vmem:[%s11632_s5 + $0xa8] sm:$0xff]  ;;  %v736_v39 = vld [vmem:[%s11632_s5 + $0x30] sm:$0xff] }
  0xba   : > { %916 = vperm.xlu0 %8003, %v894_v41   ;;  %668 = vperm.xlu1 %8004, %v653_v42   ;;  %v737_v41 = vld [vmem:[%s11632_s5 + $0x38] sm:$0xff] }
  0xbb   : > { %v5325_v42 = vld [vmem:[%s11632_s5 + $0xb8] sm:$0xff] }
  0xbe   : > { %870 = vperm.xlu0 %8003, %v727_v44   ;;  %673 = vperm.xlu1 %8004, %v654_v45   ;;  %v5311_v44 = vld [vmem:[%s11632_s5 + $0x48] sm:$0xff]  ;;  %v5312_v45 = vld [vmem:[%s11632_s5 + $0x50] sm:$0xff] }
  0xc2   : > { %926 = vperm.xlu0 %8003, %v896_v46   ;;  %845 = vperm.xlu1 %8004, %v722_v47   ;;  %v5313_v46 = vld [vmem:[%s11632_s5 + $0x58] sm:$0xff]  ;;  %v5314_v47 = vld [vmem:[%s11632_s5 + $0x60] sm:$0xff] }
  0xc6   : > { %880 = vperm.xlu0 %8003, %v729_v48   ;;  %850 = vperm.xlu1 %8004, %v723_v49   ;;  %v5315_v48 = vld [vmem:[%s11632_s5 + $0x68] sm:$0xff]  ;;  %v5316_v49 = vld [vmem:[%s11632_s5 + $0x70] sm:$0xff] }
  0xca   : > { %936 = vperm.xlu0 %8003, %v898_v50   ;;  %901 = vperm.xlu1 %8004, %v891_v51   ;;  %v5317_v50 = vld [vmem:[%s11632_s5 + $0x78] sm:$0xff]  ;;  %v5326_v51 = vld [vmem:[%s11632_s5 + $0xc0] sm:$0xff] }
  0xce   : > { %906 = vperm.xlu1 %8004, %v892_v52   ;;  %v5327_v52 = vld [vmem:[%s11632_s5 + $0xc8] sm:$0xff] }
  0xd2   : > { %855 = vperm.xlu1 %8004, %v724_v53   ;;  %v5328_v53 = vld [vmem:[%s11632_s5 + $0xd0] sm:$0xff] }
  0xd6   : > { %911 = vperm.xlu1 %8004, %v893_v54   ;;  %v5329_v54 = vld [vmem:[%s11632_s5 + $0xd8] sm:$0xff] }
  0xda   : > { %865 = vperm.xlu1 %8004, %v726_v55   ;;  %v5330_v55 = vld [vmem:[%s11632_s5 + $0xe0] sm:$0xff] }
  0xde   : > { %921 = vperm.xlu1 %8004, %v895_v56   ;;  %v5331_v56 = vld [vmem:[%s11632_s5 + $0xe8] sm:$0xff] }
  0xe2   : > { %875 = vperm.xlu1 %8004, %v728_v59  }
  0xe6   : > { %931 = vperm.xlu1 %8004, %v897_v60  }
 0x131   : > { %v659_v62 = vpop.permute.xlu0 %658 }
 0x132   : > { %v682_v0 = vmul.f32 %v5303_v61, %v659_v62  ;;  %v694_v9 = vmul.f32 %v5305_v4, %v659_v62  ;;  %v706_v17 = vmul.f32 %v5307_v14, %v659_v62  ;;  %v718_v24 = vmul.f32 %v5309_v21, %v659_v62 }
 0x135   : > { %v664_v63 = vpop.permute.xlu1 %663 }
 0x136   : > { %v683_v1 = vmul.f32 %v5303_v61, %v664_v63  ;;  %v695_v6 = vmul.f32 %v5305_v4, %v664_v63  ;;  %v707_v15 = vmul.f32 %v5307_v14, %v664_v63  ;;  %v719_v22 = vmul.f32 %v5309_v21, %v664_v63  ;;  %v8436_v63 = vpop.permute.xlu0 %860 }
 0x138   : > { %v8249_v2 = vpack.c.bf16 %v683_v1, %v682_v0  ;;  %v8260_v11 = vpack.c.bf16 %v695_v6, %v694_v9  ;;  %v8277_v18 = vpack.c.bf16 %v707_v15, %v706_v17  ;;  %v8292_v25 = vpack.c.bf16 %v719_v22, %v718_v24 }
 0x139   : > { %v669_v3 = vpop.permute.xlu1 %668 }
 0x13a   : > { %6420 = vmatprep.subr.bf16.mxu1 %v8249_v2  ;;  %6484 = vmatprep.subr.bf16.mxu0 %v8249_v2  ;;  %v684_v7 = vmul.f32 %v5303_v61, %v669_v3  ;;  %v696_v13 = vmul.f32 %v5305_v4, %v669_v3  ;;  %v708_v20 = vmul.f32 %v5307_v14, %v669_v3  ;;  %v8440_v1 = vpop.permute.xlu0 %916 }
 0x13b   : > { %6422 = vmatpush3.bf16.msra.mxu1 %v8249_v2  ;;  %6486 = vmatpush3.bf16.msra.mxu0 %v8249_v2  ;;  %v720_v27 = vmul.f32 %v5309_v21, %v669_v3 }
 0x13d   : > { %v674_v5 = vpop.permute.xlu1 %673 }
 0x13e   : > { %v685_v8 = vmul.f32 %v5303_v61, %v674_v5  ;;  %v697_v12 = vmul.f32 %v5305_v4, %v674_v5  ;;  %v709_v19 = vmul.f32 %v5307_v14, %v674_v5  ;;  %v721_v26 = vmul.f32 %v5309_v21, %v674_v5  ;;  %v8444_v3 = vpop.permute.xlu0 %870 }
 0x140   : > { %v8258_v10 = vpack.c.bf16 %v685_v8, %v684_v7  ;;  %v8271_v16 = vpack.c.bf16 %v697_v12, %v696_v13  ;;  %v8286_v23 = vpack.c.bf16 %v709_v19, %v708_v20  ;;  %v8298_v28 = vpack.c.bf16 %v721_v26, %v720_v27 }
 0x141   : > { %v8428_v59 = vpop.permute.xlu1 %845 }
 0x142   : > { %6424 = vmatprep.subr.bf16.mxu1 %v8258_v10  ;;  %6488 = vmatprep.subr.bf16.mxu0 %v8258_v10  ;;  %v8448_v5 = vpop.permute.xlu0 %926 }
 0x143   : > { %6426 = vmatpush3.bf16.msra.mxu1 %v8258_v10  ;;  %6490 = vmatpush3.bf16.msra.mxu0 %v8258_v10 }
 0x144   : > { %6428 = vmatprep.subr.bf16.mxu1 %v8260_v11  ;;  %6492 = vmatprep.subr.bf16.mxu0 %v8260_v11 }
 0x145   : > { %v8430_v60 = vpop.permute.xlu1 %850 }
 0x146   : > { %v8466_v22 = vpop.permute.xlu0 %880 }
 0x147   : > { %6430 = vmatpush3.bf16.msra.mxu1 %v8260_v11  ;;  %6494 = vmatpush3.bf16.msra.mxu0 %v8260_v11 }
 0x148   : > { %6432 = vmatprep.subr.bf16.mxu1 %v8271_v16  ;;  %6496 = vmatprep.subr.bf16.mxu0 %v8271_v16 }
 0x149   : > { %v8432_v61 = vpop.permute.xlu1 %901 }
 0x14b   : > { %6434 = vmatpush3.bf16.msra.mxu1 %v8271_v16  ;;  %6498 = vmatpush3.bf16.msra.mxu0 %v8271_v16 }
 0x14c   : > { %6436 = vmatprep.subr.bf16.mxu1 %v8277_v18  ;;  %6500 = vmatprep.subr.bf16.mxu0 %v8277_v18 }
 0x14d   : > { %v8434_v62 = vpop.permute.xlu1 %906 }
 0x14f   : > { %6438 = vmatpush3.bf16.msra.mxu1 %v8277_v18  ;;  %6502 = vmatpush3.bf16.msra.mxu0 %v8277_v18 }
 0x150   : > { %6440 = vmatprep.subr.bf16.mxu1 %v8286_v23  ;;  %6504 = vmatprep.subr.bf16.mxu0 %v8286_v23 }
 0x151   : > { %v8438_v0 = vpop.permute.xlu1 %855 }
 0x153   : > { %6442 = vmatpush3.bf16.msra.mxu1 %v8286_v23  ;;  %6506 = vmatpush3.bf16.msra.mxu0 %v8286_v23 }
 0x154   : > { %6444 = vmatprep.subr.bf16.mxu1 %v8292_v25  ;;  %6508 = vmatprep.subr.bf16.mxu0 %v8292_v25 }
 0x157   : > { %6446 = vmatpush3.bf16.msra.mxu1 %v8292_v25  ;;  %6510 = vmatpush3.bf16.msra.mxu0 %v8292_v25 }
 0x158   : > { %6448 = vmatprep.subr.bf16.mxu1 %v8298_v28  ;;  %6512 = vmatprep.subr.bf16.mxu0 %v8298_v28 }
 0x15b   : > { %6450 = vmatpush3.bf16.msra.mxu1 %v8298_v28  ;;  %6514 = vmatpush3.bf16.msra.mxu0 %v8298_v28 }
 0x15c   : > { %6452 = vmatprep.subr.bf16.mxu1 %v8249_v2 }
 0x15e   : > { %6188 = vmatmul.mubr.f32.vlgmr.msra.gmra.mrb[0].mxu1 %v731_v29  ;;  %6276 = vmatmul.mubr.f32.vlgmr.msra.gmra.mrb[0].mxu0 %v5319_v30 }
 0x15f   : > { %6454 = vmatpush3.bf16.msra.mxu1 %v8249_v2  ;;  %6190 = vmatprep.mubr.f32.mxu1 %v732_v31 }
 0x160   : > { %6456 = vmatprep.subr.bf16.mxu1 %v8258_v10  ;;  %6278 = vmatprep.mubr.f32.mxu0 %v5320_v32 }
 0x162   : > { %6191 = vmatmul.mubr.f32.gmra.mrb[2].mxu1 %v733_v33  ;;  %6279 = vmatmul.mubr.f32.gmra.mrb[2].mxu0 %v5321_v34 }
 0x163   : > { %6458 = vmatpush3.bf16.msra.mxu1 %v8258_v10  ;;  %6193 = vmatprep.mubr.f32.mxu1 %v734_v35 }
 0x164   : > { %6460 = vmatprep.subr.bf16.mxu1 %v8260_v11  ;;  %6281 = vmatprep.mubr.f32.mxu0 %v5322_v36 }
 0x166   : > { %6194 = vmatmul.mubr.f32.gmra.mrb[4].mxu1 %v735_v37  ;;  %6282 = vmatmul.mubr.f32.gmra.mrb[4].mxu0 %v5323_v38 }
 0x167   : > { %6462 = vmatpush3.bf16.msra.mxu1 %v8260_v11  ;;  %6196 = vmatprep.mubr.f32.mxu1 %v736_v39 }
 0x168   : > { %6464 = vmatprep.subr.bf16.mxu1 %v8271_v16  ;;  %6284 = vmatprep.mubr.f32.mxu0 %v5324_v40 }
 0x16a   : > { %6197 = vmatmul.mubr.f32.gmra.mrb[6].mxu1 %v737_v41  ;;  %6285 = vmatmul.mubr.f32.gmra.mrb[6].mxu0 %v5325_v42 }
 0x16b   : > { %6466 = vmatpush3.bf16.msra.mxu1 %v8271_v16  ;;  %6231 = vmatprep.mubr.f32.mxu1 %v5310_v43 }
 0x16c   : > { %6468 = vmatprep.subr.bf16.mxu1 %v8277_v18 }
 0x16f   : > { %6470 = vmatpush3.bf16.msra.mxu1 %v8277_v18 }
 0x170   : > { %6472 = vmatprep.subr.bf16.mxu1 %v8286_v23 }
 0x173   : > { %6474 = vmatpush3.bf16.msra.mxu1 %v8286_v23 }
 0x174   : > { %6476 = vmatprep.subr.bf16.mxu1 %v8292_v25 }
 0x177   : > { %6478 = vmatpush3.bf16.msra.mxu1 %v8292_v25 }
 0x178   : > { %6480 = vmatprep.subr.bf16.mxu1 %v8298_v28 }
 0x17b   : > { %6482 = vmatpush3.bf16.msra.mxu1 %v8298_v28 }
 0x17c   : > { %6516 = vmatprep.subr.bf16.mxu1 %v8249_v2 }
 0x17e   : > { %6232 = vmatmul.mubr.f32.vlgmr.msra.gmra.mrb[8].mxu1 %v5311_v44 }
 0x17f   : > { %6518 = vmatpush3.bf16.msra.mxu1 %v8249_v2  ;;  %6234 = vmatprep.mubr.f32.mxu1 %v5312_v45  ;;  %v8442_v2 = vpop.permute.xlu1 %911  ;;  %v8487_v45 = vpop.permute.xlu0 %936 }
 0x180   : > { %6520 = vmatprep.subr.bf16.mxu1 %v8258_v10 }
 0x182   : > { %6235 = vmatmul.mubr.f32.gmra.mrb[10].mxu1 %v5313_v46 }
 0x183   : > { %6522 = vmatpush3.bf16.msra.mxu1 %v8258_v10  ;;  %6237 = vmatprep.mubr.f32.mxu1 %v5314_v47  ;;  %v8446_v4 = vpop.permute.xlu1 %865 }
 0x184   : > { %6524 = vmatprep.subr.bf16.mxu1 %v8260_v11 }
 0x186   : > { %6238 = vmatmul.mubr.f32.gmra.mrb[12].mxu1 %v5315_v48 }
 0x187   : > { %6526 = vmatpush3.bf16.msra.mxu1 %v8260_v11  ;;  %6240 = vmatprep.mubr.f32.mxu1 %v5316_v49  ;;  %v8450_v6 = vpop.permute.xlu1 %921 }
 0x188   : > { %6528 = vmatprep.subr.bf16.mxu1 %v8271_v16 }
 0x18a   : > { %6241 = vmatmul.mubr.f32.gmra.mrb[14].mxu1 %v5317_v50 }
 0x18b   : > { %6530 = vmatpush3.bf16.msra.mxu1 %v8271_v16  ;;  %6319 = vmatprep.mubr.f32.mxu1 %v5326_v51 }
 0x18c   : > { %6532 = vmatprep.subr.bf16.mxu1 %v8277_v18 }
 0x18f   : > { %6534 = vmatpush3.bf16.msra.mxu1 %v8277_v18 }
 0x190   : > { %6536 = vmatprep.subr.bf16.mxu1 %v8286_v23 }
 0x193   : > { %6538 = vmatpush3.bf16.msra.mxu1 %v8286_v23  ;;  %v8468_v23 = vpop.permute.xlu1 %875 }
 0x194   : > { %6540 = vmatprep.subr.bf16.mxu1 %v8292_v25 }
 0x197   : > { %6542 = vmatpush3.bf16.msra.mxu1 %v8292_v25  ;;  %v8491_v48 = vpop.permute.xlu1 %931 }
 0x198   : > { %6544 = vmatprep.subr.bf16.mxu1 %v8298_v28 }
 0x19b   : > { %6546 = vmatpush3.bf16.msra.mxu1 %v8298_v28 }
 0x19e   : > { %6320 = vmatmul.mubr.f32.vlgmr.msra.gmra.mrb[16].mxu1 %v5327_v52 }
 0x19f   : > { %6322 = vmatprep.mubr.f32.mxu1 %v5328_v53 }
 0x1a2   : > { %6323 = vmatmul.mubr.f32.gmra.mrb[18].mxu1 %v5329_v54 }
 0x1a3   : > { %6325 = vmatprep.mubr.f32.mxu1 %v5330_v55 }
 0x1a6   : > { %6326 = vmatmul.mubr.f32.gmra.mrb[20].mxu1 %v5331_v56 }
 0x1a7   : > { %6328 = vmatprep.mubr.f32.mxu1 %v5332_v57 }
 0x1aa   : > { %6329 = vmatmul.mubr.f32.gmra.mrb[22].mxu1 %v5333_v58 }
 0x231   : > { %v8452_v7 = vpop.f32.mrb[0].mxu1  ;;  %v6277_v8 = vpop.f32.mrb[0].mxu0 }
 0x232   : > { %v1240_v9 = vmul.f32 %v6277_v8, %v8430_v60  ;;  %v8455_v10 = vpop.f32.mrb[1].mxu1  ;;  %v1200_v11 = vpop.f32.mrb[1].mxu0 }
 0x233   : > { %v1239_v12 = vmul.f32 %v1200_v11, %v8428_v59 }
 0x234   : > { %v1248_v13 = vadd.f32 %v1240_v9, %v8434_v62 }
 0x235   : > { %v1247_v14 = vadd.f32 %v1239_v12, %v8432_v61  ;;  %v8460_v15 = vpop.f32.mrb[2].mxu1  ;;  %v6280_v16 = vpop.f32.mrb[2].mxu0 }
 0x236   : > { %v1242_v17 = vmul.f32 %v6280_v16, %v8436_v63  ;;  %v8463_v18 = vpop.f32.mrb[3].mxu1  ;;  %v1210_v19 = vpop.f32.mrb[3].mxu0  ;;  %vm1256_vm5 = vcmp.ge.f32.partialorder %v1248_v13, 0.0  ;;  %v1264_v21 = vmul.f32 0.01, %v1248_v13 }
 0x237   : > { %v1241_v20 = vmul.f32 %v1210_v19, %v8438_v0  ;;  %vm1255_vm6 = vcmp.ge.f32.partialorder %v1247_v14, 0.0  ;;  %v1263_v25 = vmul.f32 0.01, %v1247_v14 }
 0x238   : > { %v1250_v24 = vadd.f32 %v1242_v17, %v8440_v1  ;;  %v1272_v27 = vsel %vm1256_vm5, %v1248_v13, %v1264_v21 }
 0x239   : > { %v1249_v26 = vadd.f32 %v1241_v20, %v8442_v2  ;;  %v8472_v28 = vpop.f32.mrb[4].mxu1  ;;  %v6283_v29 = vpop.f32.mrb[4].mxu0  ;;  %1475 = vrot.lane.b32.xlu0 %v1272_v27, %s8032_s0  ;;  %v1271_v31 = vsel %vm1255_vm6, %v1247_v14, %v1263_v25 }
 0x23a   : > { %v1244_v30 = vmul.f32 %v6283_v29, %v8444_v3  ;;  %v8476_v32 = vpop.f32.mrb[5].mxu1  ;;  %v1220_v33 = vpop.f32.mrb[5].mxu0  ;;  %1473 = vrot.lane.b32.xlu1 %v1271_v31, %s8032_s0  ;;  %vm1258_vm7 = vcmp.ge.f32.partialorder %v1250_v24, 0.0  ;;  %v1266_v36 = vmul.f32 0.01, %v1250_v24  ;;  %v1556_v31 = vld [vmem:[%s11635_s8] sm:$0xff] }
 0x23b   : > { %v1243_v34 = vmul.f32 %v1220_v33, %v8446_v4  ;;  %vm1257_vm8 = vcmp.ge.f32.partialorder %v1249_v26, 0.0  ;;  %v1265_v40 = vmul.f32 0.01, %v1249_v26  ;;  %v1557_v33 = vld [vmem:[%s11635_s8 + $0x8] sm:$0xff] }
 0x23c   : > { %v1252_v35 = vadd.f32 %v1244_v30, %v8448_v5  ;;  %v1274_v42 = vsel %vm1258_vm7, %v1250_v24, %v1266_v36 }
 0x23d   : > { %v1251_v37 = vadd.f32 %v1243_v34, %v8450_v6  ;;  %v8482_v38 = vpop.f32.mrb[6].mxu1  ;;  %v6286_v39 = vpop.f32.mrb[6].mxu0  ;;  %1479 = vrot.lane.b32.xlu0 %v1274_v42, %s8032_s0  ;;  %v1273_v46 = vsel %vm1257_vm8, %v1249_v26, %v1265_v40  ;;  %v1558_v34 = vld [vmem:[%s11635_s8 + $0x10] sm:$0xff]  ;;  %v1559_v40 = vld [vmem:[%s11635_s8 + $0x18] sm:$0xff] }
 0x23e   : > { %v1246_v41 = vmul.f32 %v6286_v39, %v8466_v22  ;;  %v8485_v43 = vpop.f32.mrb[7].mxu1  ;;  %v1230_v44 = vpop.f32.mrb[7].mxu0  ;;  %1477 = vrot.lane.b32.xlu1 %v1273_v46, %s8032_s0  ;;  %vm1260_vm9 = vcmp.ge.f32.partialorder %v1252_v35, 0.0  ;;  %v1268_v50 = vmul.f32 0.01, %v1252_v35  ;;  %v6547_v39 = vpack.c.bf16 %v1557_v33, %v1556_v31 }
 0x23f   : > { %v1245_v47 = vmul.f32 %v1230_v44, %v8468_v23  ;;  %vm1259_vm10 = vcmp.ge.f32.partialorder %v1251_v37, 0.0  ;;  %v1267_v52 = vmul.f32 0.01, %v1251_v37  ;;  %v6551_v46 = vpack.c.bf16 %v1559_v40, %v1558_v34  ;;  %v5371_v40 = vld [vmem:[%s11635_s8 + $0x78] sm:$0xff] }
 0x240   : > { %v1254_v49 = vadd.f32 %v1246_v41, %v8487_v45  ;;  %v1276_v53 = vsel %vm1260_vm9, %v1252_v35, %v1268_v50  ;;  %v5343_v41 = vld [vmem:[%s11635_s8 + $0x28] sm:$0xff]  ;;  %6548 = vmatprep.subr.bf16.mxu0 %v6547_v39 }
 0x241   : > { %v1253_v51 = vadd.f32 %v1245_v47, %v8491_v48  ;;  %1483 = vrot.lane.b32.xlu0 %v1276_v53, %s8032_s0  ;;  %v1275_v55 = vsel %vm1259_vm10, %v1251_v37, %v1267_v52  ;;  %v5344_v47 = vld [vmem:[%s11635_s8 + $0x30] sm:$0xff]  ;;  %v5345_v52 = vld [vmem:[%s11635_s8 + $0x38] sm:$0xff]  ;;  %v5346_v53 = vld [vmem:[%s11635_s8 + $0x40] sm:$0xff]  ;;  %6550 = vmatpush3.bf16.msra.mxu0 %v6547_v39 }
 0x242   : > { %vm1262_vm11 = vcmp.ge.f32.partialorder %v1254_v49, 0.0  ;;  %v1270_v54 = vmul.f32 0.01, %v1254_v49  ;;  %1481 = vrot.lane.b32.xlu1 %v1275_v55, %s8032_s0  ;;  %6552 = vmatprep.subr.bf16.mxu0 %v6551_v46 }
 0x243   : > { %vm1261_vm12 = vcmp.ge.f32.partialorder %v1253_v51, 0.0  ;;  %v1269_v56 = vmul.f32 0.01, %v1253_v51 }
 0x244   : > { %v1278_v57 = vsel %vm1262_vm11, %v1254_v49, %v1270_v54 }
 0x245   : > { %v1277_v58 = vsel %vm1261_vm12, %v1253_v51, %v1269_v56  ;;  %1487 = vrot.lane.b32.xlu0 %v1278_v57, %s8032_s0  ;;  %v6555_v51 = vpack.c.bf16 %v5344_v47, %v5343_v41  ;;  %6554 = vmatpush3.bf16.msra.mxu0 %v6551_v46  ;;  %v5372_v46 = vld [vmem:[%s11635_s8 + $0x80] sm:$0xff] }
 0x246   : > { %1485 = vrot.lane.b32.xlu1 %v1277_v58, %s8032_s0 }
 0x247   : > { %6556 = vmatprep.subr.bf16.mxu1 %v6555_v51 }
 0x248   : > { %6558 = vmatpush3.bf16.msra.mxu1 %v6555_v51 }
 0x251   : > { %v6233_v8 = vpop.f32.mrb[8].mxu1 }
 0x252   : > { %v1086_v9 = vmul.f32 %v6233_v8, %v8430_v60  ;;  %v1046_v11 = vpop.f32.mrb[9].mxu1 }
 0x253   : > { %v1085_v12 = vmul.f32 %v1046_v11, %v8428_v59 }
 0x254   : > { %v1094_v13 = vadd.f32 %v1086_v9, %v8434_v62 }
 0x255   : > { %v1093_v14 = vadd.f32 %v1085_v12, %v8432_v61  ;;  %v6236_v16 = vpop.f32.mrb[10].mxu1  ;;  %v1560_v12 = vld [vmem:[%s11635_s8 + $0x20] sm:$0xf] }
 0x256   : > { %v1088_v17 = vmul.f32 %v6236_v16, %v8436_v63  ;;  %v1056_v19 = vpop.f32.mrb[11].mxu1  ;;  %vm1102_vm13 = vcmp.ge.f32.partialorder %v1094_v13, 0.0  ;;  %v1110_v20 = vmul.f32 0.01, %v1094_v13  ;;  %6339 = vmatprep.subr.msk.mxu0 %vm1586_vm2, %v1560_v12 }
 0x257   : > { %v1087_v21 = vmul.f32 %v1056_v19, %v8438_v0  ;;  %vm1101_vm14 = vcmp.ge.f32.partialorder %v1093_v14, 0.0  ;;  %v1109_v24 = vmul.f32 0.01, %v1093_v14  ;;  %6340 = vmatpush3.msk.msra.mxu0 %vm1586_vm2, %v1560_v12 }
 0x258   : > { %v1096_v25 = vadd.f32 %v1088_v17, %v8440_v1  ;;  %v1118_v26 = vsel %vm1102_vm13, %v1094_v13, %v1110_v20  ;;  %v6559_v13 = vpack.c.bf16 %v5346_v53, %v5345_v52 }
 0x259   : > { %v1095_v27 = vadd.f32 %v1087_v21, %v8442_v2  ;;  %v6239_v29 = vpop.f32.mrb[12].mxu1  ;;  %1443 = vrot.lane.b32.xlu0 %v1118_v26, %s8033_s30  ;;  %v1117_v30 = vsel %vm1101_vm14, %v1093_v14, %v1109_v24  ;;  %v5347_v26 = vld [vmem:[%s11635_s8 + $0x48] sm:$0xf] }
 0x25a   : > { %v1090_v35 = vmul.f32 %v6239_v29, %v8444_v3  ;;  %1441 = vrot.lane.b32.xlu1 %v1117_v30, %s8033_s30  ;;  %v1066_v36 = vpop.f32.mrb[13].mxu1  ;;  %vm1104_vm15 = vcmp.ge.f32.partialorder %v1096_v25, 0.0  ;;  %v1112_v37 = vmul.f32 0.01, %v1096_v25  ;;  %6560 = vmatprep.subr.bf16.mxu1 %v6559_v13  ;;  %v5358_v29 = vld [vmem:[%s11635_s8 + $0x58] sm:$0xff] }
 0x25b   : > { %v1089_v42 = vmul.f32 %v1066_v36, %v8446_v4  ;;  %vm1103_vm0 = vcmp.ge.f32.partialorder %v1095_v27, 0.0  ;;  %v1111_v44 = vmul.f32 0.01, %v1095_v27  ;;  %6562 = vmatpush3.bf16.msra.mxu1 %v6559_v13 }
 0x25c   : > { %v1098_v49 = vadd.f32 %v1090_v35, %v8448_v5  ;;  %v1120_v50 = vsel %vm1104_vm15, %v1096_v25, %v1112_v37  ;;  %6361 = vmatprep.subr.msk.mxu1 %vm1586_vm2, %v5347_v26 }
 0x25d   : > { %v1097_v54 = vadd.f32 %v1089_v42, %v8450_v6  ;;  %v6242_v55 = vpop.f32.mrb[14].mxu1  ;;  %1447 = vrot.lane.b32.xlu0 %v1120_v50, %s8033_s30  ;;  %v1119_v56 = vsel %vm1103_vm0, %v1095_v27, %v1111_v44  ;;  %v5357_v27 = vld [vmem:[%s11635_s8 + $0x50] sm:$0xff]  ;;  %v8579_v50 = vpack.c.bf16 %v5372_v46, %v5371_v40  ;;  %v2038_v40 = vld [vmem:[%s11637_s10 + $0x8] sm:$0xff]  ;;  %v2040_v46 = vld [vmem:[%s11637_s10 + $0x18] sm:$0xff]  ;;  %vm1529_vm0 = vcmask 72704  }
 0x25e   : > { %v1092_v57 = vmul.f32 %v6242_v55, %v8466_v22  ;;  %1445 = vrot.lane.b32.xlu1 %v1119_v56, %s8033_s30  ;;  %v1076_v58 = vpop.f32.mrb[15].mxu1  ;;  %vm1106_vm1 = vcmp.ge.f32.partialorder %v1098_v49, 0.0  ;;  %v1114_v8 = vmul.f32 0.01, %v1098_v49  ;;  %v8564_v30 = vpack.c.bf16 %v5358_v29, %v5357_v27 }
 0x25f   : > { %v1091_v9 = vmul.f32 %v1076_v58, %v8468_v23  ;;  %vm1105_vm3 = vcmp.ge.f32.partialorder %v1097_v54, 0.0  ;;  %v1113_v11 = vmul.f32 0.01, %v1097_v54  ;;  %6362 = vmatpush3.msk.msra.mxu1 %vm1586_vm2, %v5347_v26 }
 0x260   : > { %v1100_v14 = vadd.f32 %v1092_v57, %v8487_v45  ;;  %v1122_v16 = vsel %vm1106_vm1, %v1098_v49, %v1114_v8  ;;  %6564 = vmatprep.subr.bf16.mxu0 %v8564_v30  ;;  %6572 = vmatprep.subr.bf16.mxu1 %v8579_v50 }
 0x261   : > { %v1099_v17 = vadd.f32 %v1091_v9, %v8491_v48  ;;  %1451 = vrot.lane.b32.xlu0 %v1122_v16, %s8033_s30  ;;  %v1121_v19 = vsel %vm1105_vm3, %v1097_v54, %v1113_v11 }
 0x262   : > { %1449 = vrot.lane.b32.xlu1 %v1121_v19, %s8033_s30  ;;  %vm1108_vm4 = vcmp.ge.f32.partialorder %v1100_v14, 0.0  ;;  %v1116_v20 = vmul.f32 0.01, %v1100_v14 }
 0x263   : > { %vm1107_vm5 = vcmp.ge.f32.partialorder %v1099_v17, 0.0  ;;  %v1115_v21 = vmul.f32 0.01, %v1099_v17 }
 0x264   : > { %v1124_v24 = vsel %vm1108_vm4, %v1100_v14, %v1116_v20  ;;  %vm1538_vm4 = vcmask 146432  }
 0x265   : > { %1455 = vrot.lane.b32.xlu0 %v1124_v24, %s8033_s30  ;;  %v1123_v25 = vsel %vm1107_vm5, %v1099_v17, %v1115_v21  ;;  %vm1547_vm5 = vcmask 220160  }
 0x266   : > { %1453 = vrot.lane.b32.xlu1 %v1123_v25, %s8033_s30 }
 0x271   : > { %v6321_v31 = vpop.f32.mrb[16].mxu1 }
 0x272   : > { %v1394_v33 = vmul.f32 %v6321_v31, %v8430_v60  ;;  %v1354_v34 = vpop.f32.mrb[17].mxu1 }
 0x273   : > { %v1393_v35 = vmul.f32 %v1354_v34, %v8428_v59 }
 0x274   : > { %v1402_v36 = vadd.f32 %v1394_v33, %v8434_v62 }
 0x275   : > { %v1401_v37 = vadd.f32 %v1393_v35, %v8432_v61  ;;  %v6324_v39 = vpop.f32.mrb[18].mxu1 }
 0x276   : > { %v1396_v41 = vmul.f32 %v6324_v39, %v8436_v63  ;;  %v1364_v42 = vpop.f32.mrb[19].mxu1  ;;  %vm1410_vm6 = vcmp.ge.f32.partialorder %v1402_v36, 0.0  ;;  %v1418_v44 = vmul.f32 0.01, %v1402_v36  ;;  %v2159_v39 = vld [vmem:[%s11638_s11 + $0x8] sm:$0xff] }
 0x277   : > { %v1395_v47 = vmul.f32 %v1364_v42, %v8438_v0  ;;  %vm1409_vm7 = vcmp.ge.f32.partialorder %v1401_v37, 0.0  ;;  %v1417_v49 = vmul.f32 0.01, %v1401_v37  ;;  %v2039_v42 = vld [vmem:[%s11637_s10 + $0x10] sm:$0xff] }
 0x278   : > { %v1404_v51 = vadd.f32 %v1396_v41, %v8440_v1  ;;  %v1426_v52 = vsel %vm1410_vm6, %v1402_v36, %v1418_v44  ;;  %v2158_v36 = vld [vmem:[%s11638_s11] sm:$0xff]  ;;  %v2160_v41 = vld [vmem:[%s11638_s11 + $0x10] sm:$0xff]  ;;  %v2161_v44 = vld [vmem:[%s11638_s11 + $0x18] sm:$0xff]  ;;  %vm1561_vm6 = vcmask 293888  }
 0x279   : > { %v1403_v53 = vadd.f32 %v1395_v47, %v8442_v2  ;;  %v6327_v54 = vpop.f32.mrb[20].mxu1  ;;  %1507 = vrot.lane.b32.xlu0 %v1426_v52, %s8034_s28  ;;  %v1425_v55 = vsel %vm1409_vm7, %v1401_v37, %v1417_v49  ;;  %v2037_v37 = vld [vmem:[%s11637_s10] sm:$0xff] }
 0x27a   : > { %v1398_v56 = vmul.f32 %v6327_v54, %v8444_v3  ;;  %v1374_v57 = vpop.f32.mrb[21].mxu1  ;;  %1505 = vrot.lane.b32.xlu1 %v1425_v55, %s8034_s28  ;;  %vm1412_vm8 = vcmp.ge.f32.partialorder %v1404_v51, 0.0  ;;  %v1420_v58 = vmul.f32 0.01, %v1404_v51 }
 0x27b   : > { %v1397_v8 = vmul.f32 %v1374_v57, %v8446_v4  ;;  %vm1411_vm9 = vcmp.ge.f32.partialorder %v1403_v53, 0.0  ;;  %v1419_v9 = vmul.f32 0.01, %v1403_v53 }
 0x27c   : > { %v1406_v11 = vadd.f32 %v1398_v56, %v8448_v5  ;;  %v1428_v12 = vsel %vm1412_vm8, %v1404_v51, %v1420_v58 }
 0x27d   : > { %v1405_v13 = vadd.f32 %v1397_v8, %v8450_v6  ;;  %v6330_v14 = vpop.f32.mrb[22].mxu1  ;;  %1511 = vrot.lane.b32.xlu0 %v1428_v12, %s8034_s28  ;;  %v1427_v16 = vsel %vm1411_vm9, %v1403_v53, %v1419_v9  ;;  %v883_v9 = vmul.f32 %v8428_v59, %v8455_v10  ;;  %v884_v12 = vmul.f32 %v8452_v7, %v8430_v60 }
 0x27e   : > { %v1400_v17 = vmul.f32 %v6330_v14, %v8466_v22  ;;  %v1384_v19 = vpop.f32.mrb[23].mxu1  ;;  %1509 = vrot.lane.b32.xlu1 %v1427_v16, %s8034_s28  ;;  %vm1414_vm10 = vcmp.ge.f32.partialorder %v1406_v11, 0.0  ;;  %v1422_v20 = vmul.f32 0.01, %v1406_v11  ;;  %v885_v14 = vmul.f32 %v8438_v0, %v8463_v18 }
 0x27f   : > { %v1399_v21 = vmul.f32 %v1384_v19, %v8468_v23  ;;  %vm1413_vm11 = vcmp.ge.f32.partialorder %v1405_v13, 0.0  ;;  %v1421_v24 = vmul.f32 0.01, %v1405_v13  ;;  %v939_v16 = vadd.f32 %v8432_v61, %v883_v9 }
 0x280   : > { %v1408_v25 = vadd.f32 %v1400_v17, %v8487_v45  ;;  %v1430_v26 = vsel %vm1414_vm10, %v1406_v11, %v1422_v20  ;;  %v940_v17 = vadd.f32 %v8434_v62, %v884_v12  ;;  %v888_v19 = vmul.f32 %v8472_v28, %v8444_v3 }
 0x281   : > { %v1407_v27 = vadd.f32 %v1399_v21, %v8491_v48  ;;  %1515 = vrot.lane.b32.xlu0 %v1430_v26, %s8034_s28  ;;  %v1429_v29 = vsel %vm1413_vm11, %v1405_v13, %v1421_v24  ;;  %v886_v13 = vmul.f32 %v8460_v15, %v8436_v63  ;;  %v887_v59 = vmul.f32 %v8446_v4, %v8476_v32  ;;  %v5373_v24 = vld [vmem:[%s11635_s8 + $0x88] sm:$0xff] }
 0x282   : > { %1513 = vrot.lane.b32.xlu1 %v1429_v29, %s8034_s28  ;;  %vm1416_vm12 = vcmp.ge.f32.partialorder %v1408_v25, 0.0  ;;  %v1424_v31 = vmul.f32 0.01, %v1408_v25  ;;  %v941_v63 = vadd.f32 %v8442_v2, %v885_v14  ;;  %v955_v7 = vmul.f32 0.01, %v939_v16 }
 0x283   : > { %vm1415_vm13 = vcmp.ge.f32.partialorder %v1407_v27, 0.0  ;;  %v1423_v33 = vmul.f32 0.01, %v1407_v27  ;;  %v942_v60 = vadd.f32 %v8440_v1, %v886_v13  ;;  %v956_v15 = vmul.f32 0.01, %v940_v17 }
 0x284   : > { %v1432_v34 = vsel %vm1416_vm12, %v1408_v25, %v1424_v31  ;;  %v944_v0 = vadd.f32 %v8448_v5, %v888_v19  ;;  %vm947_vm14 = vcmp.ge.f32.partialorder %v939_v16, 0.0  ;;  %v943_v61 = vadd.f32 %v8450_v6, %v887_v59  ;;  %v5374_v25 = vld [vmem:[%s11635_s8 + $0x90] sm:$0xff] }
 0x285   : > { %1519 = vrot.lane.b32.xlu0 %v1432_v34, %s8034_s28  ;;  %v1431_v35 = vsel %vm1415_vm13, %v1407_v27, %v1423_v33  ;;  %v890_v62 = vmul.f32 %v8482_v38, %v8466_v22  ;;  %vm948_vm15 = vcmp.ge.f32.partialorder %v940_v17, 0.0  ;;  %v958_v3 = vmul.f32 0.01, %v942_v60  ;;  %v5359_v22 = vld [vmem:[%s11635_s8 + $0x60] sm:$0xff] }
 0x286   : > { %1517 = vrot.lane.b32.xlu1 %v1431_v35, %s8034_s28  ;;  %v957_v18 = vmul.f32 0.01, %v941_v63  ;;  %v889_v4 = vmul.f32 %v8468_v23, %v8485_v43  ;;  %v963_v2 = vsel %vm947_vm14, %v939_v16, %v955_v7  ;;  %vm950_vm1 = vcmp.ge.f32.partialorder %v942_v60, 0.0  ;;  %v5360_v23 = vld [vmem:[%s11635_s8 + $0x68] sm:$0xff] }
 0x287   : > { %vm949_vm3 = vcmp.ge.f32.partialorder %v941_v63, 0.0  ;;  %v960_v5 = vmul.f32 0.01, %v944_v0  ;;  %v964_v32 = vsel %vm948_vm15, %v940_v17, %v956_v15  ;;  %v959_v38 = vmul.f32 0.01, %v943_v61 }
 0x288   : > { %v946_v43 = vadd.f32 %v8487_v45, %v890_v62  ;;  %v945_v26 = vadd.f32 %v8491_v48, %v889_v4  ;;  %v966_v27 = vsel %vm950_vm1, %v942_v60, %v958_v3  ;;  %v965_v29 = vsel %vm949_vm3, %v941_v63, %v957_v18 }
 0x289   : > { %2164 = vperm.xlu0 %8003, %v2158_v36   ;;  %vm952_vm7 = vcmp.ge.f32.partialorder %v944_v0, 0.0  ;;  %vm951_vm8 = vcmp.ge.f32.partialorder %v943_v61, 0.0  ;;  %v6567_v34 = vpack.c.bf16 %v5360_v23, %v5359_v22  ;;  %v6575_v48 = vpack.c.bf16 %v5374_v25, %v5373_v24 }
 0x28a   : > { %2136 = vperm.xlu1 %8004, %v2037_v37   ;;  %vm954_vm9 = vcmp.ge.f32.partialorder %v946_v43, 0.0  ;;  %vm953_vm10 = vcmp.ge.f32.partialorder %v945_v26, 0.0 }
 0x28d   : > { %2169 = vperm.xlu0 %8003, %v2159_v39  }
 0x28e   : > { %2141 = vperm.xlu1 %8004, %v2038_v40  }
 0x291   : > { %2174 = vperm.xlu0 %8003, %v2160_v41   ;;  %v962_v41 = vmul.f32 0.01, %v946_v43 }
 0x292   : > { %2146 = vperm.xlu1 %8004, %v2039_v42   ;;  %v961_v42 = vmul.f32 0.01, %v945_v26 }
 0x293   : > { %v970_v12 = vsel %vm954_vm9, %v946_v43, %v962_v41  ;;  %vm2588_vm9 = vcmask 400384  }
 0x294   : > { %v969_v13 = vsel %vm953_vm10, %v945_v26, %v961_v42  ;;  %vm2593_vm10 = vcmask 801792  }
 0x295   : > { %2179 = vperm.xlu0 %8003, %v2161_v44  }
 0x296   : > { %2151 = vperm.xlu1 %8004, %v2040_v46   ;;  %v968_v46 = vsel %vm952_vm7, %v944_v0, %v960_v5 }
 0x2ab   : > { %v8624_v47 = vpop.permute.xlu0 %1475 }
 0x2ac   : > { %v1474_v49 = vpop.permute.xlu1 %1473 }
 0x2af   : > { %v8626_v51 = vpop.permute.xlu0 %1479 }
 0x2b0   : > { %v8628_v52 = vpop.permute.xlu1 %1477 }
 0x2b3   : > { %v8630_v53 = vpop.permute.xlu0 %1483 }
 0x2b4   : > { %v8632_v54 = vpop.permute.xlu1 %1481 }
 0x2b7   : > { %v8634_v55 = vpop.permute.xlu0 %1487 }
 0x2b8   : > { %v8636_v56 = vpop.permute.xlu1 %1485 }
 0x2cb   : > { %v1444_v57 = vpop.permute.xlu0 %1443 }
 0x2cc   : > { %v1442_v58 = vpop.permute.xlu1 %1441  ;;  %v1531_v21 = vsel %vm1529_vm0, %v964_v32, %v1444_v57 }
 0x2cd   : > { %v1530_v6 = vsel %vm1529_vm0, %v963_v2, %v1442_v58  ;;  %v1540_v36 = vsel %vm1538_vm4, %v1531_v21, %v8624_v47  ;;  %v967_v47 = vsel %vm951_vm8, %v943_v61, %v959_v38 }
 0x2ce   : > { %v1539_v45 = vsel %vm1538_vm4, %v1530_v6, %v1474_v49 }
 0x2cf   : > { %v1448_v8 = vpop.permute.xlu0 %1447 }
 0x2d0   : > { %v1446_v11 = vpop.permute.xlu1 %1445  ;;  %v1533_v39 = vsel %vm1529_vm0, %v966_v27, %v1448_v8 }
 0x2d1   : > { %v1532_v35 = vsel %vm1529_vm0, %v965_v29, %v1446_v11  ;;  %v1542_v8 = vsel %vm1538_vm4, %v1533_v39, %v8626_v51  ;;  %v5375_v51 = vld [vmem:[%s11635_s8 + $0x98] sm:$0xf] }
 0x2d2   : > { %v1541_v49 = vsel %vm1538_vm4, %v1532_v35, %v8628_v52 }
 0x2d3   : > { %v8650_v20 = vpop.permute.xlu0 %1451 }
 0x2d4   : > { %v1450_v10 = vpop.permute.xlu1 %1449  ;;  %v1535_v11 = vsel %vm1529_vm0, %v968_v46, %v8650_v20 }
 0x2d5   : > { %v1534_v58 = vsel %vm1529_vm0, %v967_v47, %v1450_v10  ;;  %v1544_v19 = vsel %vm1538_vm4, %v1535_v11, %v8630_v53 }
 0x2d6   : > { %v1543_v14 = vsel %vm1538_vm4, %v1534_v58, %v8632_v54 }
 0x2d7   : > { %v8662_v1 = vpop.permute.xlu0 %1455 }
 0x2d8   : > { %v8664_v28 = vpop.permute.xlu1 %1453  ;;  %v1537_v59 = vsel %vm1529_vm0, %v970_v12, %v8662_v1 }
 0x2d9   : > { %v1536_v17 = vsel %vm1529_vm0, %v969_v13, %v8664_v28  ;;  %v1546_v63 = vsel %vm1538_vm4, %v1537_v59, %v8634_v55  ;;  %v2042_v55 = vld [vmem:[%s11636_s9 + $0x8] sm:$0xff]  ;;  %v2041_v13 = vld [vmem:[%s11636_s9] sm:$0xff] }
 0x2da   : > { %v1545_v60 = vsel %vm1538_vm4, %v1536_v17, %v8636_v56  ;;  %v5386_v56 = vld [vmem:[%s11636_s9 + $0x48] sm:$0xff]  ;;  %v5388_v17 = vld [vmem:[%s11636_s9 + $0x58] sm:$0xff] }
 0x2db   : > { %v2046_v59 = vld [vmem:[%s11636_s9 + $0x28] sm:$0xff] }
 0x2eb   : > { %v1508_v31 = vpop.permute.xlu0 %1507 }
 0x2ec   : > { %v1506_v33 = vpop.permute.xlu1 %1505  ;;  %v1549_v40 = vsel %vm1547_vm5, %v1540_v36, %v1508_v31 }
 0x2ed   : > { %v8689_v37 = vsel %vm1547_vm5, %v1539_v45, %v1506_v33 }
 0x2ee   : > { %6341 = vmatprep.mubr.msk.f32.mxu0 %vm1561_vm6, %v8689_v37  ;;  %6363 = vmatprep.mubr.msk.f32.mxu1 %vm1561_vm6, %v8689_v37 }
 0x2ef   : > { %6342 = vmatmul.mubr.msk.f32.vlgmr.msra.gmra.mrb[8].mxu0 %vm1561_vm6, %v1549_v40  ;;  %6364 = vmatmul.mubr.msk.f32.vlgmr.msra.gmra.mrb[24].mxu1 %vm1561_vm6, %v1549_v40  ;;  %v1512_v44 = vpop.permute.xlu0 %1511 }
 0x2f0   : > { %6566 = vmatpush3.bf16.msra.mxu0 %v8564_v30  ;;  %v1510_v57 = vpop.permute.xlu1 %1509  ;;  %6574 = vmatpush3.bf16.msra.mxu1 %v8579_v50  ;;  %v1551_v30 = vsel %vm1547_vm5, %v1542_v8, %v1512_v44  ;;  %v5361_v50 = vld [vmem:[%s11635_s8 + $0x70] sm:$0xf] }
 0x2f1   : > { %v1550_v9 = vsel %vm1547_vm5, %v1541_v49, %v1510_v57  ;;  %6568 = vmatprep.subr.bf16.mxu0 %v6567_v34  ;;  %6576 = vmatprep.subr.bf16.mxu1 %v6575_v48 }
 0x2f2   : > { %6344 = vmatprep.mubr.msk.f32.mxu0 %vm1561_vm6, %v1550_v9  ;;  %6366 = vmatprep.mubr.msk.f32.mxu1 %vm1561_vm6, %v1550_v9 }
 0x2f3   : > { %6345 = vmatmul.mubr.msk.f32.gmra.mrb[10].mxu0 %vm1561_vm6, %v1551_v30  ;;  %6367 = vmatmul.mubr.msk.f32.gmra.mrb[26].mxu1 %vm1561_vm6, %v1551_v30  ;;  %v1516_v52 = vpop.permute.xlu0 %1515 }
 0x2f4   : > { %v1514_v16 = vpop.permute.xlu1 %1513  ;;  %6570 = vmatpush3.bf16.msra.mxu0 %v6567_v34  ;;  %6578 = vmatpush3.bf16.msra.mxu1 %v6575_v48  ;;  %v1553_v54 = vsel %vm1547_vm5, %v1544_v19, %v1516_v52  ;;  %v2043_v19 = vld [vmem:[%s11636_s9 + $0x10] sm:$0xff] }
 0x2f5   : > { %v1552_v20 = vsel %vm1547_vm5, %v1543_v14, %v1514_v16  ;;  %6383 = vmatprep.subr.msk.mxu0 %vm1586_vm2, %v5361_v50  ;;  %6405 = vmatprep.subr.msk.mxu1 %vm1586_vm2, %v5375_v51  ;;  %v5385_v14 = vld [vmem:[%s11636_s9 + $0x40] sm:$0xff]  ;;  %v2044_v16 = vld [vmem:[%s11636_s9 + $0x18] sm:$0xff] }
 0x2f6   : > { %6347 = vmatprep.mubr.msk.f32.mxu0 %vm1561_vm6, %v1552_v20  ;;  %6369 = vmatprep.mubr.msk.f32.mxu1 %vm1561_vm6, %v1552_v20 }
 0x2f7   : > { %6348 = vmatmul.mubr.msk.f32.gmra.mrb[12].mxu0 %vm1561_vm6, %v1553_v54  ;;  %6370 = vmatmul.mubr.msk.f32.gmra.mrb[28].mxu1 %vm1561_vm6, %v1553_v54  ;;  %v1520_v53 = vpop.permute.xlu0 %1519 }
 0x2f8   : > { %v1518_v10 = vpop.permute.xlu1 %1517  ;;  %6384 = vmatpush3.msk.msra.mxu0 %vm1586_vm2, %v5361_v50  ;;  %6406 = vmatpush3.msk.msra.mxu1 %vm1586_vm2, %v5375_v51  ;;  %v1555_v15 = vsel %vm1547_vm5, %v1546_v63, %v1520_v53  ;;  %v2045_v53 = vld [vmem:[%s11636_s9 + $0x20] sm:$0xff]  ;;  %v5392_v63 = vld [vmem:[%s11636_s9 + $0x78] sm:$0xff] }
 0x2f9   : > { %v1554_v7 = vsel %vm1547_vm5, %v1545_v60, %v1518_v10  ;;  %v5389_v10 = vld [vmem:[%s11636_s9 + $0x60] sm:$0xff]  ;;  %v2048_v60 = vld [vmem:[%s11636_s9 + $0x38] sm:$0xff] }
 0x2fa   : > { %6350 = vmatprep.mubr.msk.f32.mxu0 %vm1561_vm6, %v1554_v7  ;;  %6372 = vmatprep.mubr.msk.f32.mxu1 %vm1561_vm6, %v1554_v7 }
 0x2fb   : > { %6351 = vmatmul.mubr.msk.f32.gmra.mrb[14].mxu0 %vm1561_vm6, %v1555_v15  ;;  %6373 = vmatmul.mubr.msk.f32.gmra.mrb[30].mxu1 %vm1561_vm6, %v1555_v15 }
 0x2fc   : > { %6385 = vmatprep.mubr.msk.f32.mxu0 %vm1561_vm6, %v8689_v37  ;;  %6407 = vmatprep.mubr.msk.f32.mxu1 %vm1561_vm6, %v8689_v37 }
 0x2ff   : > { %6386 = vmatmul.mubr.msk.f32.vlgmr.msra.gmra.mrb[16].mxu0 %vm1561_vm6, %v1549_v40  ;;  %6408 = vmatmul.mubr.msk.f32.vlgmr.msra.gmra.mrb[32].mxu1 %vm1561_vm6, %v1549_v40 }
 0x300   : > { %6388 = vmatprep.mubr.msk.f32.mxu0 %vm1561_vm6, %v1550_v9  ;;  %6410 = vmatprep.mubr.msk.f32.mxu1 %vm1561_vm6, %v1550_v9 }
 0x303   : > { %6389 = vmatmul.mubr.msk.f32.gmra.mrb[18].mxu0 %vm1561_vm6, %v1551_v30  ;;  %6411 = vmatmul.mubr.msk.f32.gmra.mrb[34].mxu1 %vm1561_vm6, %v1551_v30 }
 0x304   : > { %6391 = vmatprep.mubr.msk.f32.mxu0 %vm1561_vm6, %v1552_v20  ;;  %6413 = vmatprep.mubr.msk.f32.mxu1 %vm1561_vm6, %v1552_v20  ;;  %v5387_v20 = vld [vmem:[%s11636_s9 + $0x50] sm:$0xff] }
 0x307   : > { %6392 = vmatmul.mubr.msk.f32.gmra.mrb[20].mxu0 %vm1561_vm6, %v1553_v54  ;;  %6414 = vmatmul.mubr.msk.f32.gmra.mrb[36].mxu1 %vm1561_vm6, %v1553_v54  ;;  %v5390_v54 = vld [vmem:[%s11636_s9 + $0x68] sm:$0xff] }
 0x308   : > { %6394 = vmatprep.mubr.msk.f32.mxu0 %vm1561_vm6, %v1554_v7  ;;  %6416 = vmatprep.mubr.msk.f32.mxu1 %vm1561_vm6, %v1554_v7  ;;  %v2047_v7 = vld [vmem:[%s11636_s9 + $0x30] sm:$0xff] }
 0x30b   : > { %6395 = vmatmul.mubr.msk.f32.gmra.mrb[22].mxu0 %vm1561_vm6, %v1555_v15  ;;  %6417 = vmatmul.mubr.msk.f32.gmra.mrb[38].mxu1 %vm1561_vm6, %v1555_v15  ;;  %v5391_v15 = vld [vmem:[%s11636_s9 + $0x70] sm:$0xff] }
 0x30c   : > { %2113 = vmatprep.mubr.f32.mxu0 %v2042_v55  ;;  %2271 = vmatprep.mubr.f32.mxu1 %v5386_v56  ;;  %v5394_v55 = vld [vmem:[%s11636_s9 + $0x88] sm:$0xff] }
 0x30d   : > { %v5402_v56 = vld [vmem:[%s11636_s9 + $0xc8] sm:$0xff] }
 0x3c2   : > { %v6343_v0 = vpop.f32.mrb[8].mxu0  ;;  %v6365_v61 = vpop.f32.mrb[24].mxu1 }
 0x3c3   : > { %v1656_v62 = vpop.f32.mrb[9].mxu0  ;;  %v1770_v3 = vpop.f32.mrb[25].mxu1 }
 0x3c4   : > { %v8775_v18 = vpack.c.bf16 %v6343_v0, %v1656_v62  ;;  %v8777_v4 = vpack.c.bf16 %v6365_v61, %v1770_v3  ;;  %v5393_v0 = vld [vmem:[%s11636_s9 + $0x80] sm:$0xff]  ;;  %v5396_v62 = vld [vmem:[%s11636_s9 + $0x98] sm:$0xff] }
 0x3c5   : > { %v5401_v61 = vld [vmem:[%s11636_s9 + $0xc0] sm:$0xff]  ;;  %v5404_v3 = vld [vmem:[%s11636_s9 + $0xd8] sm:$0xff] }
 0x3c6   : > { %v6346_v1 = vpop.f32.mrb[10].mxu0  ;;  %v6368_v2 = vpop.f32.mrb[26].mxu1 }
 0x3c7   : > { %v1666_v28 = vpop.f32.mrb[11].mxu0  ;;  %v1780_v5 = vpop.f32.mrb[27].mxu1 }
 0x3c8   : > { %v8779_v32 = vpack.c.bf16 %v6346_v1, %v1666_v28  ;;  %v8781_v6 = vpack.c.bf16 %v6368_v2, %v1780_v5  ;;  %v5398_v1 = vld [vmem:[%s11636_s9 + $0xa8] sm:$0xff]  ;;  %v5397_v28 = vld [vmem:[%s11636_s9 + $0xa0] sm:$0xff] }
 0x3c9   : > { %v5406_v2 = vld [vmem:[%s11636_s9 + $0xe8] sm:$0xff]  ;;  %v5405_v5 = vld [vmem:[%s11636_s9 + $0xe0] sm:$0xff] }
 0x3ca   : > { %v6349_v22 = vpop.f32.mrb[12].mxu0  ;;  %v6371_v23 = vpop.f32.mrb[28].mxu1 }
 0x3cb   : > { %v1676_v38 = vpop.f32.mrb[13].mxu0  ;;  %v1790_v43 = vpop.f32.mrb[29].mxu1 }
 0x3cc   : > { %v8783_v21 = vpack.c.bf16 %v6349_v22, %v1676_v38  ;;  %v8785_v24 = vpack.c.bf16 %v6371_v23, %v1790_v43  ;;  %v5399_v22 = vld [vmem:[%s11636_s9 + $0xb0] sm:$0xff]  ;;  %v2604_v38 = vld [vmem:[%s11639_s12 + $0x8] sm:$0xff]  ;;  %v2606_v43 = vld [vmem:[%s11639_s12 + $0x18] sm:$0xff] }
 0x3cd   : > { %v5407_v23 = vld [vmem:[%s11636_s9 + $0xf0] sm:$0xff] }
 0x3ce   : > { %v6352_v25 = vpop.f32.mrb[14].mxu0  ;;  %v6374_v26 = vpop.f32.mrb[30].mxu1 }
 0x3cf   : > { %v1686_v27 = vpop.f32.mrb[15].mxu0  ;;  %v1800_v29 = vpop.f32.mrb[31].mxu1 }
 0x3d0   : > { %v8787_v31 = vpack.c.bf16 %v6352_v25, %v1686_v27  ;;  %v8789_v45 = vpack.c.bf16 %v6374_v26, %v1800_v29  ;;  %v5418_v25 = vld [vmem:[%s11639_s12 + $0x1a8] sm:$0xff]  ;;  %v2603_v26 = vld [vmem:[%s11639_s12] sm:$0xff]  ;;  %v2605_v27 = vld [vmem:[%s11639_s12 + $0x10] sm:$0xff] }
 0x3d2   : > { %v6387_v33 = vpop.f32.mrb[16].mxu0  ;;  %v6409_v34 = vpop.f32.mrb[32].mxu1 }
 0x3d3   : > { %v1884_v35 = vpop.f32.mrb[17].mxu0  ;;  %v1998_v36 = vpop.f32.mrb[33].mxu1 }
 0x3d4   : > { %v6579_v37 = vpack.c.bf16 %v6387_v33, %v1884_v35  ;;  %v8791_v48 = vpack.c.bf16 %v6409_v34, %v1998_v36  ;;  %v5417_v33 = vld [vmem:[%s11639_s12 + $0x1a0] sm:$0xff]  ;;  %v2608_v34 = vld [vmem:[%s11639_s12 + $0x28] sm:$0xff]  ;;  %v2610_v36 = vld [vmem:[%s11639_s12 + $0x38] sm:$0xff] }
 0x3d6   : > { %v6390_v39 = vpop.f32.mrb[18].mxu0  ;;  %v6412_v40 = vpop.f32.mrb[34].mxu1  ;;  %6580 = vmatprep.subr.bf16.mxu0 %v6579_v37  ;;  %6612 = vmatprep.subr.bf16.mxu1 %v6579_v37 }
 0x3d7   : > { %v1894_v41 = vpop.f32.mrb[19].mxu0  ;;  %v2008_v42 = vpop.f32.mrb[35].mxu1  ;;  %6582 = vmatpush3.bf16.msra.mxu0 %v8775_v18  ;;  %6614 = vmatpush3.bf16.msra.mxu1 %v8775_v18 }
 0x3d8   : > { %v6583_v44 = vpack.c.bf16 %v6390_v39, %v1894_v41  ;;  %v8795_v46 = vpack.c.bf16 %v6412_v40, %v2008_v42  ;;  %v6711_v39 = vpack.c.bf16 %v2610_v36, %v2608_v34  ;;  %v2607_v41 = vld [vmem:[%s11639_s12 + $0x20] sm:$0xff]  ;;  %v2609_v42 = vld [vmem:[%s11639_s12 + $0x30] sm:$0xff] }
 0x3d9   : > { %v2625_v34 = vld [vmem:[%s11639_s12 + $0xb0] sm:$0xff]  ;;  %v5437_v36 = vld [vmem:[%s11639_s12 + $0x240] sm:$0xff] }
 0x3da   : > { %v6393_v47 = vpop.f32.mrb[20].mxu0  ;;  %v6415_v49 = vpop.f32.mrb[36].mxu1  ;;  %6584 = vmatprep.subr.bf16.mxu0 %v6583_v44  ;;  %6616 = vmatprep.subr.bf16.mxu1 %v6583_v44 }
 0x3db   : > { %v1904_v57 = vpop.f32.mrb[21].mxu0  ;;  %v2018_v58 = vpop.f32.mrb[37].mxu1  ;;  %6586 = vmatpush3.bf16.msra.mxu0 %v8779_v32  ;;  %6618 = vmatpush3.bf16.msra.mxu1 %v8779_v32 }
 0x3dc   : > { %v6587_v8 = vpack.c.bf16 %v6393_v47, %v1904_v57  ;;  %v8799_v9 = vpack.c.bf16 %v6415_v49, %v2018_v58  ;;  %v5421_v47 = vld [vmem:[%s11639_s12 + $0x1c0] sm:$0xff]  ;;  %v2612_v49 = vld [vmem:[%s11639_s12 + $0x48] sm:$0xff]  ;;  %v2614_v57 = vld [vmem:[%s11639_s12 + $0x58] sm:$0xff] }
 0x3de   : > { %v6396_v11 = vpop.f32.mrb[22].mxu0  ;;  %v6418_v30 = vpop.f32.mrb[38].mxu1  ;;  %6588 = vmatprep.subr.bf16.mxu0 %v6587_v8  ;;  %6620 = vmatprep.subr.bf16.mxu1 %v6587_v8 }
 0x3df   : > { %v1914_v50 = vpop.f32.mrb[23].mxu0  ;;  %v2028_v51 = vpop.f32.mrb[39].mxu1  ;;  %6590 = vmatpush3.bf16.msra.mxu0 %v8783_v21  ;;  %6622 = vmatpush3.bf16.msra.mxu1 %v8783_v21 }
 0x3e0   : > { %v6591_v52 = vpack.c.bf16 %v6396_v11, %v1914_v50  ;;  %v8803_v12 = vpack.c.bf16 %v6418_v30, %v2028_v51  ;;  %v5426_v11 = vld [vmem:[%s11639_s12 + $0x1e8] sm:$0xff]  ;;  %v2611_v30 = vld [vmem:[%s11639_s12 + $0x40] sm:$0xff]  ;;  %v2613_v51 = vld [vmem:[%s11639_s12 + $0x50] sm:$0xff] }
 0x3e2   : > { %6592 = vmatprep.subr.bf16.mxu0 %v6591_v52  ;;  %6624 = vmatprep.subr.bf16.mxu1 %v6591_v52 }
 0x3e3   : > { %6594 = vmatpush3.bf16.msra.mxu0 %v8787_v31  ;;  %6626 = vmatpush3.bf16.msra.mxu1 %v8787_v31 }
 0x3e4   : > { %6596 = vmatprep.subr.bf16.mxu0 %v8791_v48  ;;  %6628 = vmatprep.subr.bf16.mxu1 %v8791_v48 }
 0x3e7   : > { %6598 = vmatpush3.bf16.msra.mxu0 %v8777_v4  ;;  %6630 = vmatpush3.bf16.msra.mxu1 %v8777_v4 }
 0x3e8   : > { %6600 = vmatprep.subr.bf16.mxu0 %v8795_v46  ;;  %6632 = vmatprep.subr.bf16.mxu1 %v8795_v46 }
 0x3eb   : > { %6602 = vmatpush3.bf16.msra.mxu0 %v8781_v6  ;;  %6634 = vmatpush3.bf16.msra.mxu1 %v8781_v6 }
 0x3ec   : > { %6604 = vmatprep.subr.bf16.mxu0 %v8799_v9  ;;  %6636 = vmatprep.subr.bf16.mxu1 %v8799_v9 }
 0x3ef   : > { %6606 = vmatpush3.bf16.msra.mxu0 %v8785_v24  ;;  %6638 = vmatpush3.bf16.msra.mxu1 %v8785_v24 }
 0x3f0   : > { %6608 = vmatprep.subr.bf16.mxu0 %v8803_v12  ;;  %6640 = vmatprep.subr.bf16.mxu1 %v8803_v12 }
 0x3f3   : > { %6610 = vmatpush3.bf16.msra.mxu0 %v8789_v45  ;;  %6642 = vmatpush3.bf16.msra.mxu1 %v8789_v45 }
 0x3f4   : > { %6644 = vmatprep.subr.bf16.mxu0 %v6579_v37  ;;  %6676 = vmatprep.subr.bf16.mxu1 %v6579_v37  ;;  %v5420_v37 = vld [vmem:[%s11639_s12 + $0x1b8] sm:$0xff] }
 0x3f6   : > { %2114 = vmatmul.mubr.f32.vlgmr.msra.gmra.mrb[24].mxu0 %v2041_v13  ;;  %2272 = vmatmul.mubr.f32.vlgmr.msra.gmra.mrb[40].mxu1 %v5385_v14  ;;  %v6717_v13 = vpack.c.bf16 %v2613_v51, %v2611_v30  ;;  %v2616_v14 = vld [vmem:[%s11639_s12 + $0x68] sm:$0xff]  ;;  %v5439_v51 = vld [vmem:[%s11639_s12 + $0x250] sm:$0xff] }
 0x3f7   : > { %6646 = vmatpush3.bf16.msra.mxu0 %v8775_v18  ;;  %6678 = vmatpush3.bf16.msra.mxu1 %v8775_v18  ;;  %v5395_v18 = vld [vmem:[%s11636_s9 + $0x90] sm:$0xff] }
 0x3f8   : > { %6648 = vmatprep.subr.bf16.mxu0 %v6583_v44  ;;  %6680 = vmatprep.subr.bf16.mxu1 %v6583_v44  ;;  %v5419_v44 = vld [vmem:[%s11639_s12 + $0x1b0] sm:$0xff] }
 0x3f9   : > { %2118 = vmatprep.mubr.f32.mxu0 %v2044_v16  ;;  %2276 = vmatprep.mubr.f32.mxu1 %v5388_v17  ;;  %v6761_v58 = vpack.c.bf16 %v5421_v47, %v5419_v44  ;;  %v2618_v16 = vld [vmem:[%s11639_s12 + $0x78] sm:$0xff] }
 0x3fa   : > { %2119 = vmatmul.mubr.f32.gmra.mrb[26].mxu0 %v2043_v19  ;;  %2277 = vmatmul.mubr.f32.gmra.mrb[42].mxu1 %v5387_v20  ;;  %v5428_v17 = vld [vmem:[%s11639_s12 + $0x1f8] sm:$0xff]  ;;  %v6719_v20 = vpack.c.bf16 %v2618_v16, %v2616_v14 }
 0x3fb   : > { %6650 = vmatpush3.bf16.msra.mxu0 %v8779_v32  ;;  %6682 = vmatpush3.bf16.msra.mxu1 %v8779_v32  ;;  %v5400_v32 = vld [vmem:[%s11636_s9 + $0xb8] sm:$0xff] }
 0x3fc   : > { %6652 = vmatprep.subr.bf16.mxu0 %v6587_v8  ;;  %6684 = vmatprep.subr.bf16.mxu1 %v6587_v8  ;;  %v6715_v8 = vpack.c.bf16 %v2614_v57, %v2612_v49  ;;  %v5440_v44 = vld [vmem:[%s11639_s12 + $0x258] sm:$0xff] }
 0x3fd   : > { %2123 = vmatprep.mubr.f32.mxu0 %v2046_v59  ;;  %2281 = vmatprep.mubr.f32.mxu1 %v5390_v54  ;;  %v5430_v59 = vld [vmem:[%s11639_s12 + $0x208] sm:$0xff]  ;;  %v2615_v54 = vld [vmem:[%s11639_s12 + $0x60] sm:$0xff] }
 0x3fe   : > { %2124 = vmatmul.mubr.f32.gmra.mrb[28].mxu0 %v2045_v53  ;;  %2282 = vmatmul.mubr.f32.gmra.mrb[44].mxu1 %v5389_v10  ;;  %v2617_v53 = vld [vmem:[%s11639_s12 + $0x70] sm:$0xff]  ;;  %v6767_v10 = vpack.c.bf16 %v5430_v59, %v5428_v17  ;;  %v5446_v59 = vld [vmem:[%s11639_s12 + $0x288] sm:$0xff] }
 0x3ff   : > { %6654 = vmatpush3.bf16.msra.mxu0 %v8783_v21  ;;  %6686 = vmatpush3.bf16.msra.mxu1 %v8783_v21  ;;  %v5416_v21 = vld [vmem:[%s11639_s12 + $0x198] sm:$0xff] }
 0x400   : > { %6656 = vmatprep.subr.bf16.mxu0 %v6591_v52  ;;  %6688 = vmatprep.subr.bf16.mxu1 %v6591_v52  ;;  %v6755_v29 = vpack.c.bf16 %v5418_v25, %v5416_v21  ;;  %v5423_v52 = vld [vmem:[%s11639_s12 + $0x1d0] sm:$0xff] }
 0x401   : > { %2128 = vmatprep.mubr.f32.mxu0 %v2048_v60  ;;  %2286 = vmatprep.mubr.f32.mxu1 %v5392_v63  ;;  %v5427_v60 = vld [vmem:[%s11639_s12 + $0x1f0] sm:$0xff]  ;;  %v5429_v63 = vld [vmem:[%s11639_s12 + $0x200] sm:$0xff] }
 0x402   : > { %2129 = vmatmul.mubr.f32.gmra.mrb[30].mxu0 %v2047_v7  ;;  %2287 = vmatmul.mubr.f32.gmra.mrb[46].mxu1 %v5391_v15  ;;  %v2620_v7 = vld [vmem:[%s11639_s12 + $0x88] sm:$0xff]  ;;  %v2622_v15 = vld [vmem:[%s11639_s12 + $0x98] sm:$0xff] }
 0x403   : > { %6658 = vmatpush3.bf16.msra.mxu0 %v8787_v31  ;;  %6690 = vmatpush3.bf16.msra.mxu1 %v8787_v31  ;;  %v6709_v31 = vpack.c.bf16 %v2605_v27, %v2603_v26  ;;  %v5436_v26 = vld [vmem:[%s11639_s12 + $0x238] sm:$0xff]  ;;  %v5438_v27 = vld [vmem:[%s11639_s12 + $0x248] sm:$0xff] }
 0x404   : > { %6660 = vmatprep.subr.bf16.mxu0 %v8791_v48  ;;  %6692 = vmatprep.subr.bf16.mxu1 %v8791_v48  ;;  %v5422_v48 = vld [vmem:[%s11639_s12 + $0x1c8] sm:$0xff] }
 0x405   : > { %2385 = vmatprep.mubr.f32.mxu0 %v5394_v55  ;;  %2499 = vmatprep.mubr.f32.mxu1 %v5402_v56  ;;  %v6759_v40 = vpack.c.bf16 %v5422_v48, %v5420_v37  ;;  %v5432_v55 = vld [vmem:[%s11639_s12 + $0x218] sm:$0xff]  ;;  %v5434_v56 = vld [vmem:[%s11639_s12 + $0x228] sm:$0xff] }
 0x407   : > { %6662 = vmatpush3.bf16.msra.mxu0 %v8777_v4  ;;  %6694 = vmatpush3.bf16.msra.mxu1 %v8777_v4  ;;  %v5403_v4 = vld [vmem:[%s11636_s9 + $0xd0] sm:$0xff] }
 0x408   : > { %6664 = vmatprep.subr.bf16.mxu0 %v8795_v46  ;;  %6696 = vmatprep.subr.bf16.mxu1 %v8795_v46  ;;  %v6713_v46 = vpack.c.bf16 %v2609_v42, %v2607_v41  ;;  %v2628_v41 = vld [vmem:[%s11639_s12 + $0xc8] sm:$0xff]  ;;  %v2630_v42 = vld [vmem:[%s11639_s12 + $0xd8] sm:$0xff] }
 0x409   : > { %v6731_v57 = vpack.c.bf16 %v2630_v42, %v2628_v41  ;;  %v5449_v41 = vld [vmem:[%s11639_s12 + $0x2a0] sm:$0xff]  ;;  %v2640_v42 = vld [vmem:[%s11639_s12 + $0x128] sm:$0xff] }
 0x40b   : > { %6666 = vmatpush3.bf16.msra.mxu0 %v8781_v6  ;;  %6698 = vmatpush3.bf16.msra.mxu1 %v8781_v6  ;;  %v5408_v6 = vld [vmem:[%s11636_s9 + $0xf8] sm:$0xff] }
 0x40c   : > { %6668 = vmatprep.subr.bf16.mxu0 %v8799_v9  ;;  %6700 = vmatprep.subr.bf16.mxu1 %v8799_v9  ;;  %v5424_v9 = vld [vmem:[%s11639_s12 + $0x1d8] sm:$0xff] }
 0x40d   : > { %v6763_v50 = vpack.c.bf16 %v5426_v11, %v5424_v9  ;;  %v2629_v9 = vld [vmem:[%s11639_s12 + $0xd0] sm:$0xff] }
 0x40f   : > { %6670 = vmatpush3.bf16.msra.mxu0 %v8785_v24  ;;  %6702 = vmatpush3.bf16.msra.mxu1 %v8785_v24  ;;  %v6707_v24 = vpack.c.bf16 %v2606_v43, %v2604_v38  ;;  %v2626_v38 = vld [vmem:[%s11639_s12 + $0xb8] sm:$0xff] }
 0x410   : > { %6672 = vmatprep.subr.bf16.mxu0 %v8803_v12  ;;  %6704 = vmatprep.subr.bf16.mxu1 %v8803_v12  ;;  %v5425_v12 = vld [vmem:[%s11639_s12 + $0x1e0] sm:$0xff] }
 0x411   : > { %v6765_v19 = vpack.c.bf16 %v5425_v12, %v5423_v52  ;;  %v5441_v52 = vld [vmem:[%s11639_s12 + $0x260] sm:$0xff]  ;;  %v2632_v12 = vld [vmem:[%s11639_s12 + $0xe8] sm:$0xff] }
 0x413   : > { %6674 = vmatpush3.bf16.msra.mxu0 %v8789_v45  ;;  %6706 = vmatpush3.bf16.msra.mxu1 %v8789_v45  ;;  %v5415_v45 = vld [vmem:[%s11639_s12 + $0x190] sm:$0xff] }
 0x414   : > { %6708 = vmatprep.subr.bf16.mxu0 %v6707_v24  ;;  %v6757_v35 = vpack.c.bf16 %v5417_v33, %v5415_v45  ;;  %6756 = vmatprep.subr.bf16.mxu1 %v6755_v29  ;;  %v2623_v29 = vld [vmem:[%s11639_s12 + $0xa0] sm:$0xff]  ;;  %v6775_v33 = vpack.c.bf16 %v5438_v27, %v5436_v26  ;;  %v2637_v27 = vld [vmem:[%s11639_s12 + $0x110] sm:$0xff] }
 0x415   : > { %v2635_v26 = vld [vmem:[%s11639_s12 + $0x100] sm:$0xff] }
 0x416   : > { %2386 = vmatmul.mubr.f32.vlgmr.msra.gmra.mrb[32].mxu0 %v5393_v0  ;;  %2500 = vmatmul.mubr.f32.vlgmr.msra.gmra.mrb[48].mxu1 %v5401_v61  ;;  %v6721_v0 = vpack.c.bf16 %v2617_v53, %v2615_v54  ;;  %v6769_v61 = vpack.c.bf16 %v5429_v63, %v5427_v60  ;;  %v6781_v54 = vpack.c.bf16 %v5441_v52, %v5439_v51  ;;  %v2633_v60 = vld [vmem:[%s11639_s12 + $0xf0] sm:$0xff] }
 0x417   : > { %2390 = vmatprep.mubr.f32.mxu0 %v5396_v62  ;;  %2504 = vmatprep.mubr.f32.mxu1 %v5404_v3  ;;  %v6723_v62 = vpack.c.bf16 %v2622_v15, %v2620_v7  ;;  %v6771_v3 = vpack.c.bf16 %v5434_v56, %v5432_v55  ;;  %v5443_v63 = vld [vmem:[%s11639_s12 + $0x270] sm:$0xff] }
 0x418   : > { %6710 = vmatpush1.bf16.msra.mxu0 %v6709_v31  ;;  %6758 = vmatpush1.bf16.msra.mxu1 %v6757_v35  ;;  %v5435_v35 = vld [vmem:[%s11639_s12 + $0x230] sm:$0xff] }
 0x419   : > { %6712 = vmatprep.subr.bf16.mxu0 %v6711_v39  ;;  %6760 = vmatprep.subr.bf16.mxu1 %v6759_v40  ;;  %v6729_v39 = vpack.c.bf16 %v2625_v34, %v2623_v29  ;;  %v6777_v40 = vpack.c.bf16 %v5437_v36, %v5435_v35  ;;  %v5447_v35 = vld [vmem:[%s11639_s12 + $0x290] sm:$0xff] }
 0x41a   : > { %2391 = vmatmul.mubr.f32.gmra.mrb[34].mxu0 %v5395_v18  ;;  %2505 = vmatmul.mubr.f32.gmra.mrb[50].mxu1 %v5403_v4  ;;  %v9045_v18 = vpop.permute.xlu0 %2164  ;;  %v9047_v4 = vpop.permute.xlu1 %2136  ;;  %v5451_v51 = vld [vmem:[%s11639_s12 + $0x2b0] sm:$0xff] }
 0x41b   : > { %2395 = vmatprep.mubr.f32.mxu0 %v5398_v1  ;;  %2509 = vmatprep.mubr.f32.mxu1 %v5406_v2  ;;  %v2619_v1 = vld [vmem:[%s11639_s12 + $0x80] sm:$0xff]  ;;  %v2621_v2 = vld [vmem:[%s11639_s12 + $0x90] sm:$0xff] }
 0x41c   : > { %6714 = vmatpush1.bf16.msra.mxu0 %v6713_v46  ;;  %6762 = vmatpush1.bf16.msra.mxu1 %v6761_v58  ;;  %v5442_v58 = vld [vmem:[%s11639_s12 + $0x268] sm:$0xff] }
 0x41d   : > { %6716 = vmatprep.subr.bf16.mxu0 %v6715_v8  ;;  %6764 = vmatprep.subr.bf16.mxu1 %v6763_v50  ;;  %v2627_v8 = vld [vmem:[%s11639_s12 + $0xc0] sm:$0xff]  ;;  %v6779_v50 = vpack.c.bf16 %v5442_v58, %v5440_v44  ;;  %v2642_v44 = vld [vmem:[%s11639_s12 + $0x138] sm:$0xff] }
 0x41e   : > { %2396 = vmatmul.mubr.f32.gmra.mrb[36].mxu0 %v5397_v28  ;;  %2510 = vmatmul.mubr.f32.gmra.mrb[52].mxu1 %v5405_v5  ;;  %v5431_v28 = vld [vmem:[%s11639_s12 + $0x210] sm:$0xff]  ;;  %v9087_v37 = vpop.permute.xlu0 %2169  ;;  %v9089_v48 = vpop.permute.xlu1 %2141  ;;  %v6733_v17 = vpack.c.bf16 %v2629_v9, %v2627_v8  ;;  %v5452_v58 = vld [vmem:[%s11639_s12 + $0x2b8] sm:$0xff]  ;;  %v5454_v8 = vld [vmem:[%s11639_s12 + $0x2c8] sm:$0xff]  ;;  %v6789_v9 = vpack.c.bf16 %v5449_v41, %v5447_v35 }
 0x41f   : > { %2400 = vmatprep.mubr.f32.mxu0 %v5400_v32  ;;  %2514 = vmatprep.mubr.f32.mxu1 %v5408_v6  ;;  %v6725_v6 = vpack.c.bf16 %v2621_v2, %v2619_v1  ;;  %v2636_v1 = vld [vmem:[%s11639_s12 + $0x108] sm:$0xff]  ;;  %v5463_v35 = vld [vmem:[%s11639_s12 + $0x310] sm:$0xf]  ;;  %v5474_v41 = vld [vmem:[%s11639_s12 + $0x338] sm:$0xff] }
 0x420   : > { %6718 = vmatpush1.bf16.msra.mxu0 %v6717_v13  ;;  %6766 = vmatpush1.bf16.msra.mxu1 %v6765_v19  ;;  %v2634_v19 = vld [vmem:[%s11639_s12 + $0xf8] sm:$0xff] }
 0x421   : > { %6720 = vmatprep.subr.bf16.mxu0 %v6719_v20  ;;  %6768 = vmatprep.subr.bf16.mxu1 %v6767_v10  ;;  %v5444_v20 = vld [vmem:[%s11639_s12 + $0x278] sm:$0xff]  ;;  %v6735_v53 = vpack.c.bf16 %v2634_v19, %v2632_v12  ;;  %v2631_v10 = vld [vmem:[%s11639_s12 + $0xe0] sm:$0xff] }
 0x422   : > { %2401 = vmatmul.mubr.f32.gmra.mrb[38].mxu0 %v5399_v22  ;;  %2515 = vmatmul.mubr.f32.gmra.mrb[54].mxu1 %v5407_v23  ;;  %v5433_v22 = vld [vmem:[%s11639_s12 + $0x220] sm:$0xff]  ;;  %v2624_v23 = vld [vmem:[%s11639_s12 + $0xa8] sm:$0xff]  ;;  %v5456_v19 = vld [vmem:[%s11639_s12 + $0x2d8] sm:$0xff] }
 0x423   : > { %v6773_v24 = vpack.c.bf16 %v5433_v22, %v5431_v28  ;;  %v6727_v25 = vpack.c.bf16 %v2626_v38, %v2624_v23  ;;  %v5448_v22 = vld [vmem:[%s11639_s12 + $0x298] sm:$0xff]  ;;  %v5450_v23 = vld [vmem:[%s11639_s12 + $0x2a8] sm:$0xff]  ;;  %v9159_v38 = vpop.permute.xlu0 %2174  ;;  %v5453_v12 = vld [vmem:[%s11639_s12 + $0x2c0] sm:$0xff] }
 0x424   : > { %6722 = vmatpush1.bf16.msra.mxu0 %v6721_v0  ;;  %6770 = vmatpush1.bf16.msra.mxu1 %v6769_v61  ;;  %v6783_v0 = vpack.c.bf16 %v5446_v59, %v5444_v20  ;;  %v5445_v61 = vld [vmem:[%s11639_s12 + $0x280] sm:$0xff]  ;;  %v5458_v20 = vld [vmem:[%s11639_s12 + $0x2e8] sm:$0xff] }
 0x425   : > { %6724 = vmatprep.subr.bf16.mxu0 %v6723_v62  ;;  %6772 = vmatprep.subr.bf16.mxu1 %v6771_v3 }
 0x428   : > { %6726 = vmatpush1.bf16.msra.mxu0 %v6725_v6  ;;  %6774 = vmatpush1.bf16.msra.mxu1 %v6773_v24  ;;  %v2638_v6 = vld [vmem:[%s11639_s12 + $0x118] sm:$0xff]  ;;  %v6785_v24 = vpack.c.bf16 %v5445_v61, %v5443_v63  ;;  %v2648_v61 = vld [vmem:[%s11639_s12 + $0x168] sm:$0xff] }
 0x429   : > { %6728 = vmatprep.subr.bf16.mxu0 %v6727_v25  ;;  %6776 = vmatprep.subr.bf16.mxu1 %v6775_v33  ;;  %v6739_v25 = vpack.c.bf16 %v2638_v6, %v2636_v1  ;;  %v5462_v1 = vld [vmem:[%s11639_s12 + $0x308] sm:$0xff]  ;;  %v2647_v6 = vld [vmem:[%s11639_s12 + $0x160] sm:$0xff] }
 0x42c   : > { %6730 = vmatpush1.bf16.msra.mxu0 %v6729_v39  ;;  %6778 = vmatpush1.bf16.msra.mxu1 %v6777_v40  ;;  %v6787_v40 = vpack.c.bf16 %v5450_v23, %v5448_v22  ;;  %v2649_v22 = vld [vmem:[%s11639_s12 + $0x170] sm:$0xff] }
 0x42d   : > { %6732 = vmatprep.subr.bf16.mxu0 %v6731_v57  ;;  %6780 = vmatprep.subr.bf16.mxu1 %v6779_v50  ;;  %v6741_v57 = vpack.c.bf16 %v2637_v27, %v2635_v26  ;;  %v2641_v50 = vld [vmem:[%s11639_s12 + $0x130] sm:$0xff]  ;;  %v2652_v27 = vld [vmem:[%s11639_s12 + $0x188] sm:$0xf] }
 0x430   : > { %6734 = vmatpush1.bf16.msra.mxu0 %v6733_v17  ;;  %6782 = vmatpush1.bf16.msra.mxu1 %v6781_v54  ;;  %v6791_v17 = vpack.c.bf16 %v5454_v8, %v5452_v58  ;;  %v9292_v58 = vpop.permute.xlu0 %2179 }
 0x431   : > { %6736 = vmatprep.subr.bf16.mxu0 %v6735_v53  ;;  %6784 = vmatprep.subr.bf16.mxu1 %v6783_v0  ;;  %v5457_v0 = vld [vmem:[%s11639_s12 + $0x2e0] sm:$0xff] }
 0x434   : > { %6786 = vmatpush1.bf16.msra.mxu1 %v6785_v24  ;;  %v5461_v24 = vld [vmem:[%s11639_s12 + $0x300] sm:$0xff] }
 0x435   : > { %6788 = vmatprep.subr.bf16.mxu1 %v6787_v40  ;;  %v5472_v40 = vld [vmem:[%s11639_s12 + $0x328] sm:$0xff] }
 0x438   : > { %6790 = vmatpush1.bf16.msra.mxu1 %v6789_v9 }
 0x439   : > { %6792 = vmatprep.subr.bf16.mxu1 %v6791_v17 }
 0x4c9   : > { %v6011_v5 = vpop.f32.mrb[24].mxu0  ;;  %v6055_v32 = vpop.f32.mrb[40].mxu1 }
 0x4ca   : > { %v6012_v43 = vpop.f32.mrb[25].mxu0  ;;  %v6056_v21 = vpop.f32.mrb[41].mxu1 }
 0x4cb   : > { %v9076_v31 = vadd.f32 %v6012_v43, %v6011_v5  ;;  %v6057_v45 = vadd.f32 %v6056_v21, %v6055_v32  ;;  %v6737_v32 = vpack.c.bf16 %v2633_v60, %v2631_v10  ;;  %v9161_v43 = vpop.permute.xlu1 %2146  ;;  %v6793_v60 = vpack.c.bf16 %v5453_v12, %v5451_v51 }
 0x4cd   : > { %v2292_v46 = vmul.f32 %v6057_v45, %v9047_v4  ;;  %v6014_v47 = vpop.f32.mrb[26].mxu0  ;;  %v6058_v49 = vpop.f32.mrb[42].mxu1  ;;  %6738 = vmatpush1.bf16.msra.mxu0 %v6737_v32  ;;  %6794 = vmatpush1.bf16.msra.mxu1 %v6793_v60 }
 0x4ce   : > { %v6015_v11 = vpop.f32.mrb[27].mxu0  ;;  %v6059_v30 = vpop.f32.mrb[43].mxu1  ;;  %6740 = vmatprep.subr.bf16.mxu0 %v6739_v25  ;;  %v6753_v25 = vpack.c.bf16 %v2649_v22, %v2647_v6 }
 0x4cf   : > { %v2296_v13 = vadd.f32 %v2292_v46, %v9045_v18  ;;  %v9120_v14 = vadd.f32 %v6015_v11, %v6014_v47  ;;  %v6060_v16 = vadd.f32 %v6059_v30, %v6058_v49  ;;  %v6743_v11 = vpack.c.bf16 %v2642_v44, %v2640_v42  ;;  %v2639_v30 = vld [vmem:[%s11639_s12 + $0x120] sm:$0xff]  ;;  %v5528_v42 = vld [vmem:[%s11639_s12 + $0x4b8] sm:$0xff] }
 0x4d0   : > { %v6745_v53 = vpack.c.bf16 %v2641_v50, %v2639_v30 }
 0x4d1   : > { %v2293_v7 = vmul.f32 %v6060_v16, %v9089_v48  ;;  %v6017_v15 = vpop.f32.mrb[28].mxu0  ;;  %v6061_v55 = vpop.f32.mrb[44].mxu1  ;;  %vm2300_vm11 = vcmp.ge.f32.partialorder %v2296_v13, 0.0  ;;  %v2304_v56 = vmul.f32 0.01, %v2296_v13  ;;  %v2646_v16 = vld [vmem:[%s11639_s12 + $0x158] sm:$0xff]  ;;  %6742 = vmatpush1.bf16.msra.mxu0 %v6741_v57 }
 0x4d2   : > { %v6018_v62 = vpop.f32.mrb[29].mxu0  ;;  %v6062_v3 = vpop.f32.mrb[45].mxu1  ;;  %6744 = vmatprep.subr.bf16.mxu0 %v6743_v11  ;;  %v5530_v57 = vld [vmem:[%s11639_s12 + $0x4c8] sm:$0xff] }
 0x4d3   : > { %v2297_v2 = vadd.f32 %v2293_v7, %v9087_v37  ;;  %v9148_v28 = vadd.f32 %v6018_v62, %v6017_v15  ;;  %v6063_v5 = vadd.f32 %v6062_v3, %v6061_v55  ;;  %v2308_v21 = vsel %vm2300_vm11, %v2296_v13, %v2304_v56  ;;  %v2644_v13 = vld [vmem:[%s11639_s12 + $0x148] sm:$0xff]  ;;  %v2643_v7 = vld [vmem:[%s11639_s12 + $0x140] sm:$0xff]  ;;  %v2645_v15 = vld [vmem:[%s11639_s12 + $0x150] sm:$0xff] }
 0x4d4   : > { %2544 = vrot.lane.b32.xlu1 %v2308_v21, %s8035_s25  ;;  %v6747_v63 = vpack.c.bf16 %v2646_v16, %v2644_v13  ;;  %v5455_v55 = vld [vmem:[%s11639_s12 + $0x2d0] sm:$0xff]  ;;  %v6795_v56 = vpack.c.bf16 %v5458_v20, %v5456_v19  ;;  %v2650_v62 = vld [vmem:[%s11639_s12 + $0x178] sm:$0xff]  ;;  %v6851_v11 = vpack.c.bf16 %v5530_v57, %v5528_v42  ;;  %vm2598_vm11 = vcmask 154624  }
 0x4d5   : > { %v2305_v29 = vmul.f32 0.01, %v2297_v2  ;;  %v2294_v45 = vmul.f32 %v6063_v5, %v9161_v43  ;;  %v6020_v33 = vpop.f32.mrb[30].mxu0  ;;  %v6064_v34 = vpop.f32.mrb[46].mxu1  ;;  %vm2301_vm12 = vcmp.ge.f32.partialorder %v2297_v2, 0.0  ;;  %v5460_v3 = vld [vmem:[%s11639_s12 + $0x2f8] sm:$0xff]  ;;  %6746 = vmatpush1.bf16.msra.mxu0 %v6745_v53  ;;  %v6797_v5 = vpack.c.bf16 %v5457_v0, %v5455_v55 }
 0x4d6   : > { %v6021_v36 = vpop.f32.mrb[31].mxu0  ;;  %v6065_v39 = vpop.f32.mrb[47].mxu1  ;;  %6748 = vmatprep.subr.bf16.mxu0 %v6747_v63  ;;  %v6751_v32 = vpack.c.bf16 %v2650_v62, %v2648_v61  ;;  %6796 = vmatprep.subr.bf16.mxu1 %v6795_v56  ;;  %v6799_v23 = vpack.c.bf16 %v5462_v1, %v5460_v3  ;;  %v5459_v21 = vld [vmem:[%s11639_s12 + $0x2f0] sm:$0xff] }
 0x4d7   : > { %v2298_v46 = vadd.f32 %v2294_v45, %v9159_v38  ;;  %v9185_v47 = vadd.f32 %v6021_v36, %v6020_v33  ;;  %v9187_v49 = vadd.f32 %v6065_v39, %v6064_v34  ;;  %v9220_v59 = vsel %vm2301_vm12, %v2297_v2, %v2305_v29  ;;  %6798 = vmatpush1.bf16.msra.mxu1 %v6797_v5  ;;  %v5464_v29 = vld [vmem:[%s11639_s12 + $0x318] sm:$0xf]  ;;  %v9268_v45 = vpop.permute.xlu1 %2151  ;;  %v2651_v34 = vld [vmem:[%s11639_s12 + $0x180] sm:$0xf] }
 0x4d8   : > { %v6749_v2 = vpack.c.bf16 %v2645_v15, %v2643_v7  ;;  %v6801_v26 = vpack.c.bf16 %v5461_v24, %v5459_v21  ;;  %6800 = vmatprep.subr.bf16.mxu1 %v6799_v23  ;;  %vm2653_vm12 = vcmask 556032  }
 0x4d9   : > { %v2306_v52 = vmul.f32 0.01, %v2298_v46  ;;  %vm2302_vm13 = vcmp.ge.f32.partialorder %v2298_v46, 0.0  ;;  %v2295_v33 = vmul.f32 %v9187_v49, %v9268_v45  ;;  %v6803_v49 = vpack.c.bf16 %v5474_v41, %v5472_v40 }
 0x4da   : > { %6750 = vmatpush1.bf16.msra.mxu0 %v6749_v2 }
 0x4db   : > { %v9222_v54 = vsel %vm2302_vm13, %v2298_v46, %v2306_v52  ;;  %6752 = vmatprep.subr.bf16.mxu0 %v6751_v32  ;;  %6802 = vmatpush1.bf16.msra.mxu1 %v6801_v26  ;;  %v2299_v30 = vadd.f32 %v2295_v33, %v9292_v58 }
 0x4dc   : > { %v8005_v10 = vpack.i.bf16 %v9222_v54, %v9220_v59  ;;  %5465 = vmatprep.subr.msk.mxu1 %vm1586_vm2, %v5464_v29 }
 0x4dd   : > { %v2307_v60 = vmul.f32 0.01, %v2299_v30  ;;  %vm2303_vm0 = vcmp.ge.f32.partialorder %v2299_v30, 0.0 }
 0x4de   : > { %6754 = vmatpush1.bf16.msra.mxu0 %v6753_v25 }
 0x4df   : > { %5409 = vmatprep.subr.msk.mxu0 %vm1586_vm2, %v2652_v27  ;;  %5466 = vmatpush1.msk.msra.mxu1 %vm1586_vm2, %v5463_v35  ;;  %v2311_v27 = vsel %vm2303_vm0, %v2299_v30, %v2307_v60  ;;  %v5471_v60 = vld [vmem:[%s11639_s12 + $0x320] sm:$0xff]  ;;  %vm3687_vm0 = vcmask 1040384  }
 0x4e0   : > { %6852 = vmatprep.subr.bf16.mxu1 %v6851_v11 }
 0x4e2   : > { %5410 = vmatpush1.msk.msra.mxu0 %vm1586_vm2, %v2651_v34 }
 0x4e3   : > { %6804 = vmatprep.subr.bf16.mxu0 %v6803_v49 }
 0x4e9   : > { %v6099_v36 = vpop.f32.mrb[32].mxu0  ;;  %v6143_v39 = vpop.f32.mrb[48].mxu1 }
 0x4ea   : > { %v6100_v44 = vpop.f32.mrb[33].mxu0  ;;  %v6144_v46 = vpop.f32.mrb[49].mxu1 }
 0x4eb   : > { %v6101_v8 = vadd.f32 %v6100_v44, %v6099_v36  ;;  %v6145_v9 = vadd.f32 %v6144_v46, %v6143_v39 }
 0x4ed   : > { %v2406_v50 = vmul.f32 %v6101_v8, %v9047_v4  ;;  %v2520_v51 = vmul.f32 %v6145_v9, %v9047_v4  ;;  %v6102_v52 = vpop.f32.mrb[34].mxu0  ;;  %v6146_v12 = vpop.f32.mrb[50].mxu1 }
 0x4ee   : > { %v6103_v13 = vpop.f32.mrb[35].mxu0  ;;  %v6147_v16 = vpop.f32.mrb[51].mxu1 }
 0x4ef   : > { %v2410_v17 = vadd.f32 %v2406_v50, %v9045_v18  ;;  %v2524_v19 = vadd.f32 %v2520_v51, %v9045_v18  ;;  %v6104_v20 = vadd.f32 %v6103_v13, %v6102_v52  ;;  %v6148_v53 = vadd.f32 %v6147_v16, %v6146_v12  ;;  %v3199_v50 = vld [vmem:[%s11641_s14] sm:$0xff]  ;;  %v3200_v52 = vld [vmem:[%s11641_s14 + $0x8] sm:$0xff] }
 0x4f0   : > { %v3294_v51 = vld [vmem:[%s11642_s15] sm:$0xff]  ;;  %v3295_v12 = vld [vmem:[%s11642_s15 + $0x8] sm:$0xff]  ;;  %v2154_v16 = vmul.f32 %v9076_v31, %v9047_v4  ;;  %v5527_v4 = vld [vmem:[%s11639_s12 + $0x4b0] sm:$0xff] }
 0x4f1   : > { %v2407_v63 = vmul.f32 %v6104_v20, %v9089_v48  ;;  %v2521_v7 = vmul.f32 %v6148_v53, %v9089_v48  ;;  %v6105_v15 = vpop.f32.mrb[36].mxu0  ;;  %v6149_v55 = vpop.f32.mrb[52].mxu1  ;;  %vm2414_vm14 = vcmp.ge.f32.partialorder %v2410_v17, 0.0  ;;  %v2418_v56 = vmul.f32 0.01, %v2410_v17  ;;  %v5476_v31 = vld [vmem:[%s11639_s12 + $0x348] sm:$0xff] }
 0x4f2   : > { %v6106_v0 = vpop.f32.mrb[37].mxu0  ;;  %v6150_v61 = vpop.f32.mrb[53].mxu1  ;;  %vm2528_vm15 = vcmp.ge.f32.partialorder %v2524_v19, 0.0  ;;  %v2532_v62 = vmul.f32 0.01, %v2524_v19 }
 0x4f3   : > { %v2411_v3 = vadd.f32 %v2407_v63, %v9087_v37  ;;  %v2525_v1 = vadd.f32 %v2521_v7, %v9087_v37  ;;  %v6107_v2 = vadd.f32 %v6106_v0, %v6105_v15  ;;  %v6151_v5 = vadd.f32 %v6150_v61, %v6149_v55  ;;  %v5827_v13 = vld [vmem:[#allocation2] ss:$0 sm:$0xff]  ;;  %v5473_v63 = vld [vmem:[%s11639_s12 + $0x330] sm:$0xff]  ;;  %v5532_v7 = vld [vmem:[%s11639_s12 + $0x4d8] sm:$0xff] }
 0x4f4   : > { %v2422_v32 = vsel %vm2414_vm14, %v2410_v17, %v2418_v56  ;;  %v2536_v6 = vsel %vm2528_vm15, %v2524_v19, %v2532_v62  ;;  %v2182_v17 = vadd.f32 %v9045_v18, %v2154_v16  ;;  %v2155_v19 = vmul.f32 %v9120_v14, %v9089_v48  ;;  %v5529_v18 = vld [vmem:[%s11639_s12 + $0x4c0] sm:$0xff]  ;;  %v5478_v14 = vld [vmem:[%s11639_s12 + $0x358] sm:$0xff]  ;;  %v5534_v15 = vld [vmem:[%s11639_s12 + $0x4e8] sm:$0xff] }
 0x4f5   : > { %v2408_v22 = vmul.f32 %v6107_v2, %v9161_v43  ;;  %v2522_v23 = vmul.f32 %v6151_v5, %v9161_v43  ;;  %2560 = vrot.lane.b32.xlu0 %v2422_v32, %s8036_s26  ;;  %2576 = vrot.lane.b32.xlu1 %v2536_v6, %s8037_s27  ;;  %v6108_v21 = vpop.f32.mrb[38].mxu0  ;;  %v6152_v24 = vpop.f32.mrb[54].mxu1  ;;  %v2533_v34 = vmul.f32 0.01, %v2525_v1  ;;  %v2419_v35 = vmul.f32 0.01, %v2411_v3 }
 0x4f6   : > { %v6109_v25 = vpop.f32.mrb[39].mxu0  ;;  %v6153_v26 = vpop.f32.mrb[55].mxu1  ;;  %vm2529_vm1 = vcmp.ge.f32.partialorder %v2525_v1, 0.0  ;;  %vm2415_vm3 = vcmp.ge.f32.partialorder %v2411_v3, 0.0  ;;  %v2190_v20 = vmul.f32 0.01, %v2182_v17  ;;  %v2183_v48 = vadd.f32 %v9087_v37, %v2155_v19 }
 0x4f7   : > { %v6110_v29 = vadd.f32 %v6109_v25, %v6108_v21  ;;  %v6154_v33 = vadd.f32 %v6153_v26, %v6152_v24  ;;  %v2412_v36 = vadd.f32 %v2408_v22, %v9159_v38  ;;  %v2526_v39 = vadd.f32 %v2522_v23, %v9159_v38  ;;  %v5477_v2 = vld [vmem:[%s11639_s12 + $0x350] sm:$0xff]  ;;  %v5533_v22 = vld [vmem:[%s11639_s12 + $0x4e0] sm:$0xff]  ;;  %v5480_v23 = vld [vmem:[%s11639_s12 + $0x368] sm:$0xff] }
 0x4f8   : > { %v2537_v42 = vsel %vm2529_vm1, %v2525_v1, %v2533_v34  ;;  %v2423_v44 = vsel %vm2415_vm3, %v2411_v3, %v2419_v35  ;;  %vm2186_vm8 = vcmp.ge.f32.partialorder %v2182_v17, 0.0  ;;  %v2156_v55 = vmul.f32 %v9148_v28, %v9161_v43  ;;  %v5475_v1 = vld [vmem:[%s11639_s12 + $0x340] sm:$0xff]  ;;  %v5531_v6 = vld [vmem:[%s11639_s12 + $0x4d0] sm:$0xff]  ;;  %v5482_v24 = vld [vmem:[%s11639_s12 + $0x378] sm:$0xff] }
 0x4f9   : > { %v2409_v40 = vmul.f32 %v6110_v29, %v9268_v45  ;;  %v2523_v41 = vmul.f32 %v6154_v33, %v9268_v45  ;;  %8006 = vrot.lane.b32.xlu0 %v8005_v10, %s8035_s25  ;;  %2550 = vrot.lane.b32.xlu1 %v2311_v27, %s8035_s25  ;;  %v2534_v57 = vmul.f32 0.01, %v2526_v39  ;;  %v2420_v8 = vmul.f32 0.01, %v2412_v36  ;;  %v5536_v25 = vld [vmem:[%s11639_s12 + $0x4f8] sm:$0xff]  ;;  %v5538_v26 = vld [vmem:[%s11639_s12 + $0x508] sm:$0xff] }
 0x4fa   : > { %vm2530_vm4 = vcmp.ge.f32.partialorder %v2526_v39, 0.0  ;;  %vm2416_vm5 = vcmp.ge.f32.partialorder %v2412_v36, 0.0  ;;  %v2194_v56 = vsel %vm2186_vm8, %v2182_v17, %v2190_v20  ;;  %v6805_v62 = vpack.c.bf16 %v5473_v63, %v5471_v60  ;;  %v5541_v20 = vld [vmem:[%s11639_s12 + $0x520] sm:$0xff]  ;;  %v5490_v60 = vld [vmem:[%s11639_s12 + $0x3b8] sm:$0xff] }
 0x4fb   : > { %v2413_v46 = vadd.f32 %v2409_v40, %v9292_v58  ;;  %v2527_v49 = vadd.f32 %v2523_v41, %v9292_v58  ;;  %v2538_v9 = vsel %vm2530_vm4, %v2526_v39, %v2534_v57  ;;  %v2424_v11 = vsel %vm2416_vm5, %v2412_v36, %v2420_v8  ;;  %v5479_v39 = vld [vmem:[%s11639_s12 + $0x360] sm:$0xff]  ;;  %v5540_v57 = vld [vmem:[%s11639_s12 + $0x518] sm:$0xff]  ;;  %v5542_v8 = vld [vmem:[%s11639_s12 + $0x528] sm:$0xff] }
 0x4fc   : > { %v6853_v3 = vpack.c.bf16 %v5529_v18, %v5527_v4  ;;  %v6807_v43 = vpack.c.bf16 %v5478_v14, %v5476_v31  ;;  %v6855_v32 = vpack.c.bf16 %v5534_v15, %v5532_v7  ;;  %v2191_v21 = vmul.f32 0.01, %v2183_v48  ;;  %v5544_v63 = vld [vmem:[%s11639_s12 + $0x538] sm:$0xff]  ;;  %v5546_v4 = vld [vmem:[%s11639_s12 + $0x548] sm:$0xff] }
 0x4fd   : > { %2578 = vrot.lane.b32.xlu0 %v2537_v42, %s8037_s27  ;;  %2562 = vrot.lane.b32.xlu1 %v2423_v44, %s8036_s26  ;;  %v2421_v59 = vmul.f32 0.01, %v2413_v46  ;;  %v2535_v54 = vmul.f32 0.01, %v2527_v49  ;;  %vm2417_vm6 = vcmp.ge.f32.partialorder %v2413_v46, 0.0  ;;  %vm2531_vm7 = vcmp.ge.f32.partialorder %v2527_v49, 0.0 }
 0x4fe   : > { %v2184_v27 = vadd.f32 %v9159_v38, %v2156_v55  ;;  %v2157_v29 = vmul.f32 %v9185_v47, %v9268_v45  ;;  %vm2187_vm13 = vcmp.ge.f32.partialorder %v2183_v48, 0.0  ;;  %v6809_v35 = vpack.c.bf16 %v5477_v2, %v5475_v1  ;;  %v5481_v38 = vld [vmem:[%s11639_s12 + $0x370] sm:$0xff]  ;;  %v5537_v42 = vld [vmem:[%s11639_s12 + $0x500] sm:$0xff]  ;;  %v5484_v44 = vld [vmem:[%s11639_s12 + $0x388] sm:$0xff] }
 0x4ff   : > { %v2425_v10 = vsel %vm2417_vm6, %v2413_v46, %v2421_v59  ;;  %v2539_v30 = vsel %vm2531_vm7, %v2527_v49, %v2535_v54  ;;  %v6857_v36 = vpack.c.bf16 %v5533_v22, %v5531_v6  ;;  %v5535_v47 = vld [vmem:[%s11639_s12 + $0x4f0] sm:$0xff]  ;;  %v6811_v40 = vpack.c.bf16 %v5482_v24, %v5480_v23  ;;  %v5486_v46 = vld [vmem:[%s11639_s12 + $0x398] sm:$0xff]  ;;  %v5545_v2 = vld [vmem:[%s11639_s12 + $0x540] sm:$0xff] }
 0x500   : > { %v6859_v41 = vpack.c.bf16 %v5538_v26, %v5536_v25  ;;  %v2195_v49 = vsel %vm2187_vm13, %v2183_v48, %v2191_v21  ;;  %vm2188_vm14 = vcmp.ge.f32.partialorder %v2184_v27, 0.0  ;;  %v6863_v19 = vpack.c.bf16 %v5542_v8, %v5540_v57  ;;  %v5543_v1 = vld [vmem:[%s11639_s12 + $0x530] sm:$0xff]  ;;  %v5494_v6 = vld [vmem:[%s11639_s12 + $0x3d8] sm:$0xff]  ;;  %v5550_v23 = vld [vmem:[%s11639_s12 + $0x568] sm:$0xff] }
 0x501   : > { %2580 = vrot.lane.b32.xlu0 %v2538_v9, %s8037_s27  ;;  %2564 = vrot.lane.b32.xlu1 %v2424_v11, %s8036_s26  ;;  %v2192_v9 = vmul.f32 0.01, %v2184_v27  ;;  %v2185_v11 = vadd.f32 %v9292_v58, %v2157_v29  ;;  %v5539_v58 = vld [vmem:[%s11639_s12 + $0x510] sm:$0xff]  ;;  %v5548_v22 = vld [vmem:[%s11639_s12 + $0x558] sm:$0xff]  ;;  %vm3680_vm1 = vcmask 793600  }
 0x502   : > { %v6865_v55 = vpack.c.bf16 %v5541_v20, %v5539_v58  ;;  %v5491_v29 = vld [vmem:[%s11639_s12 + $0x3c0] sm:$0xff]  ;;  %v5497_v57 = vld [vmem:[%s11639_s12 + $0x3f0] sm:$0xff] }
 0x503   : > { %v2193_v18 = vmul.f32 0.01, %v2185_v11  ;;  %v2196_v31 = vsel %vm2188_vm14, %v2184_v27, %v2192_v9  ;;  %vm2189_vm15 = vcmp.ge.f32.partialorder %v2185_v11, 0.0  ;;  %v6869_v27 = vpack.c.bf16 %v5545_v2, %v5543_v1  ;;  %v5557_v20 = vld [vmem:[%s11639_s12 + $0x5a0] sm:$0xff]  ;;  %v5566_v1 = vld [vmem:[%s11639_s12 + $0x5e8] sm:$0xff] }
 0x505   : > { %2566 = vrot.lane.b32.xlu0 %v2425_v10, %s8036_s26  ;;  %2582 = vrot.lane.b32.xlu1 %v2539_v30, %s8037_s27 }
 0x509   : > { %3282 = vperm.xlu0 %8003, %v3199_v50   ;;  %3298 = vperm.xlu1 %8004, %v3294_v51   ;;  %v6813_v50 = vpack.c.bf16 %v5481_v38, %v5479_v39  ;;  %v6861_v51 = vpack.c.bf16 %v5537_v42, %v5535_v47  ;;  %v5549_v39 = vld [vmem:[%s11639_s12 + $0x560] sm:$0xff]  ;;  %v5496_v38 = vld [vmem:[%s11639_s12 + $0x3e8] sm:$0xff] }
 0x50a   : > { %v5554_v42 = vld [vmem:[%s11639_s12 + $0x588] sm:$0xff] }
 0x50d   : > { %3287 = vperm.xlu0 %8003, %v3200_v52   ;;  %3303 = vperm.xlu1 %8004, %v3295_v12   ;;  %v6815_v52 = vpack.c.bf16 %v5486_v46, %v5484_v44  ;;  %v5483_v12 = vld [vmem:[%s11639_s12 + $0x380] sm:$0xff] }
 0x511   : > { %5147 = vperm.xlu0 %8003, %v5827_v13   ;;  %v5485_v13 = vld [vmem:[%s11639_s12 + $0x390] sm:$0xff] }
 0x512   : > { %v6817_v48 = vpack.c.bf16 %v5485_v13, %v5483_v12  ;;  %v5501_v12 = vld [vmem:[%s11639_s12 + $0x410] sm:$0xff] }
 0x546   : > { %v2545_v53 = vpop.permute.xlu1 %2544 }
 0x547   : > { %v2589_v37 = vsel %vm2588_vm9, %v2194_v56, %v2545_v53  ;;  %v5488_v53 = vld [vmem:[%s11639_s12 + $0x3a8] sm:$0xff] }
 0x548   : > { %v6819_v56 = vpack.c.bf16 %v5490_v60, %v5488_v53  ;;  %v5504_v53 = vld [vmem:[%s11639_s12 + $0x428] sm:$0xff]  ;;  %v5506_v60 = vld [vmem:[%s11639_s12 + $0x438] sm:$0xff] }
 0x567   : > { %v2577_v0 = vpop.permute.xlu1 %2576  ;;  %v2561_v61 = vpop.permute.xlu0 %2560 }
 0x568   : > { %v9379_v5 = vsel %vm2593_vm10, %v2589_v37, %v2561_v61  ;;  %v9382_v28 = vsel %vm2598_vm11, %v2561_v61, %v2577_v0  ;;  %v5487_v37 = vld [vmem:[%s11639_s12 + $0x3a0] sm:$0xff] }
 0x569   : > { %5411 = vmatprep.mubr.msk.f32.mxu0 %vm2653_vm12, %v9382_v28  ;;  %5467 = vmatprep.mubr.msk.f32.mxu1 %vm2653_vm12, %v9382_v28 }
 0x56a   : > { %2737 = vmatmul.mubr.f32.vlgmr.msra.gmra.mrb[40].mxu0 %v9379_v5  ;;  %2883 = vmatmul.mubr.f32.vlgmr.msra.gmra.mrb[56].mxu1 %v9379_v5 }
 0x56b   : > { %6806 = vmatpush1.bf16.msra.mxu0 %v6805_v62  ;;  %6854 = vmatpush1.bf16.msra.mxu1 %v6853_v3  ;;  %v9411_v33 = vpop.permute.xlu1 %2550  ;;  %v8007_v34 = vpop.permute.xlu0 %8006  ;;  %v6867_v62 = vpack.c.bf16 %v5546_v4, %v5544_v63  ;;  %v5489_v3 = vld [vmem:[%s11639_s12 + $0x3b0] sm:$0xff]  ;;  %v5560_v63 = vld [vmem:[%s11639_s12 + $0x5b8] sm:$0xff]  ;;  %v5562_v4 = vld [vmem:[%s11639_s12 + $0x5c8] sm:$0xff] }
 0x56c   : > { %v8008_v45 = vunpack.i.l.bf16 %v8007_v34  ;;  %6808 = vmatprep.subr.bf16.mxu0 %v6807_v43  ;;  %6856 = vmatprep.subr.bf16.mxu1 %v6855_v32  ;;  %v8009_v54 = vunpack.i.h.bf16 %v8007_v34  ;;  %v5492_v43 = vld [vmem:[%s11639_s12 + $0x3c8] sm:$0xff]  ;;  %v2197_v32 = vsel %vm2189_vm15, %v2185_v11, %v2193_v18  ;;  %v6821_v26 = vpack.c.bf16 %v5489_v3, %v5487_v37  ;;  %v5493_v34 = vld [vmem:[%s11639_s12 + $0x3d0] sm:$0xff]  ;;  %v5564_v3 = vld [vmem:[%s11639_s12 + $0x5d8] sm:$0xff] }
 0x56d   : > { %v2592_v21 = vsel %vm2588_vm9, %v2197_v32, %v9411_v33  ;;  %v5547_v33 = vld [vmem:[%s11639_s12 + $0x550] sm:$0xff]  ;;  %v6823_v47 = vpack.c.bf16 %v5494_v6, %v5492_v43  ;;  %v6825_v44 = vpack.c.bf16 %v5493_v34, %v5491_v29  ;;  %v5508_v37 = vld [vmem:[%s11639_s12 + $0x448] sm:$0xff]  ;;  %v5507_v32 = vld [vmem:[%s11639_s12 + $0x440] sm:$0xff] }
 0x56e   : > { %v2590_v59 = vsel %vm2588_vm9, %v2195_v49, %v8008_v45  ;;  %v2591_v7 = vsel %vm2588_vm9, %v2196_v31, %v8009_v54  ;;  %v6871_v45 = vpack.c.bf16 %v5550_v23, %v5548_v22  ;;  %v6873_v46 = vpack.c.bf16 %v5549_v39, %v5547_v33  ;;  %v5495_v49 = vld [vmem:[%s11639_s12 + $0x3e0] sm:$0xff]  ;;  %v5551_v11 = vld [vmem:[%s11639_s12 + $0x570] sm:$0xff]  ;;  %v5500_v54 = vld [vmem:[%s11639_s12 + $0x408] sm:$0xff] }
 0x56f   : > { %6810 = vmatpush1.bf16.msra.mxu0 %v6809_v35  ;;  %6858 = vmatpush1.bf16.msra.mxu1 %v6857_v36  ;;  %v2563_v10 = vpop.permute.xlu1 %2562  ;;  %v2579_v30 = vpop.permute.xlu0 %2578  ;;  %v5509_v6 = vld [vmem:[%s11639_s12 + $0x450] sm:$0xff]  ;;  %v6887_v23 = vpack.c.bf16 %v5566_v1, %v5564_v3  ;;  %v5570_v29 = vld [vmem:[%s11639_s12 + $0x608] sm:$0xff]  ;;  %v5511_v39 = vld [vmem:[%s11639_s12 + $0x460] sm:$0xff] }
 0x570   : > { %v9450_v16 = vsel %vm2593_vm10, %v2590_v59, %v2563_v10  ;;  %v9453_v17 = vsel %vm2598_vm11, %v2563_v10, %v2579_v30  ;;  %6812 = vmatprep.subr.bf16.mxu0 %v6811_v40  ;;  %6860 = vmatprep.subr.bf16.mxu1 %v6859_v41  ;;  %v5498_v40 = vld [vmem:[%s11639_s12 + $0x3f8] sm:$0xff]  ;;  %v5553_v59 = vld [vmem:[%s11639_s12 + $0x580] sm:$0xff]  ;;  %v5558_v30 = vld [vmem:[%s11639_s12 + $0x5a8] sm:$0xff]  ;;  %v6841_v34 = vpack.c.bf16 %v5509_v6, %v5507_v32 }
 0x571   : > { %5412 = vmatprep.mubr.msk.f32.mxu0 %vm2653_vm12, %v9453_v17  ;;  %5468 = vmatprep.mubr.msk.f32.mxu1 %vm2653_vm12, %v9453_v17  ;;  %v5552_v41 = vld [vmem:[%s11639_s12 + $0x578] sm:$0xff]  ;;  %v6827_v8 = vpack.c.bf16 %v5498_v40, %v5496_v38  ;;  %v5513_v38 = vld [vmem:[%s11639_s12 + $0x470] sm:$0xff] }
 0x572   : > { %2743 = vmatmul.mubr.f32.gmra.mrb[42].mxu0 %v9450_v16  ;;  %2889 = vmatmul.mubr.f32.gmra.mrb[58].mxu1 %v9450_v16  ;;  %v6875_v9 = vpack.c.bf16 %v5554_v42, %v5552_v41  ;;  %v5556_v10 = vld [vmem:[%s11639_s12 + $0x598] sm:$0xff]  ;;  %v5567_v40 = vld [vmem:[%s11639_s12 + $0x5f0] sm:$0xff]  ;;  %v5569_v41 = vld [vmem:[%s11639_s12 + $0x600] sm:$0xff] }
 0x573   : > { %6814 = vmatpush1.bf16.msra.mxu0 %v6813_v50  ;;  %6862 = vmatpush1.bf16.msra.mxu1 %v6861_v51  ;;  %v2565_v14 = vpop.permute.xlu1 %2564  ;;  %v2581_v15 = vpop.permute.xlu0 %2580  ;;  %v6829_v50 = vpack.c.bf16 %v5497_v57, %v5495_v49  ;;  %v6877_v51 = vpack.c.bf16 %v5553_v59, %v5551_v11  ;;  %v6879_v58 = vpack.c.bf16 %v5558_v30, %v5556_v10  ;;  %v5516_v42 = vld [vmem:[%s11639_s12 + $0x488] sm:$0xff]  ;;  %v5573_v10 = vld [vmem:[%s11639_s12 + $0x620] sm:$0xff] }
 0x574   : > { %v9482_v0 = vsel %vm2593_vm10, %v2591_v7, %v2565_v14  ;;  %v9485_v61 = vsel %vm2598_vm11, %v2565_v14, %v2581_v15  ;;  %6816 = vmatprep.subr.bf16.mxu0 %v6815_v52  ;;  %6864 = vmatprep.subr.bf16.mxu1 %v6863_v19  ;;  %v5499_v52 = vld [vmem:[%s11639_s12 + $0x400] sm:$0xff]  ;;  %v5555_v19 = vld [vmem:[%s11639_s12 + $0x590] sm:$0xff]  ;;  %v6835_v7 = vpack.c.bf16 %v5506_v60, %v5504_v53  ;;  %v5574_v49 = vld [vmem:[%s11639_s12 + $0x628] sm:$0xff] }
 0x575   : > { %5413 = vmatprep.mubr.msk.f32.mxu0 %vm2653_vm12, %v9485_v61  ;;  %5469 = vmatprep.mubr.msk.f32.mxu1 %vm2653_vm12, %v9485_v61  ;;  %v6833_v18 = vpack.c.bf16 %v5501_v12, %v5499_v52  ;;  %v6881_v31 = vpack.c.bf16 %v5557_v20, %v5555_v19  ;;  %v5505_v14 = vld [vmem:[%s11639_s12 + $0x430] sm:$0xff]  ;;  %v6883_v15 = vpack.c.bf16 %v5562_v4, %v5560_v63  ;;  %v5576_v52 = vld [vmem:[%s11639_s12 + $0x638] sm:$0xf]  ;;  %v5519_v12 = vld [vmem:[%s11639_s12 + $0x4a0] sm:$0xf] }
 0x576   : > { %2749 = vmatmul.mubr.f32.gmra.mrb[44].mxu0 %v9482_v0  ;;  %2895 = vmatmul.mubr.f32.gmra.mrb[60].mxu1 %v9482_v0  ;;  %v6845_v57 = vpack.c.bf16 %v5513_v38, %v5511_v39 }
 0x577   : > { %6818 = vmatpush1.bf16.msra.mxu0 %v6817_v48  ;;  %6866 = vmatpush1.bf16.msra.mxu1 %v6865_v55  ;;  %v2583_v24 = vpop.permute.xlu1 %2582  ;;  %v2567_v25 = vpop.permute.xlu0 %2566  ;;  %v5503_v48 = vld [vmem:[%s11639_s12 + $0x420] sm:$0xff]  ;;  %v5559_v55 = vld [vmem:[%s11639_s12 + $0x5b0] sm:$0xff] }
 0x578   : > { %v9524_v35 = vsel %vm2593_vm10, %v2592_v21, %v2567_v25  ;;  %v9527_v36 = vsel %vm2598_vm11, %v2567_v25, %v2583_v24  ;;  %6820 = vmatprep.subr.bf16.mxu0 %v6819_v56  ;;  %6868 = vmatprep.subr.bf16.mxu1 %v6867_v62  ;;  %v5561_v56 = vld [vmem:[%s11639_s12 + $0x5c0] sm:$0xff]  ;;  %v5510_v62 = vld [vmem:[%s11639_s12 + $0x458] sm:$0xff]  ;;  %v6837_v2 = vpack.c.bf16 %v5505_v14, %v5503_v48  ;;  %v5563_v21 = vld [vmem:[%s11639_s12 + $0x5d0] sm:$0xff] }
 0x579   : > { %5414 = vmatprep.mubr.msk.f32.mxu0 %vm2653_vm12, %v9527_v36  ;;  %5470 = vmatprep.mubr.msk.f32.mxu1 %vm2653_vm12, %v9527_v36  ;;  %v6885_v43 = vpack.c.bf16 %v5561_v56, %v5559_v55  ;;  %v6839_v22 = vpack.c.bf16 %v5510_v62, %v5508_v37  ;;  %v5565_v24 = vld [vmem:[%s11639_s12 + $0x5e0] sm:$0xff]  ;;  %v5512_v25 = vld [vmem:[%s11639_s12 + $0x468] sm:$0xff] }
 0x57a   : > { %2755 = vmatmul.mubr.f32.gmra.mrb[46].mxu0 %v9524_v35  ;;  %2901 = vmatmul.mubr.f32.gmra.mrb[62].mxu1 %v9524_v35  ;;  %v6889_v33 = vpack.c.bf16 %v5565_v24, %v5563_v21 }
 0x57b   : > { %6822 = vmatpush1.bf16.msra.mxu0 %v6821_v26  ;;  %6870 = vmatpush1.bf16.msra.mxu1 %v6869_v27  ;;  %v5514_v26 = vld [vmem:[%s11639_s12 + $0x478] sm:$0xff] }
 0x57c   : > { %5523 = vmatprep.mubr.msk.f32.mxu0 %vm2653_vm12, %v9382_v28  ;;  %5579 = vmatprep.mubr.msk.f32.mxu1 %vm2653_vm12, %v9382_v28  ;;  %v5502_v28 = vld [vmem:[%s11639_s12 + $0x418] sm:$0xff] }
 0x57d   : > { %6824 = vmatprep.subr.bf16.mxu0 %v6823_v47  ;;  %6872 = vmatprep.subr.bf16.mxu1 %v6871_v45  ;;  %v6831_v13 = vpack.c.bf16 %v5502_v28, %v5500_v54  ;;  %v5568_v27 = vld [vmem:[%s11639_s12 + $0x5f8] sm:$0xff]  ;;  %v6843_v47 = vpack.c.bf16 %v5514_v26, %v5512_v25  ;;  %v5517_v54 = vld [vmem:[%s11639_s12 + $0x490] sm:$0xff] }
 0x57e   : > { %v6891_v45 = vpack.c.bf16 %v5570_v29, %v5568_v27  ;;  %v5571_v28 = vld [vmem:[%s11639_s12 + $0x610] sm:$0xff] }
 0x57f   : > { %6826 = vmatpush1.bf16.msra.mxu0 %v6825_v44  ;;  %6874 = vmatpush1.bf16.msra.mxu1 %v6873_v46  ;;  %v5518_v44 = vld [vmem:[%s11639_s12 + $0x498] sm:$0xff] }
 0x580   : > { %6828 = vmatprep.subr.bf16.mxu0 %v6827_v8  ;;  %6876 = vmatprep.subr.bf16.mxu1 %v6875_v9  ;;  %v5572_v46 = vld [vmem:[%s11639_s12 + $0x618] sm:$0xff]  ;;  %v6893_v8 = vpack.c.bf16 %v5569_v41, %v5567_v40  ;;  %v5515_v9 = vld [vmem:[%s11639_s12 + $0x480] sm:$0xff]  ;;  %v6847_v11 = vpack.c.bf16 %v5518_v44, %v5516_v42 }
 0x581   : > { %v6895_v59 = vpack.c.bf16 %v5574_v49, %v5572_v46  ;;  %v6849_v30 = vpack.c.bf16 %v5517_v54, %v5515_v9  ;;  %v3201_v49 = vld [vmem:[%s11640_s13] sm:$0xff]  ;;  %v5584_v9 = vld [vmem:[%s11640_s13 + $0x18] sm:$0xff] }
 0x582   : > { %v5594_v54 = vld [vmem:[%s11643_s16 + $0x1d8] sm:$0xff] }
 0x583   : > { %6830 = vmatpush1.bf16.msra.mxu0 %v6829_v50  ;;  %6878 = vmatpush1.bf16.msra.mxu1 %v6877_v51  ;;  %v6897_v50 = vpack.c.bf16 %v5573_v10, %v5571_v28  ;;  %v5520_v51 = vld [vmem:[%s11639_s12 + $0x4a8] sm:$0xf] }
 0x584   : > { %6832 = vmatprep.subr.bf16.mxu0 %v6831_v13  ;;  %6880 = vmatprep.subr.bf16.mxu1 %v6879_v58  ;;  %v5575_v13 = vld [vmem:[%s11639_s12 + $0x630] sm:$0xf]  ;;  %v5596_v28 = vld [vmem:[%s11643_s16 + $0x1e8] sm:$0xff] }
 0x587   : > { %6834 = vmatpush1.bf16.msra.mxu0 %v6833_v18  ;;  %6882 = vmatpush1.bf16.msra.mxu1 %v6881_v31 }
 0x588   : > { %6836 = vmatprep.subr.bf16.mxu0 %v6835_v7  ;;  %6884 = vmatprep.subr.bf16.mxu1 %v6883_v15 }
 0x58b   : > { %6838 = vmatpush1.bf16.msra.mxu0 %v6837_v2  ;;  %6886 = vmatpush1.bf16.msra.mxu1 %v6885_v43 }
 0x58c   : > { %6840 = vmatprep.subr.bf16.mxu0 %v6839_v22  ;;  %6888 = vmatprep.subr.bf16.mxu1 %v6887_v23 }
 0x58f   : > { %6842 = vmatpush1.bf16.msra.mxu0 %v6841_v34  ;;  %6890 = vmatpush1.bf16.msra.mxu1 %v6889_v33 }
 0x590   : > { %6844 = vmatprep.subr.bf16.mxu0 %v6843_v47  ;;  %6892 = vmatprep.subr.bf16.mxu1 %v6891_v45 }
 0x593   : > { %6846 = vmatpush1.bf16.msra.mxu0 %v6845_v57  ;;  %6894 = vmatpush1.bf16.msra.mxu1 %v6893_v8  ;;  %v5583_v57 = vld [vmem:[%s11640_s13 + $0x10] sm:$0xff]  ;;  %v3202_v8 = vld [vmem:[%s11640_s13 + $0x8] sm:$0xff] }
 0x594   : > { %6848 = vmatprep.subr.bf16.mxu0 %v6847_v11  ;;  %6896 = vmatprep.subr.bf16.mxu1 %v6895_v59  ;;  %v3623_v11 = vld [vmem:[%s11643_s16 + $0x8] sm:$0xff]  ;;  %v3625_v59 = vld [vmem:[%s11643_s16 + $0x18] sm:$0xff] }
 0x595   : > { %v9825_v10 = vpack.c.bf16 %v3625_v59, %v3623_v11  ;;  %v5614_v11 = vld [vmem:[%s11643_s16 + $0x278] sm:$0xff]  ;;  %v5616_v59 = vld [vmem:[%s11643_s16 + $0x288] sm:$0xff] }
 0x597   : > { %6850 = vmatpush1.bf16.msra.mxu0 %v6849_v30  ;;  %6898 = vmatpush1.bf16.msra.mxu1 %v6897_v50  ;;  %v9827_v30 = vpack.c.bf16 %v5596_v28, %v5594_v54  ;;  %v3622_v50 = vld [vmem:[%s11643_s16] sm:$0xff] }
 0x598   : > { %5521 = vmatprep.subr.msk.mxu0 %vm1586_vm2, %v5520_v51  ;;  %5577 = vmatprep.subr.msk.mxu1 %vm1586_vm2, %v5576_v52  ;;  %v3624_v51 = vld [vmem:[%s11643_s16 + $0x10] sm:$0xff] }
 0x599   : > { %v5593_v52 = vld [vmem:[%s11643_s16 + $0x1d0] sm:$0xff] }
 0x59b   : > { %5522 = vmatpush1.msk.msra.mxu0 %vm1586_vm2, %v5519_v12  ;;  %5578 = vmatpush1.msk.msra.mxu1 %vm1586_vm2, %v5575_v13  ;;  %v5595_v12 = vld [vmem:[%s11643_s16 + $0x1e0] sm:$0xff]  ;;  %v3627_v13 = vld [vmem:[%s11643_s16 + $0x28] sm:$0xff] }
 0x59c   : > { %3029 = vmatmul.mubr.f32.vlgmr.msra.gmra.mrb[48].mxu0 %v9379_v5  ;;  %3175 = vmatmul.mubr.f32.vlgmr.msra.gmra.mrb[64].mxu1 %v9379_v5  ;;  %v8038_v5 = vmov 0.0  }
 0x59d   : > { %5524 = vmatprep.mubr.msk.f32.mxu0 %vm2653_vm12, %v9453_v17  ;;  %5580 = vmatprep.mubr.msk.f32.mxu1 %vm2653_vm12, %v9453_v17 }
 0x5a0   : > { %3035 = vmatmul.mubr.f32.gmra.mrb[50].mxu0 %v9450_v16  ;;  %3181 = vmatmul.mubr.f32.gmra.mrb[66].mxu1 %v9450_v16 }
 0x5a1   : > { %5525 = vmatprep.mubr.msk.f32.mxu0 %vm2653_vm12, %v9485_v61  ;;  %5581 = vmatprep.mubr.msk.f32.mxu1 %vm2653_vm12, %v9485_v61 }
 0x5a4   : > { %3041 = vmatmul.mubr.f32.gmra.mrb[52].mxu0 %v9482_v0  ;;  %3187 = vmatmul.mubr.f32.gmra.mrb[68].mxu1 %v9482_v0 }
 0x5a5   : > { %5526 = vmatprep.mubr.msk.f32.mxu0 %vm2653_vm12, %v9527_v36  ;;  %5582 = vmatprep.mubr.msk.f32.mxu1 %vm2653_vm12, %v9527_v36 }
 0x5a8   : > { %3047 = vmatmul.mubr.f32.gmra.mrb[54].mxu0 %v9524_v35  ;;  %3193 = vmatmul.mubr.f32.gmra.mrb[70].mxu1 %v9524_v35 }
 0x5a9   : > { %3267 = vmatprep.mubr.f32.mxu0 %v8038_v5  ;;  %3389 = vmatprep.mubr.f32.mxu1 %v8038_v5 }
 0x63d   : > { %v2738_v16 = vpop.f32.mrb[40].mxu0  ;;  %v2884_v17 = vpop.f32.mrb[56].mxu1 }
 0x63e   : > { %v2740_v61 = vpop.f32.mrb[41].mxu0  ;;  %v2886_v58 = vpop.f32.mrb[57].mxu1 }
 0x645   : > { %v2744_v0 = vpop.f32.mrb[42].mxu0  ;;  %v2890_v19 = vpop.f32.mrb[58].mxu1 }
 0x646   : > { %v9727_v20 = vpack.c.bf16 %v2744_v0, %v2738_v16  ;;  %v9729_v53 = vpack.c.bf16 %v2890_v19, %v2884_v17  ;;  %v2746_v36 = vpop.f32.mrb[43].mxu0  ;;  %v2892_v60 = vpop.f32.mrb[59].mxu1  ;;  %v3629_v16 = vld [vmem:[%s11643_s16 + $0x38] sm:$0xff]  ;;  %v5587_v0 = vld [vmem:[%s11640_s13 + $0x30] sm:$0xff]  ;;  %v9863_v19 = vpack.c.bf16 %v3624_v51, %v3622_v50  ;;  %v3642_v50 = vld [vmem:[%s11643_s16 + $0xa0] sm:$0xff] }
 0x647   : > { %v9731_v63 = vpack.c.bf16 %v2746_v36, %v2740_v61  ;;  %v9733_v35 = vpack.c.bf16 %v2892_v60, %v2886_v58  ;;  %v5598_v17 = vld [vmem:[%s11643_s16 + $0x1f8] sm:$0xff]  ;;  %v5600_v61 = vld [vmem:[%s11643_s16 + $0x208] sm:$0xff]  ;;  %v5585_v58 = vld [vmem:[%s11640_s13 + $0x20] sm:$0xff]  ;;  %v9873_v60 = vpack.c.bf16 %v3629_v16, %v3627_v13 }
 0x648   : > { %v3628_v36 = vld [vmem:[%s11643_s16 + $0x30] sm:$0xff]  ;;  %v5615_v16 = vld [vmem:[%s11643_s16 + $0x280] sm:$0xff] }
 0x649   : > { %v2750_v4 = vpop.f32.mrb[44].mxu0  ;;  %v2896_v18 = vpop.f32.mrb[60].mxu1  ;;  %6900 = vmatprep.subr.bf16.mxu0 %v9731_v63  ;;  %6932 = vmatprep.subr.bf16.mxu1 %v9731_v63  ;;  %v3644_v51 = vld [vmem:[%s11643_s16 + $0xb0] sm:$0xff] }
 0x64a   : > { %v2752_v31 = vpop.f32.mrb[45].mxu0  ;;  %v2898_v48 = vpop.f32.mrb[61].mxu1  ;;  %6902 = vmatpush1.bf16.msra.mxu0 %v9727_v20  ;;  %6934 = vmatpush1.bf16.msra.mxu1 %v9727_v20  ;;  %v5613_v13 = vld [vmem:[%s11643_s16 + $0x270] sm:$0xff] }
 0x64d   : > { %v2756_v14 = vpop.f32.mrb[46].mxu0  ;;  %v2902_v7 = vpop.f32.mrb[62].mxu1 }
 0x64e   : > { %v9739_v15 = vpack.c.bf16 %v2756_v14, %v2750_v4  ;;  %v9741_v55 = vpack.c.bf16 %v2902_v7, %v2896_v18  ;;  %v2758_v56 = vpop.f32.mrb[47].mxu0  ;;  %v2904_v37 = vpop.f32.mrb[63].mxu1  ;;  %v5599_v4 = vld [vmem:[%s11643_s16 + $0x200] sm:$0xff]  ;;  %v3631_v18 = vld [vmem:[%s11643_s16 + $0x48] sm:$0xff] }
 0x64f   : > { %v9743_v62 = vpack.c.bf16 %v2758_v56, %v2752_v31  ;;  %v9745_v3 = vpack.c.bf16 %v2904_v37, %v2898_v48  ;;  %v3633_v31 = vld [vmem:[%s11643_s16 + $0x58] sm:$0xff]  ;;  %v5604_v14 = vld [vmem:[%s11643_s16 + $0x228] sm:$0xff]  ;;  %v3632_v37 = vld [vmem:[%s11643_s16 + $0x50] sm:$0xff] }
 0x650   : > { %v5602_v48 = vld [vmem:[%s11643_s16 + $0x218] sm:$0xff]  ;;  %v5586_v7 = vld [vmem:[%s11640_s13 + $0x28] sm:$0xff] }
 0x651   : > { %6904 = vmatprep.subr.bf16.mxu0 %v9743_v62  ;;  %6936 = vmatprep.subr.bf16.mxu1 %v9743_v62 }
 0x652   : > { %6906 = vmatpush1.bf16.msra.mxu0 %v9739_v15  ;;  %6938 = vmatpush1.bf16.msra.mxu1 %v9739_v15 }
 0x653   : > { %6908 = vmatprep.subr.bf16.mxu0 %v9733_v35  ;;  %6940 = vmatprep.subr.bf16.mxu1 %v9733_v35 }
 0x656   : > { %6910 = vmatpush1.bf16.msra.mxu0 %v9729_v53  ;;  %6942 = vmatpush1.bf16.msra.mxu1 %v9729_v53 }
 0x657   : > { %6912 = vmatprep.subr.bf16.mxu0 %v9745_v3  ;;  %6944 = vmatprep.subr.bf16.mxu1 %v9745_v3 }
 0x65a   : > { %6914 = vmatpush1.bf16.msra.mxu0 %v9741_v55  ;;  %6946 = vmatpush1.bf16.msra.mxu1 %v9741_v55 }
 0x66f   : > { %v3030_v1 = vpop.f32.mrb[48].mxu0  ;;  %v3176_v2 = vpop.f32.mrb[64].mxu1 }
 0x670   : > { %v3032_v43 = vpop.f32.mrb[49].mxu0  ;;  %v3178_v32 = vpop.f32.mrb[65].mxu1 }
 0x673   : > { %v3036_v6 = vpop.f32.mrb[50].mxu0  ;;  %v3182_v22 = vpop.f32.mrb[66].mxu1 }
 0x674   : > { %v9759_v23 = vpack.c.bf16 %v3036_v6, %v3030_v1  ;;  %v9761_v21 = vpack.c.bf16 %v3182_v22, %v3176_v2  ;;  %v3038_v24 = vpop.f32.mrb[51].mxu0  ;;  %v3184_v25 = vpop.f32.mrb[67].mxu1  ;;  %v5601_v1 = vld [vmem:[%s11643_s16 + $0x210] sm:$0xff]  ;;  %v5603_v2 = vld [vmem:[%s11643_s16 + $0x220] sm:$0xff]  ;;  %v5606_v6 = vld [vmem:[%s11643_s16 + $0x238] sm:$0xff] }
 0x675   : > { %v6915_v26 = vpack.c.bf16 %v3038_v24, %v3032_v43  ;;  %v9763_v27 = vpack.c.bf16 %v3184_v25, %v3178_v32  ;;  %v3635_v43 = vld [vmem:[%s11643_s16 + $0x68] sm:$0xff]  ;;  %v3637_v32 = vld [vmem:[%s11643_s16 + $0x78] sm:$0xff]  ;;  %v3634_v24 = vld [vmem:[%s11643_s16 + $0x60] sm:$0xff] }
 0x676   : > { %v5608_v22 = vld [vmem:[%s11643_s16 + $0x248] sm:$0xff]  ;;  %v3636_v25 = vld [vmem:[%s11643_s16 + $0x70] sm:$0xff] }
 0x677   : > { %v3042_v29 = vpop.f32.mrb[52].mxu0  ;;  %v3188_v34 = vpop.f32.mrb[68].mxu1  ;;  %6916 = vmatprep.subr.bf16.mxu0 %v6915_v26  ;;  %6948 = vmatprep.subr.bf16.mxu1 %v6915_v26 }
 0x678   : > { %v3044_v33 = vpop.f32.mrb[53].mxu0  ;;  %v3190_v39 = vpop.f32.mrb[69].mxu1  ;;  %6918 = vmatpush1.bf16.msra.mxu0 %v9759_v23  ;;  %6950 = vmatpush1.bf16.msra.mxu1 %v9759_v23 }
 0x67b   : > { %v3048_v38 = vpop.f32.mrb[54].mxu0  ;;  %v3194_v47 = vpop.f32.mrb[70].mxu1 }
 0x67c   : > { %v6921_v45 = vpack.c.bf16 %v3048_v38, %v3042_v29  ;;  %v9767_v40 = vpack.c.bf16 %v3194_v47, %v3188_v34  ;;  %v3050_v41 = vpop.f32.mrb[55].mxu0  ;;  %v3196_v42 = vpop.f32.mrb[71].mxu1  ;;  %v5605_v29 = vld [vmem:[%s11643_s16 + $0x230] sm:$0xff]  ;;  %v5607_v34 = vld [vmem:[%s11643_s16 + $0x240] sm:$0xff]  ;;  %v5610_v38 = vld [vmem:[%s11643_s16 + $0x258] sm:$0xff] }
 0x67d   : > { %v6919_v44 = vpack.c.bf16 %v3050_v41, %v3044_v33  ;;  %v6927_v46 = vpack.c.bf16 %v3196_v42, %v3190_v39  ;;  %v3639_v33 = vld [vmem:[%s11643_s16 + $0x88] sm:$0xff]  ;;  %v3641_v39 = vld [vmem:[%s11643_s16 + $0x98] sm:$0xff]  ;;  %v3638_v41 = vld [vmem:[%s11643_s16 + $0x80] sm:$0xff] }
 0x67e   : > { %v5612_v47 = vld [vmem:[%s11643_s16 + $0x268] sm:$0xff]  ;;  %v3640_v42 = vld [vmem:[%s11643_s16 + $0x90] sm:$0xff] }
 0x67f   : > { %6920 = vmatprep.subr.bf16.mxu0 %v6919_v44  ;;  %6952 = vmatprep.subr.bf16.mxu1 %v6919_v44  ;;  %v10013_v54 = vpack.c.bf16 %v3640_v42, %v3638_v41  ;;  %v3654_v41 = vld [vmem:[%s11643_s16 + $0x100] sm:$0xff]  ;;  %v3656_v42 = vld [vmem:[%s11643_s16 + $0x110] sm:$0xff] }
 0x680   : > { %6922 = vmatpush1.bf16.msra.mxu0 %v6921_v45  ;;  %6954 = vmatpush1.bf16.msra.mxu1 %v6921_v45 }
 0x681   : > { %6924 = vmatprep.subr.bf16.mxu0 %v9763_v27  ;;  %6956 = vmatprep.subr.bf16.mxu1 %v9763_v27  ;;  %11853 = vst [vmem:[#allocation4_spill] sm:$0xff] %v10013_v54 }
 0x684   : > { %6926 = vmatpush1.bf16.msra.mxu0 %v9761_v21  ;;  %6958 = vmatpush1.bf16.msra.mxu1 %v9761_v21 }
 0x685   : > { %6928 = vmatprep.subr.bf16.mxu0 %v6927_v46  ;;  %6960 = vmatprep.subr.bf16.mxu1 %v6927_v46 }
 0x688   : > { %6930 = vmatpush1.bf16.msra.mxu0 %v9767_v40  ;;  %6962 = vmatpush1.bf16.msra.mxu1 %v9767_v40 }
 0x689   : > { %6964 = vmatprep.subr.bf16.mxu0 %v9731_v63  ;;  %6996 = vmatprep.subr.bf16.mxu1 %v9731_v63  ;;  %v9875_v63 = vpack.c.bf16 %v5600_v61, %v5598_v17  ;;  %v3647_v17 = vld [vmem:[%s11643_s16 + $0xc8] sm:$0xff]  ;;  %v3649_v61 = vld [vmem:[%s11643_s16 + $0xd8] sm:$0xff] }
 0x68b   : > { %3268 = vmatmul.mubr.f32.vlgmr.msra.gmra.mrb[56].mxu0 %v3201_v49  ;;  %3390 = vmatmul.mubr.f32.vlgmr.msra.gmra.mrb[72].mxu1 %v5583_v57  ;;  %v5609_v49 = vld [vmem:[%s11643_s16 + $0x250] sm:$0xff]  ;;  %v5611_v57 = vld [vmem:[%s11643_s16 + $0x260] sm:$0xff] }
 0x68c   : > { %6966 = vmatpush1.bf16.msra.mxu0 %v9727_v20  ;;  %6998 = vmatpush1.bf16.msra.mxu1 %v9727_v20  ;;  %v9865_v20 = vpack.c.bf16 %v5595_v12, %v5593_v52  ;;  %v10015_v28 = vpack.c.bf16 %v5611_v57, %v5609_v49  ;;  %v10027_v12 = vpack.c.bf16 %v5616_v59, %v5614_v11  ;;  %v3659_v11 = vld [vmem:[%s11643_s16 + $0x128] sm:$0xff]  ;;  %v3661_v59 = vld [vmem:[%s11643_s16 + $0x138] sm:$0xff] }
 0x68d   : > { %6968 = vmatprep.subr.bf16.mxu0 %v9743_v62  ;;  %7000 = vmatprep.subr.bf16.mxu1 %v9743_v62  ;;  %v9917_v62 = vpack.c.bf16 %v3633_v31, %v3631_v18  ;;  %v10061_v18 = vpack.c.bf16 %v3649_v61, %v3647_v17  ;;  %v3658_v17 = vld [vmem:[%s11643_s16 + $0x120] sm:$0xff]  ;;  %v3660_v61 = vld [vmem:[%s11643_s16 + $0x130] sm:$0xff] }
 0x68e   : > { %3273 = vmatprep.mubr.f32.mxu0 %v8038_v5  ;;  %3395 = vmatprep.mubr.f32.mxu1 %v8038_v5  ;;  %11854 = vst [vmem:[#allocation5_spill] sm:$0xff] %v10015_v28  ;;  %11856 = vst [vmem:[#allocation7_spill] sm:$0xff] %v10027_v12 }
 0x68f   : > { %3274 = vmatmul.mubr.f32.gmra.mrb[58].mxu0 %v3202_v8  ;;  %3396 = vmatmul.mubr.f32.gmra.mrb[74].mxu1 %v5584_v9  ;;  %v3643_v8 = vld [vmem:[%s11643_s16 + $0xa8] sm:$0xff]  ;;  %v3645_v9 = vld [vmem:[%s11643_s16 + $0xb8] sm:$0xff]  ;;  %11859 = vst [vmem:[#allocation10_spill] sm:$0xff] %v10061_v18 }
 0x690   : > { %6970 = vmatpush1.bf16.msra.mxu0 %v9739_v15  ;;  %7002 = vmatpush1.bf16.msra.mxu1 %v9739_v15  ;;  %v5588_v15 = vld [vmem:[%s11640_s13 + $0x38] sm:$0xff]  ;;  %v10025_v52 = vpack.c.bf16 %v3645_v9, %v3643_v8  ;;  %v5625_v8 = vld [vmem:[%s11643_s16 + $0x2d0] sm:$0xff]  ;;  %v5627_v9 = vld [vmem:[%s11643_s16 + $0x2e0] sm:$0xff] }
 0x691   : > { %6972 = vmatprep.subr.bf16.mxu0 %v9733_v35  ;;  %7004 = vmatprep.subr.bf16.mxu1 %v9733_v35  ;;  %v5597_v35 = vld [vmem:[%s11643_s16 + $0x1f0] sm:$0xff] }
 0x692   : > { %3489 = vmatprep.mubr.f32.mxu0 %v8038_v5  ;;  %3589 = vmatprep.mubr.f32.mxu1 %v8038_v5  ;;  %v9907_v56 = vpack.c.bf16 %v5599_v4, %v5597_v35  ;;  %11855 = vst [vmem:[#allocation6_spill] sm:$0xff] %v10025_v52  ;;  %v3646_v35 = vld [vmem:[%s11643_s16 + $0xc0] sm:$0xff]  ;;  %v3648_v4 = vld [vmem:[%s11643_s16 + $0xd0] sm:$0xff] }
 0x694   : > { %6974 = vmatpush1.bf16.msra.mxu0 %v9729_v53  ;;  %7006 = vmatpush1.bf16.msra.mxu1 %v9729_v53  ;;  %v3626_v53 = vld [vmem:[%s11643_s16 + $0x20] sm:$0xff] }
 0x695   : > { %6976 = vmatprep.subr.bf16.mxu0 %v9745_v3  ;;  %7008 = vmatprep.subr.bf16.mxu1 %v9745_v3  ;;  %v9919_v3 = vpack.c.bf16 %v5604_v14, %v5602_v48  ;;  %v5617_v48 = vld [vmem:[%s11643_s16 + $0x290] sm:$0xff]  ;;  %v5619_v14 = vld [vmem:[%s11643_s16 + $0x2a0] sm:$0xff] }
 0x698   : > { %6978 = vmatpush1.bf16.msra.mxu0 %v9741_v55  ;;  %7010 = vmatpush1.bf16.msra.mxu1 %v9741_v55  ;;  %v9905_v55 = vpack.c.bf16 %v3628_v36, %v3626_v53  ;;  %v10049_v53 = vpack.c.bf16 %v3644_v51, %v3642_v50  ;;  %v10051_v36 = vpack.c.bf16 %v5615_v16, %v5613_v13  ;;  %v5630_v50 = vld [vmem:[%s11643_s16 + $0x2f8] sm:$0xff]  ;;  %v5632_v51 = vld [vmem:[%s11643_s16 + $0x308] sm:$0xff] }
 0x699   : > { %6980 = vmatprep.subr.bf16.mxu0 %v6915_v26  ;;  %7012 = vmatprep.subr.bf16.mxu1 %v6915_v26  ;;  %v9953_v26 = vpack.c.bf16 %v3637_v32, %v3635_v43  ;;  %v3650_v43 = vld [vmem:[%s11643_s16 + $0xe0] sm:$0xff]  ;;  %v3652_v32 = vld [vmem:[%s11643_s16 + $0xf0] sm:$0xff]  ;;  %v10157_v13 = vpack.c.bf16 %v3656_v42, %v3654_v41  ;;  %v10159_v16 = vpack.c.bf16 %v5627_v9, %v5625_v8  ;;  %v5638_v41 = vld [vmem:[%s11643_s16 + $0x338] sm:$0xff] }
 0x69a   : > { %11857 = vst [vmem:[#allocation8_spill] sm:$0xff] %v10049_v53  ;;  %11858 = vst [vmem:[#allocation9_spill] sm:$0xff] %v10051_v36  ;;  %v5640_v42 = vld [vmem:[%s11643_s16 + $0x348] sm:$0xff] }
 0x69b   : > { %11869 = vst [vmem:[#allocation20_spill] sm:$0xff] %v10157_v13  ;;  %11870 = vst [vmem:[#allocation21_spill] sm:$0xff] %v10159_v16 }
 0x69c   : > { %6982 = vmatpush1.bf16.msra.mxu0 %v9759_v23  ;;  %7014 = vmatpush1.bf16.msra.mxu1 %v9759_v23 }
 0x69d   : > { %6984 = vmatprep.subr.bf16.mxu0 %v6919_v44  ;;  %7016 = vmatprep.subr.bf16.mxu1 %v6919_v44  ;;  %v9989_v44 = vpack.c.bf16 %v3641_v39, %v3639_v33  ;;  %v5626_v33 = vld [vmem:[%s11643_s16 + $0x2d8] sm:$0xff]  ;;  %v5628_v39 = vld [vmem:[%s11643_s16 + $0x2e8] sm:$0xff] }
 0x69e   : > { %v10135_v57 = vpack.c.bf16 %v5628_v39, %v5626_v33  ;;  %v3667_v33 = vld [vmem:[%s11643_s16 + $0x168] sm:$0xff]  ;;  %v3669_v39 = vld [vmem:[%s11643_s16 + $0x178] sm:$0xff] }
 0x6a0   : > { %6986 = vmatpush1.bf16.msra.mxu0 %v6921_v45  ;;  %7018 = vmatpush1.bf16.msra.mxu1 %v6921_v45  ;;  %v9977_v45 = vpack.c.bf16 %v3636_v25, %v3634_v24  ;;  %v5621_v24 = vld [vmem:[%s11643_s16 + $0x2b0] sm:$0xff]  ;;  %v5623_v25 = vld [vmem:[%s11643_s16 + $0x2c0] sm:$0xff]  ;;  %11868 = vst [vmem:[#allocation19_spill] sm:$0xff] %v10135_v57 }
 0x6a1   : > { %6988 = vmatprep.subr.bf16.mxu0 %v9763_v27  ;;  %7020 = vmatprep.subr.bf16.mxu1 %v9763_v27  ;;  %v9955_v27 = vpack.c.bf16 %v5608_v22, %v5606_v6 }
 0x6a4   : > { %6990 = vmatpush1.bf16.msra.mxu0 %v9761_v21  ;;  %7022 = vmatpush1.bf16.msra.mxu1 %v9761_v21  ;;  %v9943_v21 = vpack.c.bf16 %v5603_v2, %v5601_v1  ;;  %v10085_v1 = vpack.c.bf16 %v3648_v4, %v3646_v35  ;;  %v10087_v2 = vpack.c.bf16 %v5619_v14, %v5617_v48  ;;  %v5629_v35 = vld [vmem:[%s11643_s16 + $0x2f0] sm:$0xff]  ;;  %v5631_v4 = vld [vmem:[%s11643_s16 + $0x300] sm:$0xff]  ;;  %v3663_v48 = vld [vmem:[%s11643_s16 + $0x148] sm:$0xff] }
 0x6a5   : > { %6992 = vmatprep.subr.bf16.mxu0 %v6927_v46  ;;  %7024 = vmatprep.subr.bf16.mxu1 %v6927_v46  ;;  %v9991_v46 = vpack.c.bf16 %v5612_v47, %v5610_v38  ;;  %v10121_v38 = vpack.c.bf16 %v3652_v32, %v3650_v43  ;;  %v10123_v47 = vpack.c.bf16 %v5623_v25, %v5621_v24  ;;  %v3665_v14 = vld [vmem:[%s11643_s16 + $0x158] sm:$0xff]  ;;  %v3662_v43 = vld [vmem:[%s11643_s16 + $0x140] sm:$0xff]  ;;  %v3664_v32 = vld [vmem:[%s11643_s16 + $0x150] sm:$0xff] }
 0x6a6   : > { %11861 = vst [vmem:[#allocation12_spill] sm:$0xff] %v10085_v1  ;;  %11862 = vst [vmem:[#allocation13_spill] sm:$0xff] %v10087_v2  ;;  %v10205_v24 = vpack.c.bf16 %v3665_v14, %v3663_v48  ;;  %v10229_v8 = vpack.c.bf16 %v3664_v32, %v3662_v43  ;;  %v5642_v48 = vld [vmem:[%s11643_s16 + $0x358] sm:$0xff]  ;;  %v5644_v14 = vld [vmem:[%s11643_s16 + $0x368] sm:$0xff] }
 0x6a7   : > { %11852 = vst [vmem:[#allocation3_spill] sm:$0xff] %v9991_v46  ;;  %11865 = vst [vmem:[#allocation16_spill] sm:$0xff] %v10121_v38  ;;  %v10273_v32 = vpack.c.bf16 %v5644_v14, %v5642_v48  ;;  %v3674_v48 = vld [vmem:[%s11643_s16 + $0x1a0] sm:$0xff]  ;;  %v3676_v14 = vld [vmem:[%s11643_s16 + $0x1b0] sm:$0xff] }
 0x6a8   : > { %6994 = vmatpush1.bf16.msra.mxu0 %v9767_v40  ;;  %7026 = vmatpush1.bf16.msra.mxu1 %v9767_v40  ;;  %v9979_v40 = vpack.c.bf16 %v5607_v34, %v5605_v29  ;;  %v3655_v29 = vld [vmem:[%s11643_s16 + $0x108] sm:$0xff]  ;;  %v3657_v34 = vld [vmem:[%s11643_s16 + $0x118] sm:$0xff]  ;;  %11866 = vst [vmem:[#allocation17_spill] sm:$0xff] %v10123_v47  ;;  %11875 = vst [vmem:[#allocation26_spill] sm:$0xff] %v10205_v24 }
 0x6a9   : > { %7028 = vmatprep.subr.bf16.mxu0 %v9825_v10  ;;  %7084 = vmatprep.subr.bf16.mxu1 %v9827_v30  ;;  %v10133_v49 = vpack.c.bf16 %v3657_v34, %v3655_v29  ;;  %v5633_v29 = vld [vmem:[%s11643_s16 + $0x310] sm:$0xff]  ;;  %v5635_v34 = vld [vmem:[%s11643_s16 + $0x320] sm:$0xff]  ;;  %11877 = vst [vmem:[#allocation28_spill] sm:$0xff] %v10229_v8  ;;  %11884 = vst [vmem:[#allocation35_spill] sm:$0xff] %v10273_v32 }
 0x6aa   : > { %v10231_v9 = vpack.c.bf16 %v5635_v34, %v5633_v29  ;;  %v3670_v29 = vld [vmem:[%s11643_s16 + $0x180] sm:$0xff]  ;;  %v3672_v34 = vld [vmem:[%s11643_s16 + $0x190] sm:$0xff] }
 0x6ab   : > { %3490 = vmatmul.mubr.f32.vlgmr.msra.gmra.mrb[60].mxu0 %v5585_v58  ;;  %3590 = vmatmul.mubr.f32.vlgmr.msra.gmra.mrb[76].mxu1 %v5587_v0  ;;  %v5618_v58 = vld [vmem:[%s11643_s16 + $0x298] sm:$0xff]  ;;  %v5620_v0 = vld [vmem:[%s11643_s16 + $0x2a8] sm:$0xff]  ;;  %11867 = vst [vmem:[#allocation18_spill] sm:$0xff] %v10133_v49 }
 0x6ac   : > { %3495 = vmatprep.mubr.f32.mxu0 %v8038_v5  ;;  %3595 = vmatprep.mubr.f32.mxu1 %v8038_v5  ;;  %v3630_v5 = vld [vmem:[%s11643_s16 + $0x40] sm:$0xff]  ;;  %v10063_v31 = vpack.c.bf16 %v5620_v0, %v5618_v58  ;;  %v10169_v58 = vpack.c.bf16 %v3661_v59, %v3659_v11  ;;  %v10171_v0 = vpack.c.bf16 %v5632_v51, %v5630_v50  ;;  %v3668_v59 = vld [vmem:[%s11643_s16 + $0x170] sm:$0xff] }
 0x6ad   : > { %7030 = vmatpush1.bf16.msra.mxu0 %v9863_v19  ;;  %7086 = vmatpush1.bf16.msra.mxu1 %v9865_v20  ;;  %v9941_v23 = vpack.c.bf16 %v3632_v37, %v3630_v5  ;;  %v5622_v5 = vld [vmem:[%s11643_s16 + $0x2b8] sm:$0xff]  ;;  %v5624_v37 = vld [vmem:[%s11643_s16 + $0x2c8] sm:$0xff]  ;;  %11878 = vst [vmem:[#allocation29_spill] sm:$0xff] %v10231_v9  ;;  %v3666_v11 = vld [vmem:[%s11643_s16 + $0x160] sm:$0xff]  ;;  %v10241_v50 = vpack.c.bf16 %v3669_v39, %v3667_v33 }
 0x6ae   : > { %7032 = vmatprep.subr.bf16.mxu0 %v9873_v60  ;;  %7088 = vmatprep.subr.bf16.mxu1 %v9875_v63  ;;  %11860 = vst [vmem:[#allocation11_spill] sm:$0xff] %v10063_v31  ;;  %v10099_v22 = vpack.c.bf16 %v5624_v37, %v5622_v5  ;;  %11871 = vst [vmem:[#allocation22_spill] sm:$0xff] %v10169_v58  ;;  %v10193_v5 = vpack.c.bf16 %v3660_v61, %v3658_v17  ;;  %v5637_v17 = vld [vmem:[%s11643_s16 + $0x330] sm:$0xff]  ;;  %v5639_v61 = vld [vmem:[%s11643_s16 + $0x340] sm:$0xff] }
 0x6af   : > { %3496 = vmatmul.mubr.f32.gmra.mrb[62].mxu0 %v5586_v7  ;;  %3596 = vmatmul.mubr.f32.gmra.mrb[78].mxu1 %v5588_v15  ;;  %v3651_v7 = vld [vmem:[%s11643_s16 + $0xe8] sm:$0xff]  ;;  %v3653_v15 = vld [vmem:[%s11643_s16 + $0xf8] sm:$0xff]  ;;  %11872 = vst [vmem:[#allocation23_spill] sm:$0xff] %v10171_v0  ;;  %v10195_v37 = vpack.c.bf16 %v5631_v4, %v5629_v35  ;;  %11879 = vst [vmem:[#allocation30_spill] sm:$0xff] %v10241_v50  ;;  %v10243_v51 = vpack.c.bf16 %v5640_v42, %v5638_v41 }
 0x6b0   : > { %v10097_v6 = vpack.c.bf16 %v3653_v15, %v3651_v7  ;;  %11864 = vst [vmem:[#allocation15_spill] sm:$0xff] %v10099_v22  ;;  %v5634_v7 = vld [vmem:[%s11643_s16 + $0x318] sm:$0xff]  ;;  %v5636_v15 = vld [vmem:[%s11643_s16 + $0x328] sm:$0xff]  ;;  %11873 = vst [vmem:[#allocation24_spill] sm:$0xff] %v10193_v5  ;;  %v10288_v39 = vpack.c.bf16 %v3672_v34, %v3670_v29  ;;  %v10324_v34 = vpack.c.bf16 %v3676_v14, %v3674_v48 }
 0x6b1   : > { %7034 = vmatpush1.bf16.msra.mxu0 %v9905_v55  ;;  %7090 = vmatpush1.bf16.msra.mxu1 %v9907_v56  ;;  %11874 = vst [vmem:[#allocation25_spill] sm:$0xff] %v10195_v37  ;;  %v10207_v25 = vpack.c.bf16 %v5636_v15, %v5634_v7  ;;  %11880 = vst [vmem:[#allocation31_spill] sm:$0xff] %v10243_v51  ;;  %v3671_v35 = vld [vmem:[%s11643_s16 + $0x188] sm:$0xff]  ;;  %v3673_v4 = vld [vmem:[%s11643_s16 + $0x198] sm:$0xff]  ;;  %v10265_v7 = vpack.c.bf16 %v3668_v59, %v3666_v11 }
 0x6b2   : > { %7036 = vmatprep.subr.bf16.mxu0 %v9917_v62  ;;  %7092 = vmatprep.subr.bf16.mxu1 %v9919_v3  ;;  %11863 = vst [vmem:[#allocation14_spill] sm:$0xff] %v10097_v6  ;;  %v10267_v15 = vpack.c.bf16 %v5639_v61, %v5637_v17  ;;  %v10271_v43 = vpack.c.bf16 %v3673_v4, %v3671_v35  ;;  %v5641_v33 = vld [vmem:[%s11643_s16 + $0x350] sm:$0xff]  ;;  %11885 = vst [vmem:[#allocation36_spill] sm:$0xff] %v10288_v39  ;;  %v5643_v41 = vld [vmem:[%s11643_s16 + $0x360] sm:$0xff] }
 0x6b3   : > { %11876 = vst [vmem:[#allocation27_spill] sm:$0xff] %v10207_v25  ;;  %11881 = vst [vmem:[#allocation32_spill] sm:$0xff] %v10265_v7  ;;  %v3675_v42 = vld [vmem:[%s11643_s16 + $0x1a8] sm:$0xff]  ;;  %v3677_v11 = vld [vmem:[%s11643_s16 + $0x1b8] sm:$0xff]  ;;  %v10299_v59 = vpack.c.bf16 %v5643_v41, %v5641_v33 }
 0x6b4   : > { %11882 = vst [vmem:[#allocation33_spill] sm:$0xff] %v10267_v15  ;;  %11883 = vst [vmem:[#allocation34_spill] sm:$0xff] %v10271_v43  ;;  %v10301_v17 = vpack.c.bf16 %v3677_v11, %v3675_v42  ;;  %v5646_v61 = vld [vmem:[%s11643_s16 + $0x378] sm:$0xff]  ;;  %v5648_v35 = vld [vmem:[%s11643_s16 + $0x388] sm:$0xff] }
 0x6b5   : > { %7038 = vmatpush1.bf16.msra.mxu0 %v9941_v23  ;;  %7094 = vmatpush1.bf16.msra.mxu1 %v9943_v21  ;;  %11886 = vst [vmem:[#allocation37_spill] sm:$0xff] %v10299_v59  ;;  %v10310_v4 = vpack.c.bf16 %v5648_v35, %v5646_v61  ;;  %v5645_v29 = vld [vmem:[%s11643_s16 + $0x370] sm:$0xff]  ;;  %11889 = vst [vmem:[#allocation40_spill] sm:$0xff] %v10324_v34  ;;  %v5647_v33 = vld [vmem:[%s11643_s16 + $0x380] sm:$0xff] }
 0x6b6   : > { %7040 = vmatprep.subr.bf16.mxu0 %v9953_v26  ;;  %7096 = vmatprep.subr.bf16.mxu1 %v9955_v27  ;;  %11887 = vst [vmem:[#allocation38_spill] sm:$0xff] %v10301_v17  ;;  %v10332_v41 = vld [vmem:[%s11643_s16 + $0x1c8] sm:$0x1]  ;;  %v10334_v42 = vpack.c.bf16 %v5647_v33, %v5645_v29  ;;  %v10339_v11 = vld [vmem:[%s11643_s16 + $0x398] sm:$0x1] }
 0x6b7   : > { %11888 = vst [vmem:[#allocation39_spill] sm:$0xff] %v10310_v4  ;;  %11890 = vst [vmem:[#allocation41_spill] sm:$0xff] %v10332_v41  ;;  %v5656_v61 = vld [vmem:[%s11643_s16 + $0x3a8] sm:$0xff]  ;;  %v5658_v35 = vld [vmem:[%s11643_s16 + $0x3b8] sm:$0xff] }
 0x6b8   : > { %11891 = vst [vmem:[#allocation42_spill] sm:$0xff] %v10334_v42  ;;  %11892 = vst [vmem:[#allocation43_spill] sm:$0xff] %v10339_v11  ;;  %v5718_v48 = vld [vmem:[%s11643_s16 + $0x578] sm:$0xff]  ;;  %v5720_v14 = vld [vmem:[%s11643_s16 + $0x588] sm:$0xff]  ;;  %v10362_v33 = vpack.c.bf16 %v5658_v35, %v5656_v61  ;;  %v10379_v61 = vpop.permute.xlu1 %3298  ;;  %v10381_v35 = vpop.permute.xlu0 %3282 }
 0x6b9   : > { %7042 = vmatpush1.bf16.msra.mxu0 %v9977_v45  ;;  %7098 = vmatpush1.bf16.msra.mxu1 %v9979_v40  ;;  %v10360_v29 = vld [vmem:[%s11643_s16 + $0x1c0] sm:$0x1] }
 0x6ba   : > { %7044 = vmatprep.subr.bf16.mxu0 %v9989_v44  ;;  %7100 = vmatprep.subr.bf16.mxu1 %v9991_v46  ;;  %11893 = vst [vmem:[#allocation44_spill] sm:$0xff] %v10360_v29  ;;  %11894 = vst [vmem:[#allocation45_spill] sm:$0xff] %v10362_v33 }
 0x6bd   : > { %7046 = vmatpush1.bf16.msra.mxu0 %v10013_v54  ;;  %7102 = vmatpush1.bf16.msra.mxu1 %v10015_v28 }
 0x6be   : > { %7048 = vmatprep.subr.bf16.mxu0 %v10025_v52  ;;  %7104 = vmatprep.subr.bf16.mxu1 %v10027_v12 }
 0x6c1   : > { %7050 = vmatpush1.bf16.msra.mxu0 %v10049_v53  ;;  %7106 = vmatpush1.bf16.msra.mxu1 %v10051_v36 }
 0x6c2   : > { %7052 = vmatprep.subr.bf16.mxu0 %v10061_v18  ;;  %7108 = vmatprep.subr.bf16.mxu1 %v10063_v31 }
 0x6c5   : > { %7054 = vmatpush1.bf16.msra.mxu0 %v10085_v1  ;;  %7110 = vmatpush1.bf16.msra.mxu1 %v10087_v2 }
 0x6c6   : > { %7056 = vmatprep.subr.bf16.mxu0 %v10097_v6  ;;  %7112 = vmatprep.subr.bf16.mxu1 %v10099_v22 }
 0x6c9   : > { %7058 = vmatpush1.bf16.msra.mxu0 %v10121_v38  ;;  %7114 = vmatpush1.bf16.msra.mxu1 %v10123_v47 }
 0x6ca   : > { %7060 = vmatprep.subr.bf16.mxu0 %v10133_v49  ;;  %7116 = vmatprep.subr.bf16.mxu1 %v10135_v57 }
 0x6cd   : > { %7062 = vmatpush1.bf16.msra.mxu0 %v10157_v13  ;;  %7118 = vmatpush1.bf16.msra.mxu1 %v10159_v16 }
 0x6ce   : > { %7064 = vmatprep.subr.bf16.mxu0 %v10169_v58  ;;  %7120 = vmatprep.subr.bf16.mxu1 %v10171_v0 }
 0x6d1   : > { %7066 = vmatpush1.bf16.msra.mxu0 %v10193_v5  ;;  %7122 = vmatpush1.bf16.msra.mxu1 %v10195_v37 }
 0x6d2   : > { %7068 = vmatprep.subr.bf16.mxu0 %v10205_v24  ;;  %7124 = vmatprep.subr.bf16.mxu1 %v10207_v25 }
 0x6d5   : > { %7070 = vmatpush1.bf16.msra.mxu0 %v10229_v8  ;;  %7126 = vmatpush1.bf16.msra.mxu1 %v10231_v9 }
 0x6d6   : > { %7072 = vmatprep.subr.bf16.mxu0 %v10241_v50  ;;  %7128 = vmatprep.subr.bf16.mxu1 %v10243_v51 }
 0x6d9   : > { %7074 = vmatpush1.bf16.msra.mxu0 %v10265_v7  ;;  %7130 = vmatpush1.bf16.msra.mxu1 %v10267_v15  ;;  %v10409_v15 = vpop.permute.xlu0 %3287 }
 0x6da   : > { %7076 = vmatprep.subr.bf16.mxu0 %v10271_v43  ;;  %7132 = vmatprep.subr.bf16.mxu1 %v10273_v32  ;;  %v5662_v43 = vld [vmem:[%s11643_s16 + $0x3d8] sm:$0xff] }
 0x6dd   : > { %7078 = vmatpush1.bf16.msra.mxu0 %v10288_v39  ;;  %7134 = vmatpush1.bf16.msra.mxu1 %v10299_v59 }
 0x6de   : > { %7080 = vmatprep.subr.bf16.mxu0 %v10301_v17  ;;  %7136 = vmatprep.subr.bf16.mxu1 %v10310_v4  ;;  %v10371_v4 = vpack.c.bf16 %v5720_v14, %v5718_v48 }
 0x6e0   : > { %11896 = vst [vmem:[#allocation47_spill] sm:$0xff] %v10371_v4 }
 0x6e1   : > { %7082 = vmatpush1.bf16.msra.mxu0 %v10324_v34  ;;  %7138 = vmatpush1.bf16.msra.mxu1 %v10334_v42  ;;  %v10369_v34 = vld [vmem:[%s11643_s16 + $0x390] sm:$0x1] }
 0x6e2   : > { %5589 = vmatprep.subr.msk.mxu0 %vm3687_vm0, %v10332_v41  ;;  %5651 = vmatprep.subr.msk.mxu1 %vm3687_vm0, %v10339_v11  ;;  %11895 = vst [vmem:[#allocation46_spill] sm:$0xff] %v10369_v34 }
 0x6e5   : > { %5590 = vmatpush1.msk.msra.mxu0 %vm3687_vm0, %v10360_v29  ;;  %5652 = vmatpush1.msk.msra.mxu1 %vm3687_vm0, %v10369_v34  ;;  %v5655_v34 = vld [vmem:[%s11643_s16 + $0x3a0] sm:$0xff]  ;;  %v5717_v29 = vld [vmem:[%s11643_s16 + $0x570] sm:$0xff] }
 0x6e6   : > { %7140 = vmatprep.subr.bf16.mxu0 %v10362_v33  ;;  %7196 = vmatprep.subr.bf16.mxu1 %v10371_v4  ;;  %v5657_v4 = vld [vmem:[%s11643_s16 + $0x3b0] sm:$0xff] }
 0x75e   : > { %v3269_v11 = vpop.f32.mrb[56].mxu0  ;;  %v10383_v41 = vpop.f32.mrb[72].mxu1 }
 0x75f   : > { %11897 = vst [vmem:[#allocation48_spill] sm:$0xff] %v10383_v41  ;;  %v3290_v48 = vmul.f32 %v10381_v35, %v3269_v11  ;;  %v3271_v14 = vpop.f32.mrb[57].mxu0  ;;  %v10386_v42 = vpop.f32.mrb[73].mxu1  ;;  %v5719_v11 = vld [vmem:[%s11643_s16 + $0x580] sm:$0xff]  ;;  %v10411_v41 = vpack.c.bf16 %v5657_v4, %v5655_v34 }
 0x760   : > { %v3291_v33 = vmul.f32 %v10381_v35, %v3271_v14  ;;  %v5660_v14 = vld [vmem:[%s11643_s16 + $0x3c8] sm:$0xff]  ;;  %v10413_v51 = vpack.c.bf16 %v5719_v11, %v5717_v29  ;;  %v10423_v4 = vpop.permute.xlu1 %3303 }
 0x761   : > { %v3306_v17 = vadd.f32 %v10379_v61, %v3290_v48  ;;  %11898 = vst [vmem:[#allocation49_spill] sm:$0xff] %v10411_v41  ;;  %v5724_v48 = vld [vmem:[%s11643_s16 + $0x5a8] sm:$0xff]  ;;  %v10427_v11 = vpack.c.bf16 %v5662_v43, %v5660_v14  ;;  %v5726_v14 = vld [vmem:[%s11643_s16 + $0x5b8] sm:$0xff] }
 0x762   : > { %v3307_v59 = vadd.f32 %v10379_v61, %v3291_v33  ;;  %v3275_v39 = vpop.f32.mrb[58].mxu0  ;;  %v3397_v32 = vpop.f32.mrb[74].mxu1  ;;  %11899 = vst [vmem:[#allocation50_spill] sm:$0xff] %v10413_v51  ;;  %v5722_v33 = vld [vmem:[%s11643_s16 + $0x598] sm:$0xff] }
 0x763   : > { %v3314_v7 = vmul.f32 0.01, %v3306_v17  ;;  %vm3310_vm3 = vcmp.ge.f32.partialorder %v3306_v17, 0.0  ;;  %v3292_v9 = vmul.f32 %v10409_v15, %v3275_v39  ;;  %v3404_v8 = vmul.f32 %v3397_v32, %v10409_v15  ;;  %v3277_v25 = vpop.f32.mrb[59].mxu0  ;;  %v3399_v24 = vpop.f32.mrb[75].mxu1  ;;  %11900 = vst [vmem:[#allocation51_spill] sm:$0xff] %v10427_v11 }
 0x764   : > { %v3315_v50 = vmul.f32 0.01, %v3307_v59  ;;  %v3293_v34 = vmul.f32 %v10409_v15, %v3277_v25  ;;  %v3405_v29 = vmul.f32 %v3399_v24, %v10409_v15  ;;  %vm3311_vm4 = vcmp.ge.f32.partialorder %v3307_v59, 0.0  ;;  %v5659_v32 = vld [vmem:[%s11643_s16 + $0x3c0] sm:$0xff] }
 0x765   : > { %v3308_v37 = vadd.f32 %v10423_v4, %v3292_v9  ;;  %v10431_v5 = vadd.f32 %v3404_v8, %v10423_v4  ;;  %v10433_v39 = vpack.c.bf16 %v5724_v48, %v5722_v33  ;;  %v10445_v24 = vsel %vm3310_vm3, %v3306_v17, %v3314_v7  ;;  %v5661_v8 = vld [vmem:[%s11643_s16 + $0x3d0] sm:$0xff]  ;;  %v5664_v7 = vld [vmem:[%s11643_s16 + $0x3e8] sm:$0xff] }
 0x766   : > { %v3319_v0 = vsel %vm3311_vm4, %v3307_v59, %v3315_v50  ;;  %v3309_v58 = vadd.f32 %v10423_v4, %v3293_v34  ;;  %v10440_v25 = vadd.f32 %v3405_v29, %v10423_v4  ;;  %v5721_v9 = vld [vmem:[%s11643_s16 + $0x590] sm:$0xff]  ;;  %v5723_v50 = vld [vmem:[%s11643_s16 + $0x5a0] sm:$0xff]  ;;  %v5666_v59 = vld [vmem:[%s11643_s16 + $0x3f8] sm:$0xff]  ;;  %v10474_v48 = vpack.c.bf16 %v5661_v8, %v5659_v32 }
 0x767   : > { %11901 = vst [vmem:[#allocation52_spill] sm:$0xff] %v10431_v5  ;;  %11902 = vst [vmem:[#allocation53_spill] sm:$0xff] %v10433_v39  ;;  %5591 = vmatprep.mubr.msk.f32.mxu0 %vm3680_vm1, %v3319_v0  ;;  %5653 = vmatprep.mubr.msk.f32.mxu1 %vm3680_vm1, %v3319_v0  ;;  %v3316_v43 = vmul.f32 0.01, %v3308_v37  ;;  %vm3312_vm6 = vcmp.ge.f32.partialorder %v3308_v37, 0.0  ;;  %v5728_v33 = vld [vmem:[%s11643_s16 + $0x5c8] sm:$0xff]  ;;  %v10476_v34 = vpack.c.bf16 %v5723_v50, %v5721_v9 }
 0x768   : > { %11903 = vst [vmem:[#allocation54_spill] sm:$0xff] %v10440_v25  ;;  %3759 = vmatmul.mubr.f32.vlgmr.msra.gmra.mrb[64].mxu0 %v10445_v24  ;;  %3901 = vmatmul.mubr.f32.vlgmr.msra.gmra.mrb[80].mxu1 %v10445_v24  ;;  %v3317_v17 = vmul.f32 0.01, %v3309_v58  ;;  %vm3313_vm5 = vcmp.ge.f32.partialorder %v3309_v58, 0.0  ;;  %11904 = vst [vmem:[#allocation55_spill] sm:$0xff] %v10474_v48  ;;  %v5663_v29 = vld [vmem:[%s11643_s16 + $0x3e0] sm:$0xff]  ;;  %v10501_v9 = vpack.c.bf16 %v5666_v59, %v5664_v7 }
 0x769   : > { %7142 = vmatpush1.bf16.msra.mxu0 %v10411_v41  ;;  %7198 = vmatpush1.bf16.msra.mxu1 %v10413_v51  ;;  %11905 = vst [vmem:[#allocation56_spill] sm:$0xff] %v10476_v34  ;;  %v5665_v51 = vld [vmem:[%s11643_s16 + $0x3f0] sm:$0xff]  ;;  %v5727_v32 = vld [vmem:[%s11643_s16 + $0x5c0] sm:$0xff]  ;;  %v5668_v8 = vld [vmem:[%s11643_s16 + $0x408] sm:$0xff]  ;;  %v10503_v50 = vpack.c.bf16 %v5728_v33, %v5726_v14 }
 0x76a   : > { %7144 = vmatprep.subr.bf16.mxu0 %v10427_v11  ;;  %7200 = vmatprep.subr.bf16.mxu1 %v10433_v39  ;;  %v10484_v41 = vsel %vm3313_vm5, %v3309_v58, %v3317_v17  ;;  %v5725_v11 = vld [vmem:[%s11643_s16 + $0x5b0] sm:$0xff]  ;;  %v10499_v58 = vsel %vm3312_vm6, %v3308_v37, %v3316_v43  ;;  %11906 = vst [vmem:[#allocation57_spill] sm:$0xff] %v10501_v9  ;;  %v5670_v17 = vld [vmem:[%s11643_s16 + $0x418] sm:$0xff]  ;;  %v5732_v5 = vld [vmem:[%s11643_s16 + $0x5e8] sm:$0xff] }
 0x76b   : > { %5592 = vmatprep.mubr.msk.f32.mxu0 %vm3680_vm1, %v10484_v41  ;;  %5654 = vmatprep.mubr.msk.f32.mxu1 %vm3680_vm1, %v10484_v41  ;;  %11907 = vst [vmem:[#allocation58_spill] sm:$0xff] %v10503_v50  ;;  %v5730_v39 = vld [vmem:[%s11643_s16 + $0x5d8] sm:$0xff]  ;;  %v10518_v37 = vpack.c.bf16 %v5665_v51, %v5663_v29  ;;  %v10520_v43 = vpack.c.bf16 %v5727_v32, %v5725_v11  ;;  %v5667_v7 = vld [vmem:[%s11643_s16 + $0x400] sm:$0xff]  ;;  %v5669_v59 = vld [vmem:[%s11643_s16 + $0x410] sm:$0xff] }
 0x76c   : > { %3765 = vmatmul.mubr.f32.gmra.mrb[66].mxu0 %v10499_v58  ;;  %3907 = vmatmul.mubr.f32.gmra.mrb[82].mxu1 %v10499_v58  ;;  %v10530_v14 = vpack.c.bf16 %v5670_v17, %v5668_v8  ;;  %v10532_v33 = vpack.c.bf16 %v5732_v5, %v5730_v39  ;;  %v5729_v51 = vld [vmem:[%s11643_s16 + $0x5d0] sm:$0xff]  ;;  %v5731_v11 = vld [vmem:[%s11643_s16 + $0x5e0] sm:$0xff]  ;;  %v5672_v29 = vld [vmem:[%s11643_s16 + $0x428] sm:$0xff]  ;;  %v10556_v32 = vpack.c.bf16 %v5669_v59, %v5667_v7 }
 0x76d   : > { %7146 = vmatpush1.bf16.msra.mxu0 %v10474_v48  ;;  %7202 = vmatpush1.bf16.msra.mxu1 %v10476_v34  ;;  %11908 = vst [vmem:[#allocation59_spill] sm:$0xff] %v10518_v37  ;;  %11909 = vst [vmem:[#allocation60_spill] sm:$0xff] %v10520_v43  ;;  %v5734_v5 = vld [vmem:[%s11643_s16 + $0x5f8] sm:$0xff]  ;;  %v5736_v39 = vld [vmem:[%s11643_s16 + $0x608] sm:$0xff]  ;;  %v10558_v8 = vpack.c.bf16 %v5731_v11, %v5729_v51 }
 0x76e   : > { %5715 = vmatprep.mubr.msk.f32.mxu0 %vm3680_vm1, %v3319_v0  ;;  %5777 = vmatprep.mubr.msk.f32.mxu1 %vm3680_vm1, %v3319_v0  ;;  %11910 = vst [vmem:[#allocation61_spill] sm:$0xff] %v10530_v14  ;;  %11911 = vst [vmem:[#allocation62_spill] sm:$0xff] %v10532_v33  ;;  %v5674_v0 = vld [vmem:[%s11643_s16 + $0x438] sm:$0xff]  ;;  %v5671_v17 = vld [vmem:[%s11643_s16 + $0x420] sm:$0xff] }
 0x76f   : > { %7148 = vmatprep.subr.bf16.mxu0 %v10501_v9  ;;  %7204 = vmatprep.subr.bf16.mxu1 %v10503_v50  ;;  %11912 = vst [vmem:[#allocation63_spill] sm:$0xff] %v10556_v32  ;;  %11913 = vst [vmem:[#allocation64_spill] sm:$0xff] %v10558_v8  ;;  %v5673_v50 = vld [vmem:[%s11643_s16 + $0x430] sm:$0xff]  ;;  %v10568_v9 = vpack.c.bf16 %v5674_v0, %v5672_v29  ;;  %v5735_v59 = vld [vmem:[%s11643_s16 + $0x600] sm:$0xff] }
 0x770   : > { %v5733_v7 = vld [vmem:[%s11643_s16 + $0x5f0] sm:$0xff]  ;;  %v5676_v51 = vld [vmem:[%s11643_s16 + $0x448] sm:$0xff]  ;;  %v5678_v11 = vld [vmem:[%s11643_s16 + $0x458] sm:$0xff] }
 0x771   : > { %7150 = vmatpush1.bf16.msra.mxu0 %v10518_v37  ;;  %7206 = vmatpush1.bf16.msra.mxu1 %v10520_v43  ;;  %11914 = vst [vmem:[#allocation65_spill] sm:$0xff] %v10568_v9  ;;  %v10570_v37 = vpack.c.bf16 %v5736_v39, %v5734_v5  ;;  %v5738_v29 = vld [vmem:[%s11643_s16 + $0x618] sm:$0xff]  ;;  %v5740_v0 = vld [vmem:[%s11643_s16 + $0x628] sm:$0xff]  ;;  %v10592_v5 = vpack.c.bf16 %v5673_v50, %v5671_v17  ;;  %v5737_v50 = vld [vmem:[%s11643_s16 + $0x610] sm:$0xff] }
 0x772   : > { %7152 = vmatprep.subr.bf16.mxu0 %v10530_v14  ;;  %7208 = vmatprep.subr.bf16.mxu1 %v10532_v33  ;;  %v10594_v39 = vpack.c.bf16 %v5735_v59, %v5733_v7  ;;  %v5675_v33 = vld [vmem:[%s11643_s16 + $0x440] sm:$0xff]  ;;  %v5677_v14 = vld [vmem:[%s11643_s16 + $0x450] sm:$0xff]  ;;  %v10604_v43 = vpack.c.bf16 %v5678_v11, %v5676_v51  ;;  %v5680_v7 = vld [vmem:[%s11643_s16 + $0x468] sm:$0xff] }
 0x773   : > { %11915 = vst [vmem:[#allocation66_spill] sm:$0xff] %v10570_v37  ;;  %11916 = vst [vmem:[#allocation67_spill] sm:$0xff] %v10592_v5  ;;  %v5739_v17 = vld [vmem:[%s11643_s16 + $0x620] sm:$0xff]  ;;  %v5682_v59 = vld [vmem:[%s11643_s16 + $0x478] sm:$0xff] }
 0x774   : > { %11917 = vst [vmem:[#allocation68_spill] sm:$0xff] %v10594_v39  ;;  %11918 = vst [vmem:[#allocation69_spill] sm:$0xff] %v10604_v43  ;;  %v5742_v51 = vld [vmem:[%s11643_s16 + $0x638] sm:$0xff]  ;;  %v5744_v11 = vld [vmem:[%s11643_s16 + $0x648] sm:$0xff] }
 0x775   : > { %7154 = vmatpush1.bf16.msra.mxu0 %v10556_v32  ;;  %7210 = vmatpush1.bf16.msra.mxu1 %v10558_v8  ;;  %v10606_v32 = vpack.c.bf16 %v5740_v0, %v5738_v29  ;;  %v10628_v29 = vpack.c.bf16 %v5677_v14, %v5675_v33  ;;  %v10630_v0 = vpack.c.bf16 %v5739_v17, %v5737_v50  ;;  %v5741_v14 = vld [vmem:[%s11643_s16 + $0x630] sm:$0xff]  ;;  %v5743_v33 = vld [vmem:[%s11643_s16 + $0x640] sm:$0xff]  ;;  %v5684_v50 = vld [vmem:[%s11643_s16 + $0x488] sm:$0xff] }
 0x776   : > { %7156 = vmatprep.subr.bf16.mxu0 %v10568_v9  ;;  %7212 = vmatprep.subr.bf16.mxu1 %v10570_v37  ;;  %v5679_v37 = vld [vmem:[%s11643_s16 + $0x460] sm:$0xff]  ;;  %v5681_v9 = vld [vmem:[%s11643_s16 + $0x470] sm:$0xff]  ;;  %v10640_v8 = vpack.c.bf16 %v5682_v59, %v5680_v7  ;;  %v5686_v17 = vld [vmem:[%s11643_s16 + $0x498] sm:$0xff] }
 0x777   : > { %11919 = vst [vmem:[#allocation70_spill] sm:$0xff] %v10606_v32  ;;  %11920 = vst [vmem:[#allocation71_spill] sm:$0xff] %v10628_v29  ;;  %v5746_v7 = vld [vmem:[%s11643_s16 + $0x658] sm:$0xff]  ;;  %v5748_v59 = vld [vmem:[%s11643_s16 + $0x668] sm:$0xff] }
 0x778   : > { %11921 = vst [vmem:[#allocation72_spill] sm:$0xff] %v10630_v0  ;;  %11922 = vst [vmem:[#allocation73_spill] sm:$0xff] %v10640_v8  ;;  %v5685_v34 = vld [vmem:[%s11643_s16 + $0x490] sm:$0xff] }
 0x779   : > { %7158 = vmatpush1.bf16.msra.mxu0 %v10592_v5  ;;  %7214 = vmatpush1.bf16.msra.mxu1 %v10594_v39  ;;  %v10642_v5 = vpack.c.bf16 %v5744_v11, %v5742_v51  ;;  %v5683_v39 = vld [vmem:[%s11643_s16 + $0x480] sm:$0xff] }
 0x77a   : > { %7160 = vmatprep.subr.bf16.mxu0 %v10604_v43  ;;  %7216 = vmatprep.subr.bf16.mxu1 %v10606_v32  ;;  %v10668_v32 = vpack.c.bf16 %v5681_v9, %v5679_v37  ;;  %v10670_v43 = vpack.c.bf16 %v5743_v33, %v5741_v14  ;;  %v10684_v9 = vpack.c.bf16 %v5686_v17, %v5684_v50  ;;  %v5745_v14 = vld [vmem:[%s11643_s16 + $0x650] sm:$0xff]  ;;  %v5747_v33 = vld [vmem:[%s11643_s16 + $0x660] sm:$0xff]  ;;  %v5750_v50 = vld [vmem:[%s11643_s16 + $0x678] sm:$0xff] }
 0x77b   : > { %11923 = vst [vmem:[#allocation74_spill] sm:$0xff] %v10642_v5  ;;  %v10686_v37 = vpack.c.bf16 %v5748_v59, %v5746_v7  ;;  %v5752_v17 = vld [vmem:[%s11643_s16 + $0x688] sm:$0xff]  ;;  %v5687_v7 = vld [vmem:[%s11643_s16 + $0x4a0] sm:$0xff] }
 0x77c   : > { %11926 = vst [vmem:[#allocation77_spill] sm:$0xff] %v10668_v32  ;;  %11927 = vst [vmem:[#allocation78_spill] sm:$0xff] %v10670_v43 }
 0x77d   : > { %7162 = vmatpush1.bf16.msra.mxu0 %v10628_v29  ;;  %7218 = vmatpush1.bf16.msra.mxu1 %v10630_v0  ;;  %11930 = vst [vmem:[#allocation81_spill] sm:$0xff] %v10684_v9  ;;  %11931 = vst [vmem:[#allocation82_spill] sm:$0xff] %v10686_v37  ;;  %v5749_v0 = vld [vmem:[%s11643_s16 + $0x670] sm:$0xff] }
 0x77e   : > { %v10664_v51 = vpop.f32.mrb[60].mxu0  ;;  %v10666_v11 = vpop.f32.mrb[76].mxu1  ;;  %7164 = vmatprep.subr.bf16.mxu0 %v10640_v8  ;;  %7220 = vmatprep.subr.bf16.mxu1 %v10642_v5  ;;  %v10713_v5 = vpack.c.bf16 %v5747_v33, %v5745_v14  ;;  %v5689_v8 = vld [vmem:[%s11643_s16 + $0x4b0] sm:$0xff]  ;;  %v5692_v14 = vld [vmem:[%s11643_s16 + $0x4c8] sm:$0xff]  ;;  %v5694_v33 = vld [vmem:[%s11643_s16 + $0x4d8] sm:$0xff] }
 0x77f   : > { %11924 = vst [vmem:[#allocation75_spill] sm:$0xff] %v10664_v51  ;;  %11925 = vst [vmem:[#allocation76_spill] sm:$0xff] %v10666_v11  ;;  %v10678_v48 = vpop.f32.mrb[61].mxu0  ;;  %v10680_v29 = vpop.f32.mrb[77].mxu1  ;;  %v5688_v11 = vld [vmem:[%s11643_s16 + $0x4a8] sm:$0xff]  ;;  %v10758_v57 = vpack.c.bf16 %v5694_v33, %v5692_v14 }
 0x780   : > { %11928 = vst [vmem:[#allocation79_spill] sm:$0xff] %v10678_v48  ;;  %11929 = vst [vmem:[#allocation80_spill] sm:$0xff] %v10680_v29  ;;  %v5690_v29 = vld [vmem:[%s11643_s16 + $0x4b8] sm:$0xff]  ;;  %v10711_v48 = vpack.c.bf16 %v5685_v34, %v5683_v39  ;;  %v10728_v39 = vpack.c.bf16 %v5752_v17, %v5750_v50  ;;  %v5760_v14 = vld [vmem:[%s11643_s16 + $0x6c8] sm:$0xff] }
 0x781   : > { %7166 = vmatpush1.bf16.msra.mxu0 %v10668_v32  ;;  %7222 = vmatpush1.bf16.msra.mxu1 %v10670_v43  ;;  %11933 = vst [vmem:[#allocation84_spill] sm:$0xff] %v10713_v5  ;;  %v5751_v32 = vld [vmem:[%s11643_s16 + $0x680] sm:$0xff]  ;;  %v10726_v34 = vpack.c.bf16 %v5690_v29, %v5688_v11  ;;  %v5754_v29 = vld [vmem:[%s11643_s16 + $0x698] sm:$0xff]  ;;  %v5756_v11 = vld [vmem:[%s11643_s16 + $0x6a8] sm:$0xff] }
 0x782   : > { %v3497_v59 = vpop.f32.mrb[62].mxu0  ;;  %v3597_v51 = vpop.f32.mrb[78].mxu1  ;;  %11932 = vst [vmem:[#allocation83_spill] sm:$0xff] %v10711_v48  ;;  %7168 = vmatprep.subr.bf16.mxu0 %v10684_v9  ;;  %7224 = vmatprep.subr.bf16.mxu1 %v10686_v37  ;;  %11935 = vst [vmem:[#allocation86_spill] sm:$0xff] %v10728_v39  ;;  %v10746_v37 = vpack.c.bf16 %v5689_v8, %v5687_v7  ;;  %v10748_v13 = vpack.c.bf16 %v5751_v32, %v5749_v0  ;;  %v5753_v8 = vld [vmem:[%s11643_s16 + $0x690] sm:$0xff]  ;;  %v5755_v0 = vld [vmem:[%s11643_s16 + $0x6a0] sm:$0xff] }
 0x783   : > { %11934 = vst [vmem:[#allocation85_spill] sm:$0xff] %v10726_v34  ;;  %v3504_v43 = vmul.f32 %v3497_v59, %v10409_v15  ;;  %v3604_v25 = vmul.f32 %v3597_v51, %v10409_v15  ;;  %v3499_v16 = vpop.f32.mrb[63].mxu0  ;;  %v3599_v9 = vpop.f32.mrb[79].mxu1  ;;  %11940 = vst [vmem:[#allocation91_spill] sm:$0xff] %v10758_v57  ;;  %v10774_v32 = vpack.c.bf16 %v5756_v11, %v5754_v29  ;;  %v5758_v7 = vld [vmem:[%s11643_s16 + $0x6b8] sm:$0xff]  ;;  %v5695_v11 = vld [vmem:[%s11643_s16 + $0x4e0] sm:$0xff] }
 0x784   : > { %v3505_v50 = vmul.f32 %v3499_v16, %v10409_v15  ;;  %v3605_v17 = vmul.f32 %v3599_v9, %v10409_v15  ;;  %11936 = vst [vmem:[#allocation87_spill] sm:$0xff] %v10746_v37  ;;  %11937 = vst [vmem:[#allocation88_spill] sm:$0xff] %v10748_v13  ;;  %v5691_v16 = vld [vmem:[%s11643_s16 + $0x4c0] sm:$0xff]  ;;  %v5693_v15 = vld [vmem:[%s11643_s16 + $0x4d0] sm:$0xff]  ;;  %v10798_v29 = vpack.c.bf16 %v5755_v0, %v5753_v8 }
 0x785   : > { %v10751_v51 = vadd.f32 %v3504_v43, %v10423_v4  ;;  %v10754_v59 = vadd.f32 %v3604_v25, %v10423_v4  ;;  %7170 = vmatpush1.bf16.msra.mxu0 %v10711_v48  ;;  %7226 = vmatpush1.bf16.msra.mxu1 %v10713_v5  ;;  %v5696_v9 = vld [vmem:[%s11643_s16 + $0x4e8] sm:$0xff]  ;;  %v10796_v33 = vpack.c.bf16 %v5693_v15, %v5691_v16  ;;  %v5757_v16 = vld [vmem:[%s11643_s16 + $0x6b0] sm:$0xff]  ;;  %v5759_v15 = vld [vmem:[%s11643_s16 + $0x6c0] sm:$0xff] }
 0x786   : > { %v10767_v43 = vadd.f32 %v3505_v50, %v10423_v4  ;;  %v10770_v25 = vadd.f32 %v3605_v17, %v10423_v4  ;;  %7172 = vmatprep.subr.bf16.mxu0 %v10726_v34  ;;  %7228 = vmatprep.subr.bf16.mxu1 %v10728_v39  ;;  %v5698_v4 = vld [vmem:[%s11643_s16 + $0x4f8] sm:$0xff]  ;;  %11944 = vst [vmem:[#allocation95_spill] sm:$0xff] %v10798_v29  ;;  %v5697_v50 = vld [vmem:[%s11643_s16 + $0x4f0] sm:$0xff]  ;;  %v5700_v8 = vld [vmem:[%s11643_s16 + $0x508] sm:$0xff] }
 0x787   : > { %11938 = vst [vmem:[#allocation89_spill] sm:$0xff] %v10751_v51  ;;  %11939 = vst [vmem:[#allocation90_spill] sm:$0xff] %v10754_v59  ;;  %v10808_v17 = vpack.c.bf16 %v5698_v4, %v5696_v9  ;;  %v10810_v59 = vpack.c.bf16 %v5760_v14, %v5758_v7  ;;  %v5702_v0 = vld [vmem:[%s11643_s16 + $0x518] sm:$0xff]  ;;  %v5764_v4 = vld [vmem:[%s11643_s16 + $0x6e8] sm:$0xff]  ;;  %v10832_v7 = vpack.c.bf16 %v5697_v50, %v5695_v11 }
 0x788   : > { %11941 = vst [vmem:[#allocation92_spill] sm:$0xff] %v10767_v43  ;;  %11942 = vst [vmem:[#allocation93_spill] sm:$0xff] %v10770_v25  ;;  %v5762_v9 = vld [vmem:[%s11643_s16 + $0x6d8] sm:$0xff]  ;;  %v10834_v14 = vpack.c.bf16 %v5759_v15, %v5757_v16  ;;  %v5699_v25 = vld [vmem:[%s11643_s16 + $0x500] sm:$0xff]  ;;  %v10844_v43 = vpack.c.bf16 %v5702_v0, %v5700_v8 }
 0x789   : > { %7174 = vmatpush1.bf16.msra.mxu0 %v10746_v37  ;;  %7230 = vmatpush1.bf16.msra.mxu1 %v10748_v13  ;;  %11943 = vst [vmem:[#allocation94_spill] sm:$0xff] %v10796_v33  ;;  %11945 = vst [vmem:[#allocation96_spill] sm:$0xff] %v10808_v17  ;;  %v5701_v51 = vld [vmem:[%s11643_s16 + $0x510] sm:$0xff]  ;;  %v5763_v50 = vld [vmem:[%s11643_s16 + $0x6e0] sm:$0xff] }
 0x78a   : > { %7176 = vmatprep.subr.bf16.mxu0 %v10758_v57  ;;  %7232 = vmatprep.subr.bf16.mxu1 %v10774_v32  ;;  %11946 = vst [vmem:[#allocation97_spill] sm:$0xff] %v10810_v59  ;;  %11947 = vst [vmem:[#allocation98_spill] sm:$0xff] %v10832_v7  ;;  %v5761_v11 = vld [vmem:[%s11643_s16 + $0x6d0] sm:$0xff]  ;;  %v5704_v16 = vld [vmem:[%s11643_s16 + $0x528] sm:$0xff] }
 0x78b   : > { %11948 = vst [vmem:[#allocation99_spill] sm:$0xff] %v10834_v14  ;;  %11949 = vst [vmem:[#allocation100_spill] sm:$0xff] %v10844_v43  ;;  %v5706_v15 = vld [vmem:[%s11643_s16 + $0x538] sm:$0xff]  ;;  %v5768_v0 = vld [vmem:[%s11643_s16 + $0x708] sm:$0xff] }
 0x78c   : > { %v5766_v8 = vld [vmem:[%s11643_s16 + $0x6f8] sm:$0xff] }
 0x78d   : > { %7178 = vmatpush1.bf16.msra.mxu0 %v10796_v33  ;;  %7234 = vmatpush1.bf16.msra.mxu1 %v10798_v29  ;;  %v10846_v33 = vpack.c.bf16 %v5764_v4, %v5762_v9  ;;  %v10868_v9 = vpack.c.bf16 %v5701_v51, %v5699_v25  ;;  %v10870_v4 = vpack.c.bf16 %v5763_v50, %v5761_v11  ;;  %v5765_v51 = vld [vmem:[%s11643_s16 + $0x6f0] sm:$0xff]  ;;  %v5767_v25 = vld [vmem:[%s11643_s16 + $0x700] sm:$0xff]  ;;  %v5708_v11 = vld [vmem:[%s11643_s16 + $0x548] sm:$0xff] }
 0x78e   : > { %7180 = vmatprep.subr.bf16.mxu0 %v10808_v17  ;;  %7236 = vmatprep.subr.bf16.mxu1 %v10810_v59  ;;  %v5703_v59 = vld [vmem:[%s11643_s16 + $0x520] sm:$0xff]  ;;  %v5705_v17 = vld [vmem:[%s11643_s16 + $0x530] sm:$0xff]  ;;  %v10880_v29 = vpack.c.bf16 %v5706_v15, %v5704_v16  ;;  %v5710_v50 = vld [vmem:[%s11643_s16 + $0x558] sm:$0xff] }
 0x78f   : > { %11950 = vst [vmem:[#allocation101_spill] sm:$0xff] %v10846_v33  ;;  %11951 = vst [vmem:[#allocation102_spill] sm:$0xff] %v10870_v4  ;;  %v5770_v16 = vld [vmem:[%s11643_s16 + $0x718] sm:$0xff]  ;;  %v5772_v15 = vld [vmem:[%s11643_s16 + $0x728] sm:$0xff] }
 0x791   : > { %7182 = vmatpush1.bf16.msra.mxu0 %v10832_v7  ;;  %7238 = vmatpush1.bf16.msra.mxu1 %v10834_v14  ;;  %v10882_v7 = vpack.c.bf16 %v5768_v0, %v5766_v8  ;;  %v10904_v8 = vpack.c.bf16 %v5705_v17, %v5703_v59  ;;  %v10906_v0 = vpack.c.bf16 %v5767_v25, %v5765_v51  ;;  %v5769_v59 = vld [vmem:[%s11643_s16 + $0x710] sm:$0xff]  ;;  %v5771_v17 = vld [vmem:[%s11643_s16 + $0x720] sm:$0xff] }
 0x792   : > { %7184 = vmatprep.subr.bf16.mxu0 %v10844_v43  ;;  %7240 = vmatprep.subr.bf16.mxu1 %v10846_v33  ;;  %v5707_v33 = vld [vmem:[%s11643_s16 + $0x540] sm:$0xff]  ;;  %v10913_v43 = vpack.c.bf16 %v5710_v50, %v5708_v11  ;;  %v10915_v14 = vpack.c.bf16 %v5772_v15, %v5770_v16  ;;  %v10930_v25 = vpack.c.bf16 %v5771_v17, %v5769_v59  ;;  %v10939_v50 = vld [vmem:[%s11643_s16 + $0x568] sm:$0x1]  ;;  %v10944_v16 = vld [vmem:[%s11643_s16 + $0x738] sm:$0x1] }
 0x793   : > { %11952 = vst [vmem:[#allocation103_spill] sm:$0xff] %v10904_v8  ;;  %v3403_v11 = vmul.f32 %v10386_v42, %v10381_v35  ;;  %v10955_v42 = vld [vmem:[%s11643_s16 + $0x560] sm:$0x1]  ;;  %v11955_v59 = vld [vmem:[#allocation21_spill] sm:$0xff] }
 0x794   : > { %v11956_v17 = vld [vmem:[#allocation22_spill] sm:$0xff] }
 0x795   : > { %7186 = vmatpush1.bf16.msra.mxu0 %v10868_v9  ;;  %7242 = vmatpush1.bf16.msra.mxu1 %v10870_v4  ;;  %v5709_v4 = vld [vmem:[%s11643_s16 + $0x550] sm:$0xff] }
 0x796   : > { %7188 = vmatprep.subr.bf16.mxu0 %v10880_v29  ;;  %7244 = vmatprep.subr.bf16.mxu1 %v10882_v7  ;;  %v10928_v51 = vpack.c.bf16 %v5709_v4, %v5707_v33  ;;  %v10960_v33 = vld [vmem:[%s11643_s16 + $0x730] sm:$0x1]  ;;  %v3407_v4 = vadd.f32 %v3403_v11, %v10379_v61  ;;  %v11957_v11 = vld [vmem:[#allocation23_spill] sm:$0xff] }
 0x798   : > { %v3415_v15 = vmul.f32 0.01, %v3407_v4  ;;  %vm3411_vm7 = vcmp.ge.f32.partialorder %v3407_v4, 0.0 }
 0x799   : > { %7190 = vmatpush1.bf16.msra.mxu0 %v10904_v8  ;;  %7246 = vmatpush1.bf16.msra.mxu1 %v10906_v0 }
 0x79a   : > { %7192 = vmatprep.subr.bf16.mxu0 %v10913_v43  ;;  %7248 = vmatprep.subr.bf16.mxu1 %v10915_v14 }
 0x79d   : > { %7194 = vmatpush1.bf16.msra.mxu0 %v10928_v51  ;;  %7250 = vmatpush1.bf16.msra.mxu1 %v10930_v25 }
 0x79e   : > { %5713 = vmatprep.subr.msk.mxu0 %vm3687_vm0, %v10939_v50  ;;  %5775 = vmatprep.subr.msk.mxu1 %vm3687_vm0, %v10944_v16 }
 0x7a1   : > { %5714 = vmatpush1.msk.msra.mxu0 %vm3687_vm0, %v10955_v42  ;;  %5776 = vmatpush1.msk.msra.mxu1 %vm3687_vm0, %v10960_v33 }
 0x7a2   : > { %4043 = vmatmul.mubr.f32.vlgmr.msra.gmra.mrb[68].mxu0 %v10445_v24  ;;  %4185 = vmatmul.mubr.f32.vlgmr.msra.gmra.mrb[84].mxu1 %v10445_v24  ;;  %v10981_v24 = vsel %vm3411_vm7, %v3407_v4, %v3415_v15  ;;  %v11958_v4 = vld [vmem:[#allocation24_spill] sm:$0xff]  ;;  %v11959_v15 = vld [vmem:[#allocation25_spill] sm:$0xff] }
 0x7a3   : > { %7252 = vmatprep.subr.bf16.mxu0 %v9825_v10  ;;  %7308 = vmatprep.subr.bf16.mxu1 %v9827_v30 }
 0x7a4   : > { %5716 = vmatprep.mubr.msk.f32.mxu0 %vm3680_vm1, %v10484_v41  ;;  %5778 = vmatprep.mubr.msk.f32.mxu1 %vm3680_vm1, %v10484_v41  ;;  %v11953_v41 = vld [vmem:[#allocation19_spill] sm:$0xff] }
 0x7a5   : > { %7254 = vmatpush1.bf16.msra.mxu0 %v9863_v19  ;;  %7310 = vmatpush1.bf16.msra.mxu1 %v9865_v20 }
 0x7a6   : > { %4049 = vmatmul.mubr.f32.gmra.mrb[70].mxu0 %v10499_v58  ;;  %4191 = vmatmul.mubr.f32.gmra.mrb[86].mxu1 %v10499_v58  ;;  %v11954_v58 = vld [vmem:[#allocation20_spill] sm:$0xff] }
 0x7a7   : > { %7256 = vmatprep.subr.bf16.mxu0 %v9873_v60  ;;  %7312 = vmatprep.subr.bf16.mxu1 %v9875_v63 }
 0x7a8   : > { %5781 = vmatprep.mubr.msk.f32.mxu0 %vm3680_vm1, %v10981_v24  ;;  %5785 = vmatprep.mubr.msk.f32.mxu1 %vm3680_vm1, %v10981_v24 }
 0x7a9   : > { %7258 = vmatpush1.bf16.msra.mxu0 %v9905_v55  ;;  %7314 = vmatpush1.bf16.msra.mxu1 %v9907_v56 }
 0x7aa   : > { %7260 = vmatprep.subr.bf16.mxu0 %v9917_v62  ;;  %7316 = vmatprep.subr.bf16.mxu1 %v9919_v3 }
 0x7ad   : > { %7262 = vmatpush1.bf16.msra.mxu0 %v9941_v23  ;;  %7318 = vmatpush1.bf16.msra.mxu1 %v9943_v21 }
 0x7ae   : > { %7264 = vmatprep.subr.bf16.mxu0 %v9953_v26  ;;  %7320 = vmatprep.subr.bf16.mxu1 %v9955_v27 }
 0x7b1   : > { %7266 = vmatpush1.bf16.msra.mxu0 %v9977_v45  ;;  %7322 = vmatpush1.bf16.msra.mxu1 %v9979_v40 }
 0x7b2   : > { %7268 = vmatprep.subr.bf16.mxu0 %v9989_v44  ;;  %7324 = vmatprep.subr.bf16.mxu1 %v9991_v46 }
 0x7b5   : > { %7270 = vmatpush1.bf16.msra.mxu0 %v10013_v54  ;;  %7326 = vmatpush1.bf16.msra.mxu1 %v10015_v28 }
 0x7b6   : > { %7272 = vmatprep.subr.bf16.mxu0 %v10025_v52  ;;  %7328 = vmatprep.subr.bf16.mxu1 %v10027_v12 }
 0x7b9   : > { %7274 = vmatpush1.bf16.msra.mxu0 %v10049_v53  ;;  %7330 = vmatpush1.bf16.msra.mxu1 %v10051_v36 }
 0x7ba   : > { %7276 = vmatprep.subr.bf16.mxu0 %v10061_v18  ;;  %7332 = vmatprep.subr.bf16.mxu1 %v10063_v31 }
 0x7bd   : > { %7278 = vmatpush1.bf16.msra.mxu0 %v10085_v1  ;;  %7334 = vmatpush1.bf16.msra.mxu1 %v10087_v2  ;;  %v11998_v2 = vld [vmem:[#allocation64_spill] sm:$0xff] }
 0x7be   : > { %7280 = vmatprep.subr.bf16.mxu0 %v10097_v6  ;;  %7336 = vmatprep.subr.bf16.mxu1 %v10099_v22  ;;  %v11960_v22 = vld [vmem:[#allocation26_spill] sm:$0xff] }
 0x7c1   : > { %7282 = vmatpush1.bf16.msra.mxu0 %v10121_v38  ;;  %7338 = vmatpush1.bf16.msra.mxu1 %v10123_v47  ;;  %v11961_v38 = vld [vmem:[#allocation27_spill] sm:$0xff]  ;;  %v11962_v47 = vld [vmem:[#allocation28_spill] sm:$0xff] }
 0x7c2   : > { %7284 = vmatprep.subr.bf16.mxu0 %v10133_v49  ;;  %7340 = vmatprep.subr.bf16.mxu1 %v11953_v41  ;;  %v11963_v49 = vld [vmem:[#allocation29_spill] sm:$0xff]  ;;  %v11964_v41 = vld [vmem:[#allocation30_spill] sm:$0xff] }
 0x7c5   : > { %7286 = vmatpush1.bf16.msra.mxu0 %v11954_v58  ;;  %7342 = vmatpush1.bf16.msra.mxu1 %v11955_v59  ;;  %v11965_v58 = vld [vmem:[#allocation31_spill] sm:$0xff] }
 0x7c6   : > { %7288 = vmatprep.subr.bf16.mxu0 %v11956_v17  ;;  %7344 = vmatprep.subr.bf16.mxu1 %v11957_v11  ;;  %v11966_v17 = vld [vmem:[#allocation48_spill] sm:$0xff] }
 0x7c7   : > { %v3402_v59 = vmul.f32 %v11966_v17, %v10381_v35  ;;  %v11967_v11 = vld [vmem:[#allocation32_spill] sm:$0xff] }
 0x7c8   : > { %v11975_v17 = vld [vmem:[#allocation40_spill] sm:$0xff] }
 0x7c9   : > { %7290 = vmatpush1.bf16.msra.mxu0 %v11958_v4  ;;  %7346 = vmatpush1.bf16.msra.mxu1 %v11959_v15  ;;  %v11968_v4 = vld [vmem:[#allocation33_spill] sm:$0xff]  ;;  %v11969_v15 = vld [vmem:[#allocation34_spill] sm:$0xff] }
 0x7ca   : > { %7292 = vmatprep.subr.bf16.mxu0 %v11960_v22  ;;  %7348 = vmatprep.subr.bf16.mxu1 %v11961_v38  ;;  %v11970_v22 = vld [vmem:[#allocation35_spill] sm:$0xff]  ;;  %v3406_v38 = vadd.f32 %v3402_v59, %v10379_v61  ;;  %v11979_v59 = vld [vmem:[#allocation54_spill] sm:$0xff] }
 0x7cb   : > { %vm3413_vm9 = vcmp.ge.f32.partialorder %v11979_v59, 0.0 }
 0x7cc   : > { %v3414_v6 = vmul.f32 0.01, %v3406_v38  ;;  %vm3410_vm8 = vcmp.ge.f32.partialorder %v3406_v38, 0.0 }
 0x7cd   : > { %7294 = vmatpush1.bf16.msra.mxu0 %v11962_v47  ;;  %7350 = vmatpush1.bf16.msra.mxu1 %v11963_v49  ;;  %v11971_v47 = vld [vmem:[#allocation36_spill] sm:$0xff]  ;;  %v11972_v49 = vld [vmem:[#allocation37_spill] sm:$0xff] }
 0x7ce   : > { %7296 = vmatprep.subr.bf16.mxu0 %v11964_v41  ;;  %7352 = vmatprep.subr.bf16.mxu1 %v11965_v58  ;;  %v11973_v41 = vld [vmem:[#allocation38_spill] sm:$0xff]  ;;  %v11974_v58 = vld [vmem:[#allocation39_spill] sm:$0xff] }
 0x7d1   : > { %7298 = vmatpush1.bf16.msra.mxu0 %v11967_v11  ;;  %7354 = vmatpush1.bf16.msra.mxu1 %v11968_v4  ;;  %v11976_v11 = vld [vmem:[#allocation42_spill] sm:$0xff]  ;;  %v11977_v4 = vld [vmem:[#allocation41_spill] sm:$0xff] }
 0x7d2   : > { %7300 = vmatprep.subr.bf16.mxu0 %v11969_v15  ;;  %7356 = vmatprep.subr.bf16.mxu1 %v11970_v22  ;;  %v11978_v22 = vld [vmem:[#allocation43_spill] sm:$0xff]  ;;  %v11981_v15 = vld [vmem:[#allocation44_spill] sm:$0xff] }
 0x7d5   : > { %7302 = vmatpush1.bf16.msra.mxu0 %v11971_v47  ;;  %7358 = vmatpush1.bf16.msra.mxu1 %v11972_v49  ;;  %v3417_v47 = vmul.f32 0.01, %v11979_v59  ;;  %v11980_v49 = vld [vmem:[#allocation52_spill] sm:$0xff] }
 0x7d6   : > { %7304 = vmatprep.subr.bf16.mxu0 %v11973_v41  ;;  %7360 = vmatprep.subr.bf16.mxu1 %v11974_v58  ;;  %v3416_v41 = vmul.f32 0.01, %v11980_v49  ;;  %v11982_v58 = vld [vmem:[#allocation46_spill] sm:$0xff]  ;;  %vm3412_vm10 = vcmp.ge.f32.partialorder %v11980_v49, 0.0 }
 0x7d9   : > { %7306 = vmatpush1.bf16.msra.mxu0 %v11975_v17  ;;  %7362 = vmatpush1.bf16.msra.mxu1 %v11976_v11  ;;  %v11051_v11 = vsel %vm3410_vm8, %v3406_v38, %v3414_v6  ;;  %v11059_v17 = vsel %vm3413_vm9, %v11979_v59, %v3417_v47  ;;  %v11985_v6 = vld [vmem:[#allocation49_spill] sm:$0xff]  ;;  %v11986_v38 = vld [vmem:[#allocation50_spill] sm:$0xff]  ;;  %v11989_v59 = vld [vmem:[#allocation55_spill] sm:$0xff] }
 0x7da   : > { %5779 = vmatprep.subr.msk.mxu0 %vm3687_vm0, %v11977_v4  ;;  %5783 = vmatprep.subr.msk.mxu1 %vm3687_vm0, %v11978_v22  ;;  %v11983_v22 = vld [vmem:[#allocation45_spill] sm:$0xff]  ;;  %v11984_v4 = vld [vmem:[#allocation47_spill] sm:$0xff] }
 0x7db   : > { %v11988_v47 = vld [vmem:[#allocation53_spill] sm:$0xff] }
 0x7dd   : > { %5780 = vmatpush1.msk.msra.mxu0 %vm3687_vm0, %v11981_v15  ;;  %5784 = vmatpush1.msk.msra.mxu1 %vm3687_vm0, %v11982_v58  ;;  %v11068_v58 = vsel %vm3412_vm10, %v11980_v49, %v3416_v41  ;;  %v11987_v15 = vld [vmem:[#allocation51_spill] sm:$0xff]  ;;  %v11991_v49 = vld [vmem:[#allocation57_spill] sm:$0xff]  ;;  %v11992_v41 = vld [vmem:[#allocation58_spill] sm:$0xff] }
 0x7de   : > { %4268 = vmatmul.mubr.f32.vlgmr.msra.gmra.mrb[72].mxu0 %v11051_v11  ;;  %4345 = vmatmul.mubr.f32.vlgmr.msra.gmra.mrb[88].mxu1 %v11051_v11 }
 0x7df   : > { %7364 = vmatprep.subr.bf16.mxu0 %v11983_v22  ;;  %7420 = vmatprep.subr.bf16.mxu1 %v11984_v4  ;;  %v11994_v4 = vld [vmem:[#allocation60_spill] sm:$0xff]  ;;  %v11997_v22 = vld [vmem:[#allocation63_spill] sm:$0xff] }
 0x7e0   : > { %5782 = vmatprep.mubr.msk.f32.mxu0 %vm3680_vm1, %v11059_v17  ;;  %5786 = vmatprep.mubr.msk.f32.mxu1 %vm3680_vm1, %v11059_v17 }
 0x7e1   : > { %7366 = vmatpush1.bf16.msra.mxu0 %v11985_v6  ;;  %7422 = vmatpush1.bf16.msra.mxu1 %v11986_v38  ;;  %v11990_v38 = vld [vmem:[#allocation56_spill] sm:$0xff]  ;;  %v11993_v6 = vld [vmem:[#allocation59_spill] sm:$0xff] }
 0x7e2   : > { %4274 = vmatmul.mubr.f32.gmra.mrb[74].mxu0 %v11068_v58  ;;  %4351 = vmatmul.mubr.f32.gmra.mrb[90].mxu1 %v11068_v58 }
 0x7e3   : > { %7368 = vmatprep.subr.bf16.mxu0 %v11987_v15  ;;  %7424 = vmatprep.subr.bf16.mxu1 %v11988_v47  ;;  %v11995_v15 = vld [vmem:[#allocation61_spill] sm:$0xff]  ;;  %v11996_v47 = vld [vmem:[#allocation62_spill] sm:$0xff] }
 0x7e4   : > { %5789 = vmatprep.mubr.msk.f32.mxu0 %vm3680_vm1, %v10981_v24  ;;  %5793 = vmatprep.mubr.msk.f32.mxu1 %vm3680_vm1, %v10981_v24  ;;  %v11999_v24 = vld [vmem:[#allocation65_spill] sm:$0xff] }
 0x7e5   : > { %7370 = vmatpush1.bf16.msra.mxu0 %v11989_v59  ;;  %7426 = vmatpush1.bf16.msra.mxu1 %v11990_v38  ;;  %v12000_v59 = vld [vmem:[#allocation66_spill] sm:$0xff]  ;;  %v12001_v38 = vld [vmem:[#allocation67_spill] sm:$0xff] }
 0x7e6   : > { %7372 = vmatprep.subr.bf16.mxu0 %v11991_v49  ;;  %7428 = vmatprep.subr.bf16.mxu1 %v11992_v41  ;;  %v12002_v49 = vld [vmem:[#allocation68_spill] sm:$0xff]  ;;  %v12003_v41 = vld [vmem:[#allocation69_spill] sm:$0xff] }
 0x7e9   : > { %7374 = vmatpush1.bf16.msra.mxu0 %v11993_v6  ;;  %7430 = vmatpush1.bf16.msra.mxu1 %v11994_v4  ;;  %v12004_v6 = vld [vmem:[#allocation70_spill] sm:$0xff]  ;;  %v12005_v4 = vld [vmem:[#allocation71_spill] sm:$0xff] }
 0x7ea   : > { %7376 = vmatprep.subr.bf16.mxu0 %v11995_v15  ;;  %7432 = vmatprep.subr.bf16.mxu1 %v11996_v47  ;;  %v12006_v15 = vld [vmem:[#allocation72_spill] sm:$0xff]  ;;  %v12007_v47 = vld [vmem:[#allocation73_spill] sm:$0xff] }
 0x7ed   : > { %7378 = vmatpush1.bf16.msra.mxu0 %v11997_v22  ;;  %7434 = vmatpush1.bf16.msra.mxu1 %v11998_v2  ;;  %v12008_v22 = vld [vmem:[#allocation74_spill] sm:$0xff]  ;;  %v12009_v2 = vld [vmem:[#allocation77_spill] sm:$0xff] }
 0x7ee   : > { %7380 = vmatprep.subr.bf16.mxu0 %v11999_v24  ;;  %7436 = vmatprep.subr.bf16.mxu1 %v12000_v59  ;;  %v12010_v24 = vld [vmem:[#allocation78_spill] sm:$0xff]  ;;  %v12011_v59 = vld [vmem:[#allocation81_spill] sm:$0xff] }
 0x7f1   : > { %7382 = vmatpush1.bf16.msra.mxu0 %v12001_v38  ;;  %7438 = vmatpush1.bf16.msra.mxu1 %v12002_v49  ;;  %v12012_v38 = vld [vmem:[#allocation82_spill] sm:$0xff] }
 0x7f2   : > { %7384 = vmatprep.subr.bf16.mxu0 %v12003_v41  ;;  %7440 = vmatprep.subr.bf16.mxu1 %v12004_v6 }
 0x7f5   : > { %7386 = vmatpush1.bf16.msra.mxu0 %v12005_v4  ;;  %7442 = vmatpush1.bf16.msra.mxu1 %v12006_v15 }
 0x7f6   : > { %7388 = vmatprep.subr.bf16.mxu0 %v12007_v47  ;;  %7444 = vmatprep.subr.bf16.mxu1 %v12008_v22 }
 0x7f9   : > { %7390 = vmatpush1.bf16.msra.mxu0 %v12009_v2  ;;  %7446 = vmatpush1.bf16.msra.mxu1 %v12010_v24  ;;  %v12013_v24 = vld [vmem:[#allocation94_spill] sm:$0xff] }
 0x7fa   : > { %7392 = vmatprep.subr.bf16.mxu0 %v12011_v59  ;;  %7448 = vmatprep.subr.bf16.mxu1 %v12012_v38  ;;  %v12014_v59 = vld [vmem:[#allocation95_spill] sm:$0xff]  ;;  %v12015_v38 = vld [vmem:[#allocation96_spill] sm:$0xff] }
 0x7fd   : > { %7394 = vmatpush1.bf16.msra.mxu0 %v10711_v48  ;;  %7450 = vmatpush1.bf16.msra.mxu1 %v10713_v5  ;;  %v12016_v48 = vld [vmem:[#allocation97_spill] sm:$0xff]  ;;  %v12017_v5 = vld [vmem:[#allocation98_spill] sm:$0xff] }
 0x7fe   : > { %7396 = vmatprep.subr.bf16.mxu0 %v10726_v34  ;;  %7452 = vmatprep.subr.bf16.mxu1 %v10728_v39  ;;  %v12018_v34 = vld [vmem:[#allocation99_spill] sm:$0xff]  ;;  %v12019_v39 = vld [vmem:[#allocation100_spill] sm:$0xff] }
 0x801   : > { %7398 = vmatpush1.bf16.msra.mxu0 %v10746_v37  ;;  %7454 = vmatpush1.bf16.msra.mxu1 %v10748_v13  ;;  %v12020_v37 = vld [vmem:[#allocation101_spill] sm:$0xff] }
 0x802   : > { %7400 = vmatprep.subr.bf16.mxu0 %v10758_v57  ;;  %7456 = vmatprep.subr.bf16.mxu1 %v10774_v32  ;;  %v12021_v57 = vld [vmem:[#allocation102_spill] sm:$0xff] }
 0x805   : > { %7402 = vmatpush1.bf16.msra.mxu0 %v12013_v24  ;;  %7458 = vmatpush1.bf16.msra.mxu1 %v12014_v59 }
 0x806   : > { %7404 = vmatprep.subr.bf16.mxu0 %v12015_v38  ;;  %7460 = vmatprep.subr.bf16.mxu1 %v12016_v48 }
 0x809   : > { %7406 = vmatpush1.bf16.msra.mxu0 %v12017_v5  ;;  %7462 = vmatpush1.bf16.msra.mxu1 %v12018_v34 }
 0x80a   : > { %7408 = vmatprep.subr.bf16.mxu0 %v12019_v39  ;;  %7464 = vmatprep.subr.bf16.mxu1 %v12020_v37  ;;  %v12022_v39 = vld [vmem:[#allocation79_spill] sm:$0xff] }
 0x80b   : > { %v3503_v34 = vmul.f32 %v12022_v39, %v10381_v35 }
 0x80d   : > { %7410 = vmatpush1.bf16.msra.mxu0 %v10868_v9  ;;  %7466 = vmatpush1.bf16.msra.mxu1 %v12021_v57 }
 0x80e   : > { %7412 = vmatprep.subr.bf16.mxu0 %v10880_v29  ;;  %7468 = vmatprep.subr.bf16.mxu1 %v10882_v7 }
 0x811   : > { %7414 = vmatpush1.bf16.msra.mxu0 %v10904_v8  ;;  %7470 = vmatpush1.bf16.msra.mxu1 %v10906_v0  ;;  %v3507_v8 = vadd.f32 %v3503_v34, %v10379_v61 }
 0x812   : > { %7416 = vmatprep.subr.bf16.mxu0 %v10913_v43  ;;  %7472 = vmatprep.subr.bf16.mxu1 %v10915_v14 }
 0x813   : > { %v3515_v39 = vmul.f32 0.01, %v3507_v8  ;;  %vm3511_vm11 = vcmp.ge.f32.partialorder %v3507_v8, 0.0 }
 0x815   : > { %7418 = vmatpush1.bf16.msra.mxu0 %v10928_v51  ;;  %7474 = vmatpush1.bf16.msra.mxu1 %v10930_v25  ;;  %v11153_v34 = vsel %vm3511_vm11, %v3507_v8, %v3515_v39  ;;  %v12023_v8 = vld [vmem:[#allocation13_spill] sm:$0xff] }
 0x816   : > { %5787 = vmatprep.subr.msk.mxu0 %vm3687_vm0, %v10939_v50  ;;  %5791 = vmatprep.subr.msk.mxu1 %vm3687_vm0, %v10944_v16  ;;  %v12027_v39 = vld [vmem:[#allocation17_spill] sm:$0xff] }
 0x819   : > { %5788 = vmatpush1.msk.msra.mxu0 %vm3687_vm0, %v10955_v42  ;;  %5792 = vmatpush1.msk.msra.mxu1 %vm3687_vm0, %v10960_v33 }
 0x81a   : > { %4422 = vmatmul.mubr.f32.vlgmr.msra.gmra.mrb[76].mxu0 %v11051_v11  ;;  %4499 = vmatmul.mubr.f32.vlgmr.msra.gmra.mrb[92].mxu1 %v11051_v11  ;;  %v12024_v11 = vld [vmem:[#allocation14_spill] sm:$0xff] }
 0x81b   : > { %7476 = vmatprep.subr.bf16.mxu0 %v9825_v10  ;;  %7532 = vmatprep.subr.bf16.mxu1 %v9827_v30 }
 0x81c   : > { %5790 = vmatprep.mubr.msk.f32.mxu0 %vm3680_vm1, %v11059_v17  ;;  %5794 = vmatprep.mubr.msk.f32.mxu1 %vm3680_vm1, %v11059_v17  ;;  %v12025_v17 = vld [vmem:[#allocation15_spill] sm:$0xff] }
 0x81d   : > { %7478 = vmatpush1.bf16.msra.mxu0 %v9863_v19  ;;  %7534 = vmatpush1.bf16.msra.mxu1 %v9865_v20 }
 0x81e   : > { %4428 = vmatmul.mubr.f32.gmra.mrb[78].mxu0 %v11068_v58  ;;  %4505 = vmatmul.mubr.f32.gmra.mrb[94].mxu1 %v11068_v58  ;;  %v12026_v58 = vld [vmem:[#allocation16_spill] sm:$0xff] }
 0x81f   : > { %7480 = vmatprep.subr.bf16.mxu0 %v9873_v60  ;;  %7536 = vmatprep.subr.bf16.mxu1 %v9875_v63 }
 0x820   : > { %5797 = vmatprep.mubr.msk.f32.mxu0 %vm3680_vm1, %v11153_v34  ;;  %5801 = vmatprep.mubr.msk.f32.mxu1 %vm3680_vm1, %v11153_v34 }
 0x821   : > { %7482 = vmatpush1.bf16.msra.mxu0 %v9905_v55  ;;  %7538 = vmatpush1.bf16.msra.mxu1 %v9907_v56 }
 0x822   : > { %7484 = vmatprep.subr.bf16.mxu0 %v9917_v62  ;;  %7540 = vmatprep.subr.bf16.mxu1 %v9919_v3 }
 0x825   : > { %7486 = vmatpush1.bf16.msra.mxu0 %v9941_v23  ;;  %7542 = vmatpush1.bf16.msra.mxu1 %v9943_v21 }
 0x826   : > { %7488 = vmatprep.subr.bf16.mxu0 %v9953_v26  ;;  %7544 = vmatprep.subr.bf16.mxu1 %v9955_v27 }
 0x829   : > { %7490 = vmatpush1.bf16.msra.mxu0 %v9977_v45  ;;  %7546 = vmatpush1.bf16.msra.mxu1 %v9979_v40 }
 0x82a   : > { %7492 = vmatprep.subr.bf16.mxu0 %v9989_v44  ;;  %7548 = vmatprep.subr.bf16.mxu1 %v9991_v46  ;;  %v12044_v46 = vld [vmem:[#allocation26_spill] sm:$0xff] }
 0x82d   : > { %7494 = vmatpush1.bf16.msra.mxu0 %v10013_v54  ;;  %7550 = vmatpush1.bf16.msra.mxu1 %v10015_v28 }
 0x82e   : > { %7496 = vmatprep.subr.bf16.mxu0 %v10025_v52  ;;  %7552 = vmatprep.subr.bf16.mxu1 %v10027_v12  ;;  %v12028_v12 = vld [vmem:[#allocation18_spill] sm:$0xff]  ;;  %v12047_v52 = vld [vmem:[#allocation29_spill] sm:$0xff] }
 0x831   : > { %7498 = vmatpush1.bf16.msra.mxu0 %v10049_v53  ;;  %7554 = vmatpush1.bf16.msra.mxu1 %v10051_v36  ;;  %v12029_v53 = vld [vmem:[#allocation19_spill] sm:$0xff] }
 0x832   : > { %7500 = vmatprep.subr.bf16.mxu0 %v10061_v18  ;;  %7556 = vmatprep.subr.bf16.mxu1 %v10063_v31 }
 0x835   : > { %7502 = vmatpush1.bf16.msra.mxu0 %v10085_v1  ;;  %7558 = vmatpush1.bf16.msra.mxu1 %v12023_v8  ;;  %v12034_v8 = vld [vmem:[#allocation20_spill] sm:$0xff] }
 0x836   : > { %7504 = vmatprep.subr.bf16.mxu0 %v12024_v11  ;;  %7560 = vmatprep.subr.bf16.mxu1 %v12025_v17  ;;  %v12035_v11 = vld [vmem:[#allocation21_spill] sm:$0xff]  ;;  %v12036_v17 = vld [vmem:[#allocation22_spill] sm:$0xff] }
 0x839   : > { %7506 = vmatpush1.bf16.msra.mxu0 %v12026_v58  ;;  %7562 = vmatpush1.bf16.msra.mxu1 %v12027_v39  ;;  %v12037_v58 = vld [vmem:[#allocation23_spill] sm:$0xff] }
 0x83a   : > { %7508 = vmatprep.subr.bf16.mxu0 %v12028_v12  ;;  %7564 = vmatprep.subr.bf16.mxu1 %v12029_v53  ;;  %v12045_v53 = vld [vmem:[#allocation27_spill] sm:$0xff] }
 0x83b   : > { %v11187_v36 = vpop.f32.mrb[64].mxu0  ;;  %v11189_v18 = vpop.f32.mrb[80].mxu1 }
 0x83c   : > { %12030 = vst [vmem:[#allocation48_spill] sm:$0xff] %v11187_v36  ;;  %12031 = vst [vmem:[#allocation41_spill] sm:$0xff] %v11189_v18  ;;  %v11191_v31 = vpop.f32.mrb[65].mxu0  ;;  %v11193_v1 = vpop.f32.mrb[81].mxu1  ;;  %v12046_v36 = vld [vmem:[#allocation28_spill] sm:$0xff]  ;;  %v12048_v18 = vld [vmem:[#allocation30_spill] sm:$0xff] }
 0x83d   : > { %12032 = vst [vmem:[#allocation43_spill] sm:$0xff] %v11191_v31  ;;  %12033 = vst [vmem:[#allocation54_spill] sm:$0xff] %v11193_v1  ;;  %7510 = vmatpush1.bf16.msra.mxu0 %v12034_v8  ;;  %7566 = vmatpush1.bf16.msra.mxu1 %v12035_v11  ;;  %v12042_v8 = vld [vmem:[#allocation24_spill] sm:$0xff]  ;;  %v12043_v11 = vld [vmem:[#allocation25_spill] sm:$0xff] }
 0x83e   : > { %7512 = vmatprep.subr.bf16.mxu0 %v12036_v17  ;;  %7568 = vmatprep.subr.bf16.mxu1 %v12037_v58  ;;  %v12052_v58 = vld [vmem:[#allocation33_spill] sm:$0xff]  ;;  %v12053_v17 = vld [vmem:[#allocation34_spill] sm:$0xff]  ;;  %v12054_v1 = vld [vmem:[#allocation35_spill] sm:$0xff] }
 0x83f   : > { %v11199_v39 = vpop.f32.mrb[66].mxu0  ;;  %v11201_v12 = vpop.f32.mrb[82].mxu1  ;;  %v12055_v31 = vld [vmem:[#allocation36_spill] sm:$0xff] }
 0x840   : > { %12038 = vst [vmem:[#allocation52_spill] sm:$0xff] %v11199_v39  ;;  %12039 = vst [vmem:[#allocation44_spill] sm:$0xff] %v11201_v12  ;;  %v11207_v28 = vpop.f32.mrb[67].mxu0  ;;  %v11209_v54 = vpop.f32.mrb[83].mxu1  ;;  %v12049_v12 = vld [vmem:[#allocation31_spill] sm:$0xff] }
 0x841   : > { %12040 = vst [vmem:[#allocation46_spill] sm:$0xff] %v11207_v28  ;;  %12041 = vst [vmem:[#allocation94_spill] sm:$0xff] %v11209_v54  ;;  %7514 = vmatpush1.bf16.msra.mxu0 %v12042_v8  ;;  %7570 = vmatpush1.bf16.msra.mxu1 %v12043_v11  ;;  %v12050_v39 = vld [vmem:[#allocation75_spill] sm:$0xff]  ;;  %v12051_v8 = vld [vmem:[#allocation32_spill] sm:$0xff] }
 0x842   : > { %7516 = vmatprep.subr.bf16.mxu0 %v12044_v46  ;;  %7572 = vmatprep.subr.bf16.mxu1 %v12045_v53  ;;  %v3502_v11 = vmul.f32 %v12050_v39, %v10381_v35  ;;  %v12056_v28 = vld [vmem:[#allocation37_spill] sm:$0xff]  ;;  %v12059_v39 = vld [vmem:[#allocation40_spill] sm:$0xff] }
 0x844   : > { %v3506_v54 = vadd.f32 %v3502_v11, %v10379_v61  ;;  %v11246_v11 = vld [vmem:[%s11643_s16 + $0x398] sm:$0x1] }
 0x845   : > { %7518 = vmatpush1.bf16.msra.mxu0 %v12046_v36  ;;  %7574 = vmatpush1.bf16.msra.mxu1 %v12047_v52  ;;  %12062 = vst [vmem:[#allocation96_spill] sm:$0xff] %v11246_v11  ;;  %v12082_v36 = vld [vmem:[#allocation64_spill] sm:$0xff] }
 0x846   : > { %7520 = vmatprep.subr.bf16.mxu0 %v12048_v18  ;;  %7576 = vmatprep.subr.bf16.mxu1 %v12049_v12  ;;  %v12057_v18 = vld [vmem:[#allocation38_spill] sm:$0xff]  ;;  %v12058_v12 = vld [vmem:[#allocation39_spill] sm:$0xff]  ;;  %v3514_v52 = vmul.f32 0.01, %v3506_v54  ;;  %vm3510_vm12 = vcmp.ge.f32.partialorder %v3506_v54, 0.0 }
 0x849   : > { %7522 = vmatpush1.bf16.msra.mxu0 %v12051_v8  ;;  %7578 = vmatpush1.bf16.msra.mxu1 %v12052_v58  ;;  %v12060_v8 = vld [vmem:[#allocation42_spill] sm:$0xff]  ;;  %v12081_v58 = vld [vmem:[#allocation63_spill] sm:$0xff] }
 0x84a   : > { %7524 = vmatprep.subr.bf16.mxu0 %v12053_v17  ;;  %7580 = vmatprep.subr.bf16.mxu1 %v12054_v1  ;;  %v11239_v1 = vld [vmem:[%s11643_s16 + $0x1c8] sm:$0x1] }
 0x84b   : > { %12061 = vst [vmem:[#allocation95_spill] sm:$0xff] %v11239_v1  ;;  %v12068_v17 = vld [vmem:[#allocation47_spill] sm:$0xff] }
 0x84d   : > { %7526 = vmatpush1.bf16.msra.mxu0 %v12055_v31  ;;  %7582 = vmatpush1.bf16.msra.mxu1 %v12056_v28  ;;  %v11256_v28 = vld [vmem:[%s11643_s16 + $0x1c0] sm:$0x1]  ;;  %v12067_v31 = vld [vmem:[#allocation45_spill] sm:$0xff] }
 0x84e   : > { %7528 = vmatprep.subr.bf16.mxu0 %v12057_v18  ;;  %7584 = vmatprep.subr.bf16.mxu1 %v12058_v12  ;;  %12065 = vst [vmem:[#allocation97_spill] sm:$0xff] %v11256_v28 }
 0x851   : > { %7530 = vmatpush1.bf16.msra.mxu0 %v12059_v39  ;;  %7586 = vmatpush1.bf16.msra.mxu1 %v12060_v8  ;;  %v12063_v39 = vld [vmem:[#allocation92_spill] sm:$0xff]  ;;  %v12064_v8 = vld [vmem:[#allocation89_spill] sm:$0xff] }
 0x852   : > { %5795 = vmatprep.subr.msk.mxu0 %vm3687_vm0, %v11239_v1  ;;  %5799 = vmatprep.subr.msk.mxu1 %vm3687_vm0, %v11246_v11  ;;  %v3517_v12 = vmul.f32 0.01, %v12063_v39  ;;  %vm3513_vm13 = vcmp.ge.f32.partialorder %v12063_v39, 0.0  ;;  %v3516_v18 = vmul.f32 0.01, %v12064_v8  ;;  %v11267_v11 = vsel %vm3510_vm12, %v3506_v54, %v3514_v52  ;;  %v12069_v54 = vld [vmem:[#allocation49_spill] sm:$0xff] }
 0x853   : > { %v11263_v1 = vld [vmem:[%s11643_s16 + $0x390] sm:$0x1]  ;;  %vm3512_vm14 = vcmp.ge.f32.partialorder %v12064_v8, 0.0  ;;  %v12070_v52 = vld [vmem:[#allocation50_spill] sm:$0xff] }
 0x854   : > { %12066 = vst [vmem:[#allocation98_spill] sm:$0xff] %v11263_v1 }
 0x855   : > { %5796 = vmatpush1.msk.msra.mxu0 %vm3687_vm0, %v11256_v28  ;;  %5800 = vmatpush1.msk.msra.mxu1 %vm3687_vm0, %v11263_v1  ;;  %v11275_v28 = vsel %vm3513_vm13, %v12063_v39, %v3517_v12  ;;  %v11284_v1 = vsel %vm3512_vm14, %v12064_v8, %v3516_v18  ;;  %v12072_v12 = vld [vmem:[#allocation53_spill] sm:$0xff]  ;;  %v12073_v39 = vld [vmem:[#allocation55_spill] sm:$0xff]  ;;  %v12076_v8 = vld [vmem:[#allocation58_spill] sm:$0xff] }
 0x856   : > { %4582 = vmatmul.mubr.f32.vlgmr.msra.gmra.mrb[80].mxu0 %v11267_v11  ;;  %4659 = vmatmul.mubr.f32.vlgmr.msra.gmra.mrb[96].mxu1 %v11267_v11  ;;  %v12075_v18 = vld [vmem:[#allocation57_spill] sm:$0xff] }
 0x857   : > { %7588 = vmatprep.subr.bf16.mxu0 %v12067_v31  ;;  %7644 = vmatprep.subr.bf16.mxu1 %v12068_v17  ;;  %v12071_v17 = vld [vmem:[#allocation51_spill] sm:$0xff]  ;;  %v12078_v31 = vld [vmem:[#allocation60_spill] sm:$0xff] }
 0x858   : > { %5798 = vmatprep.mubr.msk.f32.mxu0 %vm3680_vm1, %v11275_v28  ;;  %5802 = vmatprep.mubr.msk.f32.mxu1 %vm3680_vm1, %v11275_v28 }
 0x859   : > { %7590 = vmatpush1.bf16.msra.mxu0 %v12069_v54  ;;  %7646 = vmatpush1.bf16.msra.mxu1 %v12070_v52  ;;  %v12074_v52 = vld [vmem:[#allocation56_spill] sm:$0xff]  ;;  %v12077_v54 = vld [vmem:[#allocation59_spill] sm:$0xff] }
 0x85a   : > { %4588 = vmatmul.mubr.f32.gmra.mrb[82].mxu0 %v11284_v1  ;;  %4665 = vmatmul.mubr.f32.gmra.mrb[98].mxu1 %v11284_v1 }
 0x85b   : > { %7592 = vmatprep.subr.bf16.mxu0 %v12071_v17  ;;  %7648 = vmatprep.subr.bf16.mxu1 %v12072_v12  ;;  %v12079_v17 = vld [vmem:[#allocation61_spill] sm:$0xff]  ;;  %v12080_v12 = vld [vmem:[#allocation62_spill] sm:$0xff] }
 0x85c   : > { %5805 = vmatprep.mubr.msk.f32.mxu0 %vm3680_vm1, %v11153_v34  ;;  %5809 = vmatprep.mubr.msk.f32.mxu1 %vm3680_vm1, %v11153_v34  ;;  %v12083_v34 = vld [vmem:[#allocation65_spill] sm:$0xff] }
 0x85d   : > { %7594 = vmatpush1.bf16.msra.mxu0 %v12073_v39  ;;  %7650 = vmatpush1.bf16.msra.mxu1 %v12074_v52  ;;  %v12084_v39 = vld [vmem:[#allocation66_spill] sm:$0xff]  ;;  %v12085_v52 = vld [vmem:[#allocation67_spill] sm:$0xff] }
 0x85e   : > { %7596 = vmatprep.subr.bf16.mxu0 %v12075_v18  ;;  %7652 = vmatprep.subr.bf16.mxu1 %v12076_v8 }
 0x861   : > { %7598 = vmatpush1.bf16.msra.mxu0 %v12077_v54  ;;  %7654 = vmatpush1.bf16.msra.mxu1 %v12078_v31 }
 0x862   : > { %7600 = vmatprep.subr.bf16.mxu0 %v12079_v17  ;;  %7656 = vmatprep.subr.bf16.mxu1 %v12080_v12 }
 0x865   : > { %7602 = vmatpush1.bf16.msra.mxu0 %v12081_v58  ;;  %7658 = vmatpush1.bf16.msra.mxu1 %v12082_v36 }
 0x866   : > { %7604 = vmatprep.subr.bf16.mxu0 %v12083_v34  ;;  %7660 = vmatprep.subr.bf16.mxu1 %v12084_v39  ;;  %v12086_v34 = vld [vmem:[#allocation78_spill] sm:$0xff]  ;;  %v12087_v39 = vld [vmem:[#allocation81_spill] sm:$0xff] }
 0x869   : > { %7606 = vmatpush1.bf16.msra.mxu0 %v12085_v52  ;;  %7662 = vmatpush1.bf16.msra.mxu1 %v12002_v49  ;;  %v12088_v52 = vld [vmem:[#allocation82_spill] sm:$0xff]  ;;  %v12089_v49 = vld [vmem:[#allocation83_spill] sm:$0xff] }
 0x86a   : > { %7608 = vmatprep.subr.bf16.mxu0 %v12003_v41  ;;  %7664 = vmatprep.subr.bf16.mxu1 %v12004_v6  ;;  %v12090_v41 = vld [vmem:[#allocation84_spill] sm:$0xff] }
 0x86d   : > { %7610 = vmatpush1.bf16.msra.mxu0 %v12005_v4  ;;  %7666 = vmatpush1.bf16.msra.mxu1 %v12006_v15  ;;  %v12092_v15 = vld [vmem:[#allocation85_spill] sm:$0xff] }
 0x86e   : > { %7612 = vmatprep.subr.bf16.mxu0 %v12007_v47  ;;  %7668 = vmatprep.subr.bf16.mxu1 %v12008_v22  ;;  %v12093_v47 = vld [vmem:[#allocation86_spill] sm:$0xff] }
 0x871   : > { %7614 = vmatpush1.bf16.msra.mxu0 %v12009_v2  ;;  %7670 = vmatpush1.bf16.msra.mxu1 %v12086_v34  ;;  %v12094_v34 = vld [vmem:[#allocation87_spill] sm:$0xff] }
 0x872   : > { %7616 = vmatprep.subr.bf16.mxu0 %v12087_v39  ;;  %7672 = vmatprep.subr.bf16.mxu1 %v12088_v52 }
 0x875   : > { %7618 = vmatpush1.bf16.msra.mxu0 %v12089_v49  ;;  %7674 = vmatpush1.bf16.msra.mxu1 %v12090_v41  ;;  %v11320_v6 = vpop.f32.mrb[68].mxu0  ;;  %v11322_v4 = vpop.f32.mrb[84].mxu1  ;;  %v12096_v41 = vld [vmem:[#allocation91_spill] sm:$0xff] }
 0x876   : > { %12091 = vst [vmem:[#allocation101_spill] sm:$0xff] %v11322_v4  ;;  %7620 = vmatprep.subr.bf16.mxu0 %v12092_v15  ;;  %7676 = vmatprep.subr.bf16.mxu1 %v12093_v47  ;;  %v11326_v22 = vpop.f32.mrb[69].mxu0  ;;  %v11328_v2 = vpop.f32.mrb[85].mxu1  ;;  %v12097_v47 = vld [vmem:[#allocation99_spill] sm:$0xff]  ;;  %v12098_v15 = vld [vmem:[#allocation100_spill] sm:$0xff] }
 0x879   : > { %7622 = vmatpush1.bf16.msra.mxu0 %v12094_v34  ;;  %7678 = vmatpush1.bf16.msra.mxu1 %v10748_v13  ;;  %v11332_v52 = vpop.f32.mrb[70].mxu0  ;;  %v11334_v49 = vpop.f32.mrb[86].mxu1  ;;  %v12099_v34 = vld [vmem:[#allocation103_spill] sm:$0xff]  ;;  %v12100_v13 = vld [vmem:[#allocation80_spill] sm:$0xff] }
 0x87a   : > { %12095 = vst [vmem:[#allocation102_spill] sm:$0xff] %v11334_v49  ;;  %7624 = vmatprep.subr.bf16.mxu0 %v12096_v41  ;;  %7680 = vmatprep.subr.bf16.mxu1 %v10774_v32  ;;  %v11342_v39 = vpop.f32.mrb[71].mxu0  ;;  %v11344_v36 = vpop.f32.mrb[87].mxu1  ;;  %v3603_v4 = vmul.f32 %v12100_v13, %v10381_v35 }
 0x87c   : > { %v3607_v49 = vadd.f32 %v3603_v4, %v10379_v61  ;;  %v12117_v4 = vld [vmem:[#allocation19_spill] sm:$0xff] }
 0x87d   : > { %7626 = vmatpush1.bf16.msra.mxu0 %v12013_v24  ;;  %7682 = vmatpush1.bf16.msra.mxu1 %v12014_v59 }
 0x87e   : > { %7628 = vmatprep.subr.bf16.mxu0 %v12015_v38  ;;  %7684 = vmatprep.subr.bf16.mxu1 %v12016_v48  ;;  %v3615_v13 = vmul.f32 0.01, %v3607_v49  ;;  %vm3611_vm15 = vcmp.ge.f32.partialorder %v3607_v49, 0.0 }
 0x881   : > { %7630 = vmatpush1.bf16.msra.mxu0 %v12017_v5  ;;  %7686 = vmatpush1.bf16.msra.mxu1 %v12097_v47 }
 0x882   : > { %7632 = vmatprep.subr.bf16.mxu0 %v12098_v15  ;;  %7688 = vmatprep.subr.bf16.mxu1 %v12020_v37 }
 0x885   : > { %7634 = vmatpush1.bf16.msra.mxu0 %v10868_v9  ;;  %7690 = vmatpush1.bf16.msra.mxu1 %v12021_v57 }
 0x886   : > { %7636 = vmatprep.subr.bf16.mxu0 %v10880_v29  ;;  %7692 = vmatprep.subr.bf16.mxu1 %v10882_v7 }
 0x889   : > { %7638 = vmatpush1.bf16.msra.mxu0 %v12099_v34  ;;  %7694 = vmatpush1.bf16.msra.mxu1 %v10906_v0 }
 0x88a   : > { %7640 = vmatprep.subr.bf16.mxu0 %v10913_v43  ;;  %7696 = vmatprep.subr.bf16.mxu1 %v10915_v14 }
 0x88d   : > { %7642 = vmatpush1.bf16.msra.mxu0 %v10928_v51  ;;  %7698 = vmatpush1.bf16.msra.mxu1 %v10930_v25 }
 0x88e   : > { %5803 = vmatprep.subr.msk.mxu0 %vm3687_vm0, %v10939_v50  ;;  %5807 = vmatprep.subr.msk.mxu1 %vm3687_vm0, %v10944_v16 }
 0x891   : > { %5804 = vmatpush1.msk.msra.mxu0 %vm3687_vm0, %v10955_v42  ;;  %5808 = vmatpush1.msk.msra.mxu1 %vm3687_vm0, %v10960_v33 }
 0x892   : > { %4736 = vmatmul.mubr.f32.vlgmr.msra.gmra.mrb[84].mxu0 %v11267_v11  ;;  %4813 = vmatmul.mubr.f32.vlgmr.msra.gmra.mrb[100].mxu1 %v11267_v11 }
 0x893   : > { %7700 = vmatprep.subr.bf16.mxu0 %v9825_v10  ;;  %7756 = vmatprep.subr.bf16.mxu1 %v9827_v30  ;;  %v11393_v10 = vsel %vm3611_vm15, %v3607_v49, %v3615_v13  ;;  %v12101_v30 = vld [vmem:[#allocation3_spill] sm:$0xff]  ;;  %v12118_v13 = vld [vmem:[#allocation20_spill] sm:$0xff] }
 0x894   : > { %5806 = vmatprep.mubr.msk.f32.mxu0 %vm3680_vm1, %v11275_v28  ;;  %5810 = vmatprep.mubr.msk.f32.mxu1 %vm3680_vm1, %v11275_v28 }
 0x895   : > { %7702 = vmatpush1.bf16.msra.mxu0 %v9863_v19  ;;  %7758 = vmatpush1.bf16.msra.mxu1 %v9865_v20  ;;  %v12102_v19 = vld [vmem:[#allocation4_spill] sm:$0xff]  ;;  %v12103_v20 = vld [vmem:[#allocation5_spill] sm:$0xff] }
 0x896   : > { %4742 = vmatmul.mubr.f32.gmra.mrb[86].mxu0 %v11284_v1  ;;  %4819 = vmatmul.mubr.f32.gmra.mrb[102].mxu1 %v11284_v1  ;;  %v12116_v1 = vld [vmem:[#allocation18_spill] sm:$0xff] }
 0x897   : > { %7704 = vmatprep.subr.bf16.mxu0 %v9873_v60  ;;  %7760 = vmatprep.subr.bf16.mxu1 %v9875_v63  ;;  %v12104_v60 = vld [vmem:[#allocation6_spill] sm:$0xff]  ;;  %v12105_v63 = vld [vmem:[#allocation7_spill] sm:$0xff] }
 0x898   : > { %5813 = vmatprep.mubr.msk.f32.mxu0 %vm3680_vm1, %v11393_v10  ;;  %5817 = vmatprep.mubr.msk.f32.mxu1 %vm3680_vm1, %v11393_v10 }
 0x899   : > { %7706 = vmatpush1.bf16.msra.mxu0 %v9905_v55  ;;  %7762 = vmatpush1.bf16.msra.mxu1 %v9907_v56  ;;  %v12106_v55 = vld [vmem:[#allocation8_spill] sm:$0xff]  ;;  %v12107_v56 = vld [vmem:[#allocation9_spill] sm:$0xff] }
 0x89a   : > { %7708 = vmatprep.subr.bf16.mxu0 %v9917_v62  ;;  %7764 = vmatprep.subr.bf16.mxu1 %v9919_v3  ;;  %v12108_v62 = vld [vmem:[#allocation10_spill] sm:$0xff]  ;;  %v12109_v3 = vld [vmem:[#allocation11_spill] sm:$0xff] }
 0x89d   : > { %7710 = vmatpush1.bf16.msra.mxu0 %v9941_v23  ;;  %7766 = vmatpush1.bf16.msra.mxu1 %v9943_v21  ;;  %v12110_v23 = vld [vmem:[#allocation12_spill] sm:$0xff]  ;;  %v12111_v21 = vld [vmem:[#allocation13_spill] sm:$0xff] }
 0x89e   : > { %7712 = vmatprep.subr.bf16.mxu0 %v9953_v26  ;;  %7768 = vmatprep.subr.bf16.mxu1 %v9955_v27  ;;  %v12112_v26 = vld [vmem:[#allocation14_spill] sm:$0xff]  ;;  %v12113_v27 = vld [vmem:[#allocation15_spill] sm:$0xff] }
 0x8a1   : > { %7714 = vmatpush1.bf16.msra.mxu0 %v9977_v45  ;;  %7770 = vmatpush1.bf16.msra.mxu1 %v9979_v40  ;;  %v12114_v45 = vld [vmem:[#allocation16_spill] sm:$0xff]  ;;  %v12115_v40 = vld [vmem:[#allocation17_spill] sm:$0xff] }
 0x8a2   : > { %7716 = vmatprep.subr.bf16.mxu0 %v9989_v44  ;;  %7772 = vmatprep.subr.bf16.mxu1 %v12101_v30  ;;  %v12119_v30 = vld [vmem:[#allocation21_spill] sm:$0xff] }
 0x8a5   : > { %7718 = vmatpush1.bf16.msra.mxu0 %v12102_v19  ;;  %7774 = vmatpush1.bf16.msra.mxu1 %v12103_v20 }
 0x8a6   : > { %7720 = vmatprep.subr.bf16.mxu0 %v12104_v60  ;;  %7776 = vmatprep.subr.bf16.mxu1 %v12105_v63  ;;  %v12120_v60 = vld [vmem:[#allocation22_spill] sm:$0xff]  ;;  %v12121_v63 = vld [vmem:[#allocation23_spill] sm:$0xff] }
 0x8a9   : > { %7722 = vmatpush1.bf16.msra.mxu0 %v12106_v55  ;;  %7778 = vmatpush1.bf16.msra.mxu1 %v12107_v56 }
 0x8aa   : > { %7724 = vmatprep.subr.bf16.mxu0 %v12108_v62  ;;  %7780 = vmatprep.subr.bf16.mxu1 %v12109_v3 }
 0x8ad   : > { %7726 = vmatpush1.bf16.msra.mxu0 %v12110_v23  ;;  %7782 = vmatpush1.bf16.msra.mxu1 %v12111_v21 }
 0x8ae   : > { %7728 = vmatprep.subr.bf16.mxu0 %v12112_v26  ;;  %7784 = vmatprep.subr.bf16.mxu1 %v12113_v27  ;;  %v12122_v26 = vld [vmem:[#allocation24_spill] sm:$0xff]  ;;  %v12123_v27 = vld [vmem:[#allocation25_spill] sm:$0xff] }
 0x8b1   : > { %7730 = vmatpush1.bf16.msra.mxu0 %v12114_v45  ;;  %7786 = vmatpush1.bf16.msra.mxu1 %v12115_v40  ;;  %v11425_v44 = vpop.f32.mrb[72].mxu0  ;;  %v11427_v28 = vpop.f32.mrb[88].mxu1  ;;  %v12124_v45 = vld [vmem:[#allocation28_spill] sm:$0xff]  ;;  %v12125_v40 = vld [vmem:[#allocation29_spill] sm:$0xff] }
 0x8b2   : > { %7732 = vmatprep.subr.bf16.mxu0 %v12116_v1  ;;  %7788 = vmatprep.subr.bf16.mxu1 %v12117_v4  ;;  %v11431_v49 = vpop.f32.mrb[73].mxu0  ;;  %v11433_v11 = vpop.f32.mrb[89].mxu1  ;;  %v12126_v1 = vld [vmem:[#allocation30_spill] sm:$0xff]  ;;  %v12127_v4 = vld [vmem:[#allocation31_spill] sm:$0xff] }
 0x8b5   : > { %7734 = vmatpush1.bf16.msra.mxu0 %v12118_v13  ;;  %7790 = vmatpush1.bf16.msra.mxu1 %v12119_v30  ;;  %v11437_v19 = vpop.f32.mrb[74].mxu0  ;;  %v11439_v20 = vpop.f32.mrb[90].mxu1  ;;  %v12128_v13 = vld [vmem:[#allocation76_spill] sm:$0xff] }
 0x8b6   : > { %7736 = vmatprep.subr.bf16.mxu0 %v12120_v60  ;;  %7792 = vmatprep.subr.bf16.mxu1 %v12121_v63  ;;  %v7941_v55 = vpack.c.bf16 %v11437_v19, %v11425_v44  ;;  %v7945_v56 = vpack.c.bf16 %v11439_v20, %v11427_v28  ;;  %v11447_v62 = vpop.f32.mrb[75].mxu0  ;;  %v11449_v3 = vpop.f32.mrb[91].mxu1  ;;  %v3602_v30 = vmul.f32 %v12128_v13, %v10381_v35  ;;  %v12129_v60 = vld [vmem:[#allocation32_spill] sm:$0xff]  ;;  %v12130_v63 = vld [vmem:[#allocation33_spill] sm:$0xff]  ;;  %v12138_v13 = vld [vmem:[#allocation42_spill] sm:$0xff] }
 0x8b7   : > { %v7939_v23 = vpack.c.bf16 %v11447_v62, %v11431_v49  ;;  %v7943_v21 = vpack.c.bf16 %v11449_v3, %v11433_v11  ;;  %v12137_v35 = vld [vmem:[#allocation40_spill] sm:$0xff] }
 0x8b9   : > { %7738 = vmatpush1.bf16.msra.mxu0 %v12122_v26  ;;  %7794 = vmatpush1.bf16.msra.mxu1 %v12123_v27  ;;  %v12131_v26 = vld [vmem:[#allocation34_spill] sm:$0xff]  ;;  %v12133_v27 = vld [vmem:[#allocation36_spill] sm:$0xff] }
 0x8ba   : > { %7740 = vmatprep.subr.bf16.mxu0 %v12044_v46  ;;  %7796 = vmatprep.subr.bf16.mxu1 %v12045_v53  ;;  %v12132_v46 = vld [vmem:[#allocation35_spill] sm:$0xff]  ;;  %v3606_v53 = vadd.f32 %v3602_v30, %v10379_v61  ;;  %v12141_v61 = vld [vmem:[#allocation93_spill] sm:$0xff] }
 0x8bb   : > { %v3617_v30 = vmul.f32 0.01, %v12141_v61  ;;  %vm3613_vm4 = vcmp.ge.f32.partialorder %v12141_v61, 0.0 }
 0x8bc   : > { %vm3610_vm3 = vcmp.ge.f32.partialorder %v3606_v53, 0.0 }
 0x8bd   : > { %7742 = vmatpush1.bf16.msra.mxu0 %v12124_v45  ;;  %7798 = vmatpush1.bf16.msra.mxu1 %v12125_v40  ;;  %v12134_v45 = vld [vmem:[#allocation37_spill] sm:$0xff]  ;;  %v12135_v40 = vld [vmem:[#allocation38_spill] sm:$0xff] }
 0x8be   : > { %7744 = vmatprep.subr.bf16.mxu0 %v12126_v1  ;;  %7800 = vmatprep.subr.bf16.mxu1 %v12127_v4  ;;  %v12136_v1 = vld [vmem:[#allocation39_spill] sm:$0xff]  ;;  %v3614_v4 = vmul.f32 0.01, %v3606_v53 }
 0x8c1   : > { %7746 = vmatpush1.bf16.msra.mxu0 %v12129_v60  ;;  %7802 = vmatpush1.bf16.msra.mxu1 %v12130_v63  ;;  %v12139_v60 = vld [vmem:[#allocation95_spill] sm:$0xff]  ;;  %v12140_v63 = vld [vmem:[#allocation96_spill] sm:$0xff] }
 0x8c2   : > { %7748 = vmatprep.subr.bf16.mxu0 %v12131_v26  ;;  %7804 = vmatprep.subr.bf16.mxu1 %v12132_v46  ;;  %v12142_v26 = vld [vmem:[#allocation90_spill] sm:$0xff] }
 0x8c3   : > { %v3616_v46 = vmul.f32 0.01, %v12142_v26  ;;  %vm3612_vm5 = vcmp.ge.f32.partialorder %v12142_v26, 0.0 }
 0x8c5   : > { %7750 = vmatpush1.bf16.msra.mxu0 %v12133_v27  ;;  %7806 = vmatpush1.bf16.msra.mxu1 %v12134_v45  ;;  %v12143_v27 = vld [vmem:[#allocation97_spill] sm:$0xff]  ;;  %v12144_v45 = vld [vmem:[#allocation98_spill] sm:$0xff] }
 0x8c6   : > { %7752 = vmatprep.subr.bf16.mxu0 %v12135_v40  ;;  %7808 = vmatprep.subr.bf16.mxu1 %v12136_v1  ;;  %v11487_v40 = vsel %vm3610_vm3, %v3606_v53, %v3614_v4  ;;  %v12145_v1 = vld [vmem:[#allocation45_spill] sm:$0xff]  ;;  %v12148_v4 = vld [vmem:[#allocation50_spill] sm:$0xff] }
 0x8c7   : > { %v12147_v53 = vld [vmem:[#allocation49_spill] sm:$0xff] }
 0x8c9   : > { %7754 = vmatpush1.bf16.msra.mxu0 %v12137_v35  ;;  %7810 = vmatpush1.bf16.msra.mxu1 %v12138_v13  ;;  %v12146_v35 = vld [vmem:[#allocation47_spill] sm:$0xff]  ;;  %v11495_v13 = vsel %vm3613_vm4, %v12141_v61, %v3617_v30  ;;  %v12150_v61 = vld [vmem:[#allocation53_spill] sm:$0xff] }
 0x8ca   : > { %5811 = vmatprep.subr.msk.mxu0 %vm3687_vm0, %v12139_v60  ;;  %5815 = vmatprep.subr.msk.mxu1 %vm3687_vm0, %v12140_v63  ;;  %v11504_v60 = vsel %vm3612_vm5, %v12142_v26, %v3616_v46  ;;  %v12149_v63 = vld [vmem:[#allocation51_spill] sm:$0xff]  ;;  %v12153_v26 = vld [vmem:[#allocation64_spill] sm:$0xff]  ;;  %v12155_v46 = vld [vmem:[#allocation66_spill] sm:$0xff] }
 0x8cb   : > { %v12151_v30 = vld [vmem:[#allocation55_spill] sm:$0xff] }
 0x8cd   : > { %5812 = vmatpush1.msk.msra.mxu0 %vm3687_vm0, %v12143_v27  ;;  %5816 = vmatpush1.msk.msra.mxu1 %vm3687_vm0, %v12144_v45  ;;  %v12152_v27 = vld [vmem:[#allocation56_spill] sm:$0xff]  ;;  %v12156_v45 = vld [vmem:[#allocation67_spill] sm:$0xff] }
 0x8ce   : > { %4896 = vmatmul.mubr.f32.vlgmr.msra.gmra.mrb[88].mxu0 %v11487_v40  ;;  %4973 = vmatmul.mubr.f32.vlgmr.msra.gmra.mrb[104].mxu1 %v11487_v40 }
 0x8cf   : > { %7812 = vmatprep.subr.bf16.mxu0 %v12145_v1  ;;  %7868 = vmatprep.subr.bf16.mxu1 %v12146_v35  ;;  %v12164_v1 = vld [vmem:[#allocation77_spill] sm:$0xff]  ;;  %v12165_v35 = vld [vmem:[#allocation78_spill] sm:$0xff] }
 0x8d0   : > { %5814 = vmatprep.mubr.msk.f32.mxu0 %vm3680_vm1, %v11495_v13  ;;  %5818 = vmatprep.mubr.msk.f32.mxu1 %vm3680_vm1, %v11495_v13 }
 0x8d1   : > { %7814 = vmatpush1.bf16.msra.mxu0 %v12147_v53  ;;  %7870 = vmatpush1.bf16.msra.mxu1 %v12148_v4  ;;  %v12166_v53 = vld [vmem:[#allocation81_spill] sm:$0xff]  ;;  %v12167_v4 = vld [vmem:[#allocation82_spill] sm:$0xff] }
 0x8d2   : > { %4902 = vmatmul.mubr.f32.gmra.mrb[90].mxu0 %v11504_v60  ;;  %4979 = vmatmul.mubr.f32.gmra.mrb[106].mxu1 %v11504_v60 }
 0x8d3   : > { %7816 = vmatprep.subr.bf16.mxu0 %v12149_v63  ;;  %7872 = vmatprep.subr.bf16.mxu1 %v12150_v61  ;;  %v12168_v63 = vld [vmem:[#allocation83_spill] sm:$0xff]  ;;  %v12169_v61 = vld [vmem:[#allocation84_spill] sm:$0xff] }
 0x8d4   : > { %5821 = vmatprep.mubr.msk.f32.mxu0 %vm3680_vm1, %v11393_v10  ;;  %5825 = vmatprep.mubr.msk.f32.mxu1 %vm3680_vm1, %v11393_v10  ;;  %v12154_v10 = vld [vmem:[#allocation65_spill] sm:$0xff] }
 0x8d5   : > { %7818 = vmatpush1.bf16.msra.mxu0 %v12151_v30  ;;  %7874 = vmatpush1.bf16.msra.mxu1 %v12152_v27 }
 0x8d6   : > { %7820 = vmatprep.subr.bf16.mxu0 %v12075_v18  ;;  %7876 = vmatprep.subr.bf16.mxu1 %v12076_v8  ;;  %v12157_v18 = vld [vmem:[#allocation68_spill] sm:$0xff]  ;;  %v12158_v8 = vld [vmem:[#allocation69_spill] sm:$0xff] }
 0x8d9   : > { %7822 = vmatpush1.bf16.msra.mxu0 %v12077_v54  ;;  %7878 = vmatpush1.bf16.msra.mxu1 %v12078_v31  ;;  %v12159_v54 = vld [vmem:[#allocation70_spill] sm:$0xff]  ;;  %v12160_v31 = vld [vmem:[#allocation71_spill] sm:$0xff] }
 0x8da   : > { %7824 = vmatprep.subr.bf16.mxu0 %v12079_v17  ;;  %7880 = vmatprep.subr.bf16.mxu1 %v12080_v12  ;;  %v12161_v17 = vld [vmem:[#allocation72_spill] sm:$0xff]  ;;  %v12162_v12 = vld [vmem:[#allocation73_spill] sm:$0xff] }
 0x8dd   : > { %7826 = vmatpush1.bf16.msra.mxu0 %v12081_v58  ;;  %7882 = vmatpush1.bf16.msra.mxu1 %v12153_v26  ;;  %v12163_v58 = vld [vmem:[#allocation74_spill] sm:$0xff]  ;;  %v12170_v26 = vld [vmem:[#allocation85_spill] sm:$0xff] }
 0x8de   : > { %7828 = vmatprep.subr.bf16.mxu0 %v12154_v10  ;;  %7884 = vmatprep.subr.bf16.mxu1 %v12155_v46  ;;  %v12171_v10 = vld [vmem:[#allocation86_spill] sm:$0xff] }
 0x8e1   : > { %7830 = vmatpush1.bf16.msra.mxu0 %v12156_v45  ;;  %7886 = vmatpush1.bf16.msra.mxu1 %v12157_v18  ;;  %v12172_v18 = vld [vmem:[#allocation87_spill] sm:$0xff] }
 0x8e2   : > { %7832 = vmatprep.subr.bf16.mxu0 %v12158_v8  ;;  %7888 = vmatprep.subr.bf16.mxu1 %v12159_v54  ;;  %v12173_v8 = vld [vmem:[#allocation88_spill] sm:$0xff] }
 0x8e5   : > { %7834 = vmatpush1.bf16.msra.mxu0 %v12160_v31  ;;  %7890 = vmatpush1.bf16.msra.mxu1 %v12161_v17 }
 0x8e6   : > { %7836 = vmatprep.subr.bf16.mxu0 %v12162_v12  ;;  %7892 = vmatprep.subr.bf16.mxu1 %v12163_v58 }
 0x8e9   : > { %7838 = vmatpush1.bf16.msra.mxu0 %v12164_v1  ;;  %7894 = vmatpush1.bf16.msra.mxu1 %v12165_v35 }
 0x8ea   : > { %7840 = vmatprep.subr.bf16.mxu0 %v12166_v53  ;;  %7896 = vmatprep.subr.bf16.mxu1 %v12167_v4 }
 0x8ed   : > { %7842 = vmatpush1.bf16.msra.mxu0 %v12168_v63  ;;  %7898 = vmatpush1.bf16.msra.mxu1 %v12169_v61  ;;  %v4423_v30 = vpop.f32.mrb[76].mxu0  ;;  %v4500_v27 = vpop.f32.mrb[92].mxu1 }
 0x8ee   : > { %7844 = vmatprep.subr.bf16.mxu0 %v12170_v26  ;;  %7900 = vmatprep.subr.bf16.mxu1 %v12171_v10  ;;  %v4425_v46 = vpop.f32.mrb[77].mxu0  ;;  %v4502_v45 = vpop.f32.mrb[93].mxu1 }
 0x8f1   : > { %7846 = vmatpush1.bf16.msra.mxu0 %v12172_v18  ;;  %7902 = vmatpush1.bf16.msra.mxu1 %v12173_v8  ;;  %v4429_v54 = vpop.f32.mrb[78].mxu0  ;;  %v4506_v31 = vpop.f32.mrb[94].mxu1 }
 0x8f2   : > { %7848 = vmatprep.subr.bf16.mxu0 %v12096_v41  ;;  %7904 = vmatprep.subr.bf16.mxu1 %v10774_v32  ;;  %v7949_v17 = vpack.c.bf16 %v4429_v54, %v4423_v30  ;;  %v7953_v12 = vpack.c.bf16 %v4506_v31, %v4500_v27  ;;  %v4431_v58 = vpop.f32.mrb[79].mxu0  ;;  %v4508_v1 = vpop.f32.mrb[95].mxu1 }
 0x8f3   : > { %v7947_v35 = vpack.c.bf16 %v4431_v58, %v4425_v46  ;;  %v7951_v53 = vpack.c.bf16 %v4508_v1, %v4502_v45 }
 0x8f5   : > { %7850 = vmatpush1.bf16.msra.mxu0 %v12013_v24  ;;  %7906 = vmatpush1.bf16.msra.mxu1 %v12014_v59 }
 0x8f6   : > { %7852 = vmatprep.subr.bf16.mxu0 %v12015_v38  ;;  %7908 = vmatprep.subr.bf16.mxu1 %v12016_v48  ;;  %v12175_v48 = vld [vmem:[#allocation43_spill] sm:$0xff] }
 0x8f9   : > { %7854 = vmatpush1.bf16.msra.mxu0 %v12017_v5  ;;  %7910 = vmatpush1.bf16.msra.mxu1 %v12097_v47 }
 0x8fa   : > { %7856 = vmatprep.subr.bf16.mxu0 %v12098_v15  ;;  %7912 = vmatprep.subr.bf16.mxu1 %v12020_v37  ;;  %v12177_v37 = vld [vmem:[#allocation52_spill] sm:$0xff] }
 0x8fd   : > { %7858 = vmatpush1.bf16.msra.mxu0 %v10868_v9  ;;  %7914 = vmatpush1.bf16.msra.mxu1 %v12021_v57  ;;  %v12174_v57 = vld [vmem:[#allocation46_spill] sm:$0xff]  ;;  %v12183_v9 = vld [vmem:[#allocation44_spill] sm:$0xff] }
 0x8fe   : > { %7860 = vmatprep.subr.bf16.mxu0 %v10880_v29  ;;  %7916 = vmatprep.subr.bf16.mxu1 %v10882_v7  ;;  %v12176_v5 = vpack.c.bf16 %v12174_v57, %v12175_v48  ;;  %v12180_v29 = vld [vmem:[#allocation94_spill] sm:$0xff] }
 0x8ff   : > { %v12181_v7 = vld [vmem:[#allocation54_spill] sm:$0xff] }
 0x901   : > { %7862 = vmatpush1.bf16.msra.mxu0 %v12099_v34  ;;  %7918 = vmatpush1.bf16.msra.mxu1 %v10906_v0  ;;  %v12184_v0 = vld [vmem:[#allocation41_spill] sm:$0xff] }
 0x902   : > { %7864 = vmatprep.subr.bf16.mxu0 %v10913_v43  ;;  %7920 = vmatprep.subr.bf16.mxu1 %v10915_v14  ;;  %v12178_v43 = vld [vmem:[#allocation48_spill] sm:$0xff]  ;;  %v12182_v14 = vpack.c.bf16 %v12180_v29, %v12181_v7 }
 0x903   : > { %v12179_v32 = vpack.c.bf16 %v12177_v37, %v12178_v43  ;;  %v5148_v43 = vpop.permute.xlu0 %5147 }
 0x905   : > { %7866 = vmatpush1.bf16.msra.mxu0 %v10928_v51  ;;  %7922 = vmatpush1.bf16.msra.mxu1 %v10930_v25  ;;  %v12185_v51 = vpack.c.bf16 %v12183_v9, %v12184_v0  ;;  %v12186_v25 = vpack.c.bf16 %v11342_v39, %v11326_v22 }
 0x906   : > { %5819 = vmatprep.subr.msk.mxu0 %vm3687_vm0, %v10939_v50  ;;  %5823 = vmatprep.subr.msk.mxu1 %vm3687_vm0, %v10944_v16  ;;  %v12187_v50 = vpack.c.bf16 %v11332_v52, %v11320_v6  ;;  %v12188_v16 = vpack.c.bf16 %v11344_v36, %v11328_v2 }
 0x909   : > { %5820 = vmatpush1.msk.msra.mxu0 %vm3687_vm0, %v10955_v42  ;;  %5824 = vmatpush1.msk.msra.mxu1 %vm3687_vm0, %v10960_v33  ;;  %v12189_v42 = vld [vmem:[#allocation102_spill] sm:$0xff]  ;;  %v12190_v33 = vld [vmem:[#allocation101_spill] sm:$0xff]  ;;  %vm5240_vm0 = vcmask 556036  }
 0x90a   : > { %5050 = vmatmul.mubr.f32.vlgmr.msra.gmra.mrb[92].mxu0 %v11487_v40  ;;  %5127 = vmatmul.mubr.f32.vlgmr.msra.gmra.mrb[108].mxu1 %v11487_v40  ;;  %v12191_v38 = vpack.c.bf16 %v12189_v42, %v12190_v33 }
 0x90b   : > { %7924 = vmatprep.subr.bf16.mxu0 %v12176_v5  ;;  %5822 = vmatprep.mubr.msk.f32.mxu0 %vm3680_vm1, %v11495_v13 }
 0x90c   : > { %5826 = vmatprep.mubr.msk.f32.mxu1 %vm3680_vm1, %v11495_v13  ;;  %7926 = vmatpush1.bf16.msra.mxu0 %v12179_v32  ;;  %vm5241_vm1 = vmor %vm5240_vm0, %vm1586_vm2 }
 0x90d   : > { %7928 = vmatprep.subr.bf16.mxu0 %v12182_v14 }
 0x90e   : > { %5056 = vmatmul.mubr.f32.gmra.mrb[94].mxu0 %v11504_v60  ;;  %5133 = vmatmul.mubr.f32.gmra.mrb[110].mxu1 %v11504_v60 }
 0x910   : > { %7930 = vmatpush1.bf16.msra.mxu0 %v12185_v51 }
 0x911   : > { %7932 = vmatprep.subr.bf16.mxu0 %v12186_v25 }
 0x914   : > { %7934 = vmatpush1.bf16.msra.mxu0 %v12187_v50 }
 0x915   : > { %7936 = vmatprep.subr.bf16.mxu0 %v12188_v16 }
 0x918   : > { %7938 = vmatpush1.bf16.msra.mxu0 %v12191_v38 }
 0x919   : > { %7940 = vmatprep.subr.bf16.mxu0 %v7939_v23  ;;  %v5139_v23 = vld [vmem:[%s11644_s17] sm:$0xff] }
 0x91a   : > { %v5151_v13 = vcombine.high %v5139_v23, %v5139_v23 }
 0x91c   : > { %7942 = vmatpush1.bf16.msra.mxu0 %v7941_v55  ;;  %5217 = vmatprep.mubr.f32.mxu0 %v5151_v13 }
 0x91d   : > { %7944 = vmatprep.subr.bf16.mxu0 %v7943_v21 }
 0x920   : > { %7946 = vmatpush1.bf16.msra.mxu0 %v7945_v56 }
 0x921   : > { %7948 = vmatprep.subr.bf16.mxu0 %v7947_v35 }
 0x924   : > { %7950 = vmatpush1.bf16.msra.mxu0 %v7949_v17 }
 0x925   : > { %7952 = vmatprep.subr.bf16.mxu0 %v7951_v53 }
 0x928   : > { %7954 = vmatpush1.bf16.msra.mxu0 %v7953_v12 }
 0x929   : > { %v4583_v36 = vpop.f32.mrb[80].mxu0  ;;  %v4660_v2 = vpop.f32.mrb[96].mxu1 }
 0x92a   : > { %v4585_v22 = vpop.f32.mrb[81].mxu0  ;;  %v4662_v6 = vpop.f32.mrb[97].mxu1 }
 0x92d   : > { %v4589_v15 = vpop.f32.mrb[82].mxu0  ;;  %v4666_v47 = vpop.f32.mrb[98].mxu1 }
 0x92e   : > { %v7957_v59 = vpack.c.bf16 %v4589_v15, %v4583_v36  ;;  %v7961_v41 = vpack.c.bf16 %v4666_v47, %v4660_v2  ;;  %v4591_v24 = vpop.f32.mrb[83].mxu0  ;;  %v4668_v52 = vpop.f32.mrb[99].mxu1 }
 0x92f   : > { %v7955_v39 = vpack.c.bf16 %v4591_v24, %v4585_v22  ;;  %v7959_v34 = vpack.c.bf16 %v4668_v52, %v4662_v6 }
 0x931   : > { %7956 = vmatprep.subr.bf16.mxu0 %v7955_v39 }
 0x932   : > { %7958 = vmatpush1.bf16.msra.mxu0 %v7957_v59 }
 0x933   : > { %7960 = vmatprep.subr.bf16.mxu0 %v7959_v34 }
 0x936   : > { %7962 = vmatpush1.bf16.msra.mxu0 %v7961_v41 }
 0x965   : > { %v4737_v44 = vpop.f32.mrb[84].mxu0  ;;  %v4814_v28 = vpop.f32.mrb[100].mxu1 }
 0x966   : > { %v4739_v49 = vpop.f32.mrb[85].mxu0  ;;  %v4816_v11 = vpop.f32.mrb[101].mxu1 }
 0x969   : > { %v4743_v19 = vpop.f32.mrb[86].mxu0  ;;  %v4820_v20 = vpop.f32.mrb[102].mxu1 }
 0x96a   : > { %v7965_v55 = vpack.c.bf16 %v4743_v19, %v4737_v44  ;;  %v7969_v56 = vpack.c.bf16 %v4820_v20, %v4814_v28  ;;  %v4745_v62 = vpop.f32.mrb[87].mxu0  ;;  %v4822_v3 = vpop.f32.mrb[103].mxu1 }
 0x96b   : > { %v7963_v21 = vpack.c.bf16 %v4745_v62, %v4739_v49  ;;  %v7967_v40 = vpack.c.bf16 %v4822_v3, %v4816_v11 }
 0x96d   : > { %7964 = vmatprep.subr.bf16.mxu0 %v7963_v21 }
 0x96e   : > { %7966 = vmatpush1.bf16.msra.mxu0 %v7965_v55 }
 0x96f   : > { %7968 = vmatprep.subr.bf16.mxu0 %v7967_v40 }
 0x972   : > { %7970 = vmatpush1.bf16.msra.mxu0 %v7969_v56 }
 0x9a1   : > { %v4897_v60 = vpop.f32.mrb[88].mxu0  ;;  %v4974_v4 = vpop.f32.mrb[104].mxu1 }
 0x9a2   : > { %v4899_v63 = vpop.f32.mrb[89].mxu0  ;;  %v4976_v61 = vpop.f32.mrb[105].mxu1 }
 0x9a5   : > { %v4903_v30 = vpop.f32.mrb[90].mxu0  ;;  %v4980_v27 = vpop.f32.mrb[106].mxu1 }
 0x9a6   : > { %v7973_v26 = vpack.c.bf16 %v4903_v30, %v4897_v60  ;;  %v7977_v10 = vpack.c.bf16 %v4980_v27, %v4974_v4  ;;  %v4905_v46 = vpop.f32.mrb[91].mxu0  ;;  %v4982_v45 = vpop.f32.mrb[107].mxu1 }
 0x9a7   : > { %v7971_v18 = vpack.c.bf16 %v4905_v46, %v4899_v63  ;;  %v7975_v8 = vpack.c.bf16 %v4982_v45, %v4976_v61 }
 0x9a9   : > { %7972 = vmatprep.subr.bf16.mxu0 %v7971_v18 }
 0x9aa   : > { %7974 = vmatpush1.bf16.msra.mxu0 %v7973_v26 }
 0x9ab   : > { %7976 = vmatprep.subr.bf16.mxu0 %v7975_v8 }
 0x9ae   : > { %7978 = vmatpush1.bf16.msra.mxu0 %v7977_v10 }
 0x9dd   : > { %v5051_v54 = vpop.f32.mrb[92].mxu0  ;;  %v5128_v31 = vpop.f32.mrb[108].mxu1 }
 0x9de   : > { %v5053_v17 = vpop.f32.mrb[93].mxu0  ;;  %v5130_v12 = vpop.f32.mrb[109].mxu1 }
 0x9e1   : > { %v5057_v58 = vpop.f32.mrb[94].mxu0  ;;  %v5134_v1 = vpop.f32.mrb[110].mxu1 }
 0x9e2   : > { %v7981_v35 = vpack.c.bf16 %v5057_v58, %v5051_v54  ;;  %v7985_v53 = vpack.c.bf16 %v5134_v1, %v5128_v31  ;;  %v5059_v57 = vpop.f32.mrb[95].mxu0  ;;  %v5136_v48 = vpop.f32.mrb[111].mxu1 }
 0x9e3   : > { %v7979_v5 = vpack.c.bf16 %v5059_v57, %v5053_v17  ;;  %v7983_v37 = vpack.c.bf16 %v5136_v48, %v5130_v12 }
 0x9e5   : > { %7980 = vmatprep.subr.bf16.mxu0 %v7979_v5 }
 0x9e6   : > { %7982 = vmatpush1.bf16.msra.mxu0 %v7981_v35 }
 0x9e7   : > { %7984 = vmatprep.subr.bf16.mxu0 %v7983_v37 }
 0x9ea   : > { %7986 = vmatpush1.bf16.msra.mxu0 %v7985_v53 }
 0x9ed   : > { %5218 = vmatmul.mubr.f32.vlgmr.msra.gmra.mrb[96].mxu0 %v5139_v23 }
 0xac0   : > { %v5219_v32 = vpop.f32.mrb[96].mxu0 }
 0xac1   : > { %v5220_v29 = vadd.f32 %v5219_v32, %v5148_v43  ;;  %v5221_v7 = vpop.f32.mrb[97].mxu0 }
 0xac2   : > { %v5222_v14 = vadd.f32 %v5221_v7, %v5148_v43 }
 0xac3   : > { %v5224_v9 = vsub.f32 0.0, %v5220_v29 }
 0xac4   : > { %v5225_v0 = vsub.f32 0.0, %v5222_v14 }
 0xac5   : > { %v5226_v51 = vmul.f32 1.442695, %v5224_v9 }
 0xac6   : > { %v5228_v25 = vmul.f32 1.442695, %v5225_v0 }
 0xac7   : > { %8011 = vpow2.f32 %v5226_v51 }
 0xac8   : > { %8013 = vpow2.f32 %v5228_v25 }
 0xad1   : > { %v8012_v50 = vpop.eup %8011 }
 0xad2   : > { %v8014_v16 = vpop.eup %8013  ;;  %v5230_v42 = vadd.f32 1.0, %v8012_v50 }
 0xad3   : > { %v5231_v33 = vadd.f32 1.0, %v8014_v16 }
 0xad4   : > { %8015 = vrcp.f32 %v5230_v42 }
 0xad5   : > { %8017 = vrcp.f32 %v5231_v33 }
 0xade   : > { %v8016_v38 = vpop.eup %8015 }
 0xadf   : > { %v8018_v36 = vpop.eup %8017 }
 0xae0   : > { %v5238_v2 = vcombine.low %v8016_v38, %v8018_v36 }
 0xae2   : > { %5242 = vst.msk [vmem:[%s598_s3] sm:$0xff] %vm5241_vm1, %v5238_v2 }
 0xae3 PF: > { %s31_s20 = sadd.s32 1, %s8029_s20  }
 0xae4   : > { %p28_p4 = scmp.ge.s32.totalorder %s31_s20, 4  }
 0xae6   :  { %30 = sbr.rel (!%p28_p4) target bundleno = 5 (0x5), region = 147 }

</bundles_post_ra>
